<compile_context>
chip_gen: v5e
topology: v5e:2x2
jax: 0.10.0
libtpu: 0.0.40
codegen_flags: <defaults>
</compile_context>

<pallas_src>
import jax
import jax.numpy as jnp
from jax import lax
from jax.experimental import pallas as pl
from jax.experimental.pallas import tpu as pltpu

HP = 128  # lane-tile width; each GRU gate block is padded to one 128-lane tile


def make_gru_gaussian_kernel(num_layers, hidden):
    """One kernel invocation = whole sequence: stacked GRU + gaussian readout."""
    H = hidden
    L = num_layers

    def gru_cell(gi, gh, h, bhn):
        # gi/gh: (B, 3*HP); gate blocks live at lane offsets 0 / HP / 2*HP, so all
        # slices below are 128-lane-tile aligned (no lane rotates).
        r = jax.nn.sigmoid(gi[:, 0:H] + gh[:, 0:H])
        z = jax.nn.sigmoid(gi[:, HP:HP + H] + gh[:, HP:HP + H])
        n = jnp.tanh(gi[:, 2 * HP:2 * HP + H] + r * (gh[:, 2 * HP:2 * HP + H] + bhn))
        return (1.0 - z) * n + z * h                 # PyTorch GRU update

    def kernel(*refs):
        # refs: x, [w_in, w_hid, b_gi, b_hn] * L, w_ro, b_ro, out
        x_ref = refs[0]                               # (B, T, D) batch-first
        lrefs = refs[1:1 + 4 * L]
        w_ro_ref = refs[1 + 4 * L]                    # (H, out_dim)
        b_ro_ref = refs[2 + 4 * L]                    # (1, out_dim)
        out_ref = refs[3 + 4 * L]                     # (B, T, out_dim)

        B, T, D = x_ref.shape
        f32 = jnp.float32

        # Load all (small) weights once.
        Ws = [tuple(lrefs[4 * l + i][...] for i in range(4)) for l in range(L)]
        W0, U0, bgi0, bhn0 = Ws[0]

        # Hoisted layer-0 input projection (with folded b_ih + b_hh[r,z] biases),
        # computed per batch row directly from the batch-first input: no transposes.
        gi0 = [jnp.dot(x_ref[b].astype(f32), W0, preferred_element_type=f32) + bgi0
               for b in range(B)]                     # each (T, 3*HP)
        # Pre-built per-step (B, 3*HP) tiles — independent of the recurrence, so
        # these shuffles sit off the serial critical path.
        gi0_t = [jnp.concatenate([gi0[b][t:t + 1, :] for b in range(B)], axis=0)
                 for t in range(T)]

        # Hoist bias broadcasts out of the unrolled time loop (no CSE of broadcasts).
        bhn_b = [jnp.broadcast_to(Ws[l][3], (B, H)) for l in range(L)]
        bgi_b = [None] + [jnp.broadcast_to(Ws[l][2], (B, 3 * HP)) for l in range(1, L)]

        hs = [jnp.zeros((B, H), f32) for _ in range(L)]   # register-resident states
        outs = []
        for t in range(T):                            # static T -> fully unrolled
            # layer 0 step t (input projection already hoisted)
            gh = jnp.dot(hs[0], Ws[0][1], preferred_element_type=f32)      # (B, 3*HP)
            hs[0] = gru_cell(gi0_t[t], gh, hs[0], bhn_b[0])
            # layers 1..L-1, wavefront-interleaved in the same time loop
            for l in range(1, L):
                gi = jnp.dot(hs[l - 1], Ws[l][0], preferred_element_type=f32) + bgi_b[l]
                gh = jnp.dot(hs[l], Ws[l][1], preferred_element_type=f32)
                hs[l] = gru_cell(gi, gh, hs[l], bhn_b[l])
            outs.append(hs[L - 1])

        # Gaussian readout + direct (B, T, out_dim) writeback (one store per batch row).
        w_ro = w_ro_ref[...]
        b_ro = b_ro_ref[...]
        for b in range(B):
            hb = jnp.concatenate([outs[t][b:b + 1, :] for t in range(T)], axis=0)  # (T, H)
            yb = jnp.dot(hb, w_ro, preferred_element_type=f32) + b_ro              # (T, od)
            out_ref[b] = yb.astype(out_ref.dtype)

    return kernel


def approx_gen_model_gru_gaussian(x, kernel_params):
    """x: (B, T, input_dim), batch-first like the PyTorch module. Returns (B, T, 2*target_dim)."""
    layer_params, w_ro, b_ro = kernel_params
    B, T, D = x.shape
    L = len(layer_params)
    H = layer_params[0][3].shape[1]                  # b_hn is (1, H)
    out_dim = w_ro.shape[1]

    flat = [x]
    for lp in layer_params:
        flat.extend(lp)
    flat.extend([w_ro, b_ro])

    in_specs = [pl.BlockSpec(memory_space=pltpu.MemorySpace.VMEM) for _ in flat]

    return pl.pallas_call(
        make_gru_gaussian_kernel(L, H),
        out_shape=jax.ShapeDtypeStruct((B, T, out_dim), jnp.float32),
        in_specs=in_specs,
        out_specs=pl.BlockSpec(memory_space=pltpu.MemorySpace.VMEM),
    )(*flat)


def init_params_torch_layout(key, input_dim, hidden, num_layers, target_dim):
    """Synthetic params in the exact torch.nn.GRU / nn.Linear layout."""
    k = float(hidden) ** -0.5
    keys = jax.random.split(key, num_layers * 4 + 2)
    idx = 0
    layers = []
    in_dim = input_dim
    for _ in range(num_layers):
        w_ih = jax.random.uniform(keys[idx], (3 * hidden, in_dim), jnp.float32, -k, k); idx += 1
        w_hh = jax.random.uniform(keys[idx], (3 * hidden, hidden), jnp.float32, -k, k); idx += 1
        b_ih = jax.random.uniform(keys[idx], (3 * hidden,), jnp.float32, -k, k); idx += 1
        b_hh = jax.random.uniform(keys[idx], (3 * hidden,), jnp.float32, -k, k); idx += 1
        layers.append((w_ih, w_hh, b_ih, b_hh))
        in_dim = hidden
    out_dim = 2 * target_dim                          # 'gaussian' head: mean + variance params
    w_ro = jax.random.uniform(keys[idx], (out_dim, hidden), jnp.float32, -k, k); idx += 1
    b_ro = jax.random.uniform(keys[idx], (out_dim,), jnp.float32, -k, k)
    return layers, w_ro, b_ro


def prepare_kernel_params(torch_params, hidden):
    """Pack torch-layout weights: transpose, gate blocks at 128-lane boundaries, fold r/z biases."""
    layers, w_ro, b_ro = torch_params
    H = hidden

    def pack_w(w):       # torch (3H, K) -> (K, 3*HP): columns [g*HP : g*HP+H] = W_g^T
        K = w.shape[1]
        out = jnp.zeros((K, 3 * HP), jnp.float32)
        for g in range(3):
            out = out.at[:, g * HP:g * HP + H].set(jnp.transpose(w[g * H:(g + 1) * H, :]))
        return out

    def pack_b(b):       # (3H,) -> (1, 3*HP)
        out = jnp.zeros((1, 3 * HP), jnp.float32)
        for g in range(3):
            out = out.at[0, g * HP:g * HP + H].set(b[g * H:(g + 1) * H])
        return out

    kp_layers = []
    for (w_ih, w_hh, b_ih, b_hh) in layers:
        # Fold b_ih (all gates) + b_hh (r,z gates) into the input-projection bias;
        # b_hh_n stays separate (it is scaled by r inside the cell).
        b_gi = b_ih + jnp.concatenate([b_hh[:2 * H], jnp.zeros((H,), b_hh.dtype)])
        kp_layers.append((pack_w(w_ih), pack_w(w_hh), pack_b(b_gi),
                          b_hh[2 * H:][None, :].astype(jnp.float32)))
    return kp_layers, jnp.transpose(w_ro).astype(jnp.float32), b_ro[None, :].astype(jnp.float32)


def gru_gaussian_ref(x, torch_params):
    """Pure-JAX reference with torch.nn.GRU semantics + Linear readout."""
    layers, w_ro, b_ro = torch_params
    B, T, _ = x.shape
    h_seq = x
    for (w_ih, w_hh, b_ih, b_hh) in layers:
        H = w_hh.shape[1]

        def step(h_prev, x_t, w_ih=w_ih, w_hh=w_hh, b_ih=b_ih, b_hh=b_hh, H=H):
            gi = x_t @ w_ih.T + b_ih
            gh = h_prev @ w_hh.T + b_hh
            r = jax.nn.sigmoid(gi[:, :H] + gh[:, :H])
            z = jax.nn.sigmoid(gi[:, H:2 * H] + gh[:, H:2 * H])
            n = jnp.tanh(gi[:, 2 * H:] + r * gh[:, 2 * H:])
            h_new = (1.0 - z) * n + z * h_prev
            return h_new, h_new

        h0 = jnp.zeros((B, H), jnp.float32)
        _, outs = lax.scan(step, h0, jnp.transpose(h_seq, (1, 0, 2)))
        h_seq = jnp.transpose(outs, (1, 0, 2))
    return h_seq @ w_ro.T + b_ro


if __name__ == "__main__":
    B, T = 2, 8
    input_dim, target_dim, hidden, num_layers = 16, 8, 32, 2

    key = jax.random.PRNGKey(0)
    kx, kp = jax.random.split(key)
    x = jax.random.normal(kx, (B, T, input_dim), dtype=jnp.float32)

    torch_params = init_params_torch_layout(kp, input_dim, hidden, num_layers, target_dim)
    kernel_params = prepare_kernel_params(torch_params, hidden)

    out = approx_gen_model_gru_gaussian(x, kernel_params)
    out = jax.block_until_ready(out)

    ref = gru_gaussian_ref(x, torch_params)
    assert out.shape == (B, T, 2 * target_dim), out.shape
    assert jnp.allclose(out, ref, atol=1e-4, rtol=1e-4), float(jnp.max(jnp.abs(out - ref)))
    print("KERNEL_OK")
</pallas_src>

<mosaic_0001>
module attributes {stable_mosaic.version = 11 : i64} {
  func.func @kernel(%arg0: memref<2x8x16xf32, #tpu.memory_space<vmem>>, %arg1: memref<16x384xf32, #tpu.memory_space<vmem>>, %arg2: memref<32x384xf32, #tpu.memory_space<vmem>>, %arg3: memref<1x384xf32, #tpu.memory_space<vmem>>, %arg4: memref<1x32xf32, #tpu.memory_space<vmem>>, %arg5: memref<32x384xf32, #tpu.memory_space<vmem>>, %arg6: memref<32x384xf32, #tpu.memory_space<vmem>>, %arg7: memref<1x384xf32, #tpu.memory_space<vmem>>, %arg8: memref<1x32xf32, #tpu.memory_space<vmem>>, %arg9: memref<32x16xf32, #tpu.memory_space<vmem>>, %arg10: memref<1x16xf32, #tpu.memory_space<vmem>>, %arg11: memref<2x8x16xf32, #tpu.memory_space<vmem>>) attributes {dimension_semantics = [], scalar_prefetch = 0 : i64, scratch_operands = 0 : i64, tpu.core_type = #tpu.core_type<tc>} {
    %c0 = arith.constant 0 : index
    %c0_0 = arith.constant 0 : index
    %0 = vector.load %arg1[%c0, %c0_0] : memref<16x384xf32, #tpu.memory_space<vmem>>, vector<16x384xf32>
    %c0_1 = arith.constant 0 : index
    %c0_2 = arith.constant 0 : index
    %1 = vector.load %arg2[%c0_1, %c0_2] : memref<32x384xf32, #tpu.memory_space<vmem>>, vector<32x384xf32>
    %c0_3 = arith.constant 0 : index
    %c0_4 = arith.constant 0 : index
    %2 = vector.load %arg3[%c0_3, %c0_4] : memref<1x384xf32, #tpu.memory_space<vmem>>, vector<1x384xf32>
    %c0_5 = arith.constant 0 : index
    %c0_6 = arith.constant 0 : index
    %3 = vector.load %arg4[%c0_5, %c0_6] : memref<1x32xf32, #tpu.memory_space<vmem>>, vector<1x32xf32>
    %c0_7 = arith.constant 0 : index
    %c0_8 = arith.constant 0 : index
    %4 = vector.load %arg5[%c0_7, %c0_8] : memref<32x384xf32, #tpu.memory_space<vmem>>, vector<32x384xf32>
    %c0_9 = arith.constant 0 : index
    %c0_10 = arith.constant 0 : index
    %5 = vector.load %arg6[%c0_9, %c0_10] : memref<32x384xf32, #tpu.memory_space<vmem>>, vector<32x384xf32>
    %c0_11 = arith.constant 0 : index
    %c0_12 = arith.constant 0 : index
    %6 = vector.load %arg7[%c0_11, %c0_12] : memref<1x384xf32, #tpu.memory_space<vmem>>, vector<1x384xf32>
    %c0_13 = arith.constant 0 : index
    %c0_14 = arith.constant 0 : index
    %7 = vector.load %arg8[%c0_13, %c0_14] : memref<1x32xf32, #tpu.memory_space<vmem>>, vector<1x32xf32>
    %c0_15 = arith.constant 0 : index
    %c0_16 = arith.constant 0 : index
    %c0_17 = arith.constant 0 : index
    %8 = vector.load %arg0[%c0_15, %c0_16, %c0_17] : memref<2x8x16xf32, #tpu.memory_space<vmem>>, vector<1x8x16xf32>
    %9 = vector.shape_cast %8 : vector<1x8x16xf32> to vector<8x16xf32>
    %cst = arith.constant dense<0.000000e+00> : vector<8x384xf32>
    %10 = tpu.matmul %9, %0, %cst {dimension_numbers = #tpu.dot_dimension_numbers<[1], [0], [0], [1], [0, 0, 1, 1], [], []>} : vector<8x16xf32>, vector<16x384xf32>, vector<8x384xf32> -> vector<8x384xf32>
    %11 = vector.broadcast %2 : vector<1x384xf32> to vector<8x384xf32>
    %12 = arith.addf %10, %11 : vector<8x384xf32>
    %c1 = arith.constant 1 : index
    %c0_18 = arith.constant 0 : index
    %c0_19 = arith.constant 0 : index
    %13 = vector.load %arg0[%c1, %c0_18, %c0_19] : memref<2x8x16xf32, #tpu.memory_space<vmem>>, vector<1x8x16xf32>
    %14 = vector.shape_cast %13 : vector<1x8x16xf32> to vector<8x16xf32>
    %cst_20 = arith.constant dense<0.000000e+00> : vector<8x384xf32>
    %15 = tpu.matmul %14, %0, %cst_20 {dimension_numbers = #tpu.dot_dimension_numbers<[1], [0], [0], [1], [0, 0, 1, 1], [], []>} : vector<8x16xf32>, vector<16x384xf32>, vector<8x384xf32> -> vector<8x384xf32>
    %16 = vector.broadcast %2 : vector<1x384xf32> to vector<8x384xf32>
    %17 = arith.addf %15, %16 : vector<8x384xf32>
    %18 = vector.extract_strided_slice %12 {offsets = [0, 0], sizes = [1, 384], strides = [1, 1]} : vector<8x384xf32> to vector<1x384xf32>
    %19 = vector.extract_strided_slice %17 {offsets = [0, 0], sizes = [1, 384], strides = [1, 1]} : vector<8x384xf32> to vector<1x384xf32>
    %20 = tpu.concatenate %18, %19 in 0 : vector<1x384xf32>, vector<1x384xf32> -> vector<2x384xf32>
    %21 = vector.extract_strided_slice %12 {offsets = [1, 0], sizes = [1, 384], strides = [1, 1]} : vector<8x384xf32> to vector<1x384xf32>
    %22 = vector.extract_strided_slice %17 {offsets = [1, 0], sizes = [1, 384], strides = [1, 1]} : vector<8x384xf32> to vector<1x384xf32>
    %23 = tpu.concatenate %21, %22 in 0 : vector<1x384xf32>, vector<1x384xf32> -> vector<2x384xf32>
    %24 = vector.extract_strided_slice %12 {offsets = [2, 0], sizes = [1, 384], strides = [1, 1]} : vector<8x384xf32> to vector<1x384xf32>
    %25 = vector.extract_strided_slice %17 {offsets = [2, 0], sizes = [1, 384], strides = [1, 1]} : vector<8x384xf32> to vector<1x384xf32>
    %26 = tpu.concatenate %24, %25 in 0 : vector<1x384xf32>, vector<1x384xf32> -> vector<2x384xf32>
    %27 = vector.extract_strided_slice %12 {offsets = [3, 0], sizes = [1, 384], strides = [1, 1]} : vector<8x384xf32> to vector<1x384xf32>
    %28 = vector.extract_strided_slice %17 {offsets = [3, 0], sizes = [1, 384], strides = [1, 1]} : vector<8x384xf32> to vector<1x384xf32>
    %29 = tpu.concatenate %27, %28 in 0 : vector<1x384xf32>, vector<1x384xf32> -> vector<2x384xf32>
    %30 = vector.extract_strided_slice %12 {offsets = [4, 0], sizes = [1, 384], strides = [1, 1]} : vector<8x384xf32> to vector<1x384xf32>
    %31 = vector.extract_strided_slice %17 {offsets = [4, 0], sizes = [1, 384], strides = [1, 1]} : vector<8x384xf32> to vector<1x384xf32>
    %32 = tpu.concatenate %30, %31 in 0 : vector<1x384xf32>, vector<1x384xf32> -> vector<2x384xf32>
    %33 = vector.extract_strided_slice %12 {offsets = [5, 0], sizes = [1, 384], strides = [1, 1]} : vector<8x384xf32> to vector<1x384xf32>
    %34 = vector.extract_strided_slice %17 {offsets = [5, 0], sizes = [1, 384], strides = [1, 1]} : vector<8x384xf32> to vector<1x384xf32>
    %35 = tpu.concatenate %33, %34 in 0 : vector<1x384xf32>, vector<1x384xf32> -> vector<2x384xf32>
    %36 = vector.extract_strided_slice %12 {offsets = [6, 0], sizes = [1, 384], strides = [1, 1]} : vector<8x384xf32> to vector<1x384xf32>
    %37 = vector.extract_strided_slice %17 {offsets = [6, 0], sizes = [1, 384], strides = [1, 1]} : vector<8x384xf32> to vector<1x384xf32>
    %38 = tpu.concatenate %36, %37 in 0 : vector<1x384xf32>, vector<1x384xf32> -> vector<2x384xf32>
    %39 = vector.extract_strided_slice %12 {offsets = [7, 0], sizes = [1, 384], strides = [1, 1]} : vector<8x384xf32> to vector<1x384xf32>
    %40 = vector.extract_strided_slice %17 {offsets = [7, 0], sizes = [1, 384], strides = [1, 1]} : vector<8x384xf32> to vector<1x384xf32>
    %41 = tpu.concatenate %39, %40 in 0 : vector<1x384xf32>, vector<1x384xf32> -> vector<2x384xf32>
    %42 = vector.shape_cast %3 : vector<1x32xf32> to vector<1x32xf32>
    %43 = vector.broadcast %42 : vector<1x32xf32> to vector<2x32xf32>
    %44 = vector.shape_cast %7 : vector<1x32xf32> to vector<1x32xf32>
    %45 = vector.broadcast %44 : vector<1x32xf32> to vector<2x32xf32>
    %46 = vector.shape_cast %6 : vector<1x384xf32> to vector<1x384xf32>
    %47 = vector.broadcast %46 : vector<1x384xf32> to vector<2x384xf32>
    %cst_21 = arith.constant 0.000000e+00 : f32
    %48 = vector.broadcast %cst_21 : f32 to vector<2x32xf32>
    %cst_22 = arith.constant 0.000000e+00 : f32
    %49 = vector.broadcast %cst_22 : f32 to vector<2x32xf32>
    %cst_23 = arith.constant dense<0.000000e+00> : vector<2x384xf32>
    %50 = tpu.matmul %48, %1, %cst_23 {dimension_numbers = #tpu.dot_dimension_numbers<[1], [0], [0], [1], [0, 0, 1, 1], [], []>} : vector<2x32xf32>, vector<32x384xf32>, vector<2x384xf32> -> vector<2x384xf32>
    %51 = vector.extract_strided_slice %20 {offsets = [0, 0], sizes = [2, 32], strides = [1, 1]} : vector<2x384xf32> to vector<2x32xf32>
    %52 = vector.extract_strided_slice %50 {offsets = [0, 0], sizes = [2, 32], strides = [1, 1]} : vector<2x384xf32> to vector<2x32xf32>
    %53 = arith.addf %51, %52 : vector<2x32xf32>
    %54 = arith.negf %53 : vector<2x32xf32>
    %55 = math.exp %54 : vector<2x32xf32>
    %cst_24 = arith.constant 1.000000e+00 : f32
    %56 = vector.broadcast %cst_24 : f32 to vector<2x32xf32>
    %57 = arith.addf %56, %55 : vector<2x32xf32>
    %58 = arith.divf %56, %57 : vector<2x32xf32>
    %59 = vector.extract_strided_slice %20 {offsets = [0, 128], sizes = [2, 32], strides = [1, 1]} : vector<2x384xf32> to vector<2x32xf32>
    %60 = vector.extract_strided_slice %50 {offsets = [0, 128], sizes = [2, 32], strides = [1, 1]} : vector<2x384xf32> to vector<2x32xf32>
    %61 = arith.addf %59, %60 : vector<2x32xf32>
    %62 = arith.negf %61 : vector<2x32xf32>
    %63 = math.exp %62 : vector<2x32xf32>
    %cst_25 = arith.constant 1.000000e+00 : f32
    %64 = vector.broadcast %cst_25 : f32 to vector<2x32xf32>
    %65 = arith.addf %64, %63 : vector<2x32xf32>
    %66 = arith.divf %64, %65 : vector<2x32xf32>
    %67 = vector.extract_strided_slice %20 {offsets = [0, 256], sizes = [2, 32], strides = [1, 1]} : vector<2x384xf32> to vector<2x32xf32>
    %68 = vector.extract_strided_slice %50 {offsets = [0, 256], sizes = [2, 32], strides = [1, 1]} : vector<2x384xf32> to vector<2x32xf32>
    %69 = arith.addf %68, %43 : vector<2x32xf32>
    %70 = arith.mulf %58, %69 : vector<2x32xf32>
    %71 = arith.addf %67, %70 : vector<2x32xf32>
    %72 = math.tanh %71 : vector<2x32xf32>
    %cst_26 = arith.constant 1.000000e+00 : f32
    %73 = vector.broadcast %cst_26 : f32 to vector<2x32xf32>
    %74 = arith.subf %73, %66 : vector<2x32xf32>
    %75 = arith.mulf %74, %72 : vector<2x32xf32>
    %76 = arith.mulf %66, %48 : vector<2x32xf32>
    %77 = arith.addf %75, %76 : vector<2x32xf32>
    %cst_27 = arith.constant dense<0.000000e+00> : vector<2x384xf32>
    %78 = tpu.matmul %77, %4, %cst_27 {dimension_numbers = #tpu.dot_dimension_numbers<[1], [0], [0], [1], [0, 0, 1, 1], [], []>} : vector<2x32xf32>, vector<32x384xf32>, vector<2x384xf32> -> vector<2x384xf32>
    %79 = arith.addf %78, %47 : vector<2x384xf32>
    %cst_28 = arith.constant dense<0.000000e+00> : vector<2x384xf32>
    %80 = tpu.matmul %49, %5, %cst_28 {dimension_numbers = #tpu.dot_dimension_numbers<[1], [0], [0], [1], [0, 0, 1, 1], [], []>} : vector<2x32xf32>, vector<32x384xf32>, vector<2x384xf32> -> vector<2x384xf32>
    %81 = vector.extract_strided_slice %79 {offsets = [0, 0], sizes = [2, 32], strides = [1, 1]} : vector<2x384xf32> to vector<2x32xf32>
    %82 = vector.extract_strided_slice %80 {offsets = [0, 0], sizes = [2, 32], strides = [1, 1]} : vector<2x384xf32> to vector<2x32xf32>
    %83 = arith.addf %81, %82 : vector<2x32xf32>
    %84 = arith.negf %83 : vector<2x32xf32>
    %85 = math.exp %84 : vector<2x32xf32>
    %cst_29 = arith.constant 1.000000e+00 : f32
    %86 = vector.broadcast %cst_29 : f32 to vector<2x32xf32>
    %87 = arith.addf %86, %85 : vector<2x32xf32>
    %88 = arith.divf %86, %87 : vector<2x32xf32>
    %89 = vector.extract_strided_slice %79 {offsets = [0, 128], sizes = [2, 32], strides = [1, 1]} : vector<2x384xf32> to vector<2x32xf32>
    %90 = vector.extract_strided_slice %80 {offsets = [0, 128], sizes = [2, 32], strides = [1, 1]} : vector<2x384xf32> to vector<2x32xf32>
    %91 = arith.addf %89, %90 : vector<2x32xf32>
    %92 = arith.negf %91 : vector<2x32xf32>
    %93 = math.exp %92 : vector<2x32xf32>
    %cst_30 = arith.constant 1.000000e+00 : f32
    %94 = vector.broadcast %cst_30 : f32 to vector<2x32xf32>
    %95 = arith.addf %94, %93 : vector<2x32xf32>
    %96 = arith.divf %94, %95 : vector<2x32xf32>
    %97 = vector.extract_strided_slice %79 {offsets = [0, 256], sizes = [2, 32], strides = [1, 1]} : vector<2x384xf32> to vector<2x32xf32>
    %98 = vector.extract_strided_slice %80 {offsets = [0, 256], sizes = [2, 32], strides = [1, 1]} : vector<2x384xf32> to vector<2x32xf32>
    %99 = arith.addf %98, %45 : vector<2x32xf32>
    %100 = arith.mulf %88, %99 : vector<2x32xf32>
    %101 = arith.addf %97, %100 : vector<2x32xf32>
    %102 = math.tanh %101 : vector<2x32xf32>
    %cst_31 = arith.constant 1.000000e+00 : f32
    %103 = vector.broadcast %cst_31 : f32 to vector<2x32xf32>
    %104 = arith.subf %103, %96 : vector<2x32xf32>
    %105 = arith.mulf %104, %102 : vector<2x32xf32>
    %106 = arith.mulf %96, %49 : vector<2x32xf32>
    %107 = arith.addf %105, %106 : vector<2x32xf32>
    %cst_32 = arith.constant dense<0.000000e+00> : vector<2x384xf32>
    %108 = tpu.matmul %77, %1, %cst_32 {dimension_numbers = #tpu.dot_dimension_numbers<[1], [0], [0], [1], [0, 0, 1, 1], [], []>} : vector<2x32xf32>, vector<32x384xf32>, vector<2x384xf32> -> vector<2x384xf32>
    %109 = vector.extract_strided_slice %23 {offsets = [0, 0], sizes = [2, 32], strides = [1, 1]} : vector<2x384xf32> to vector<2x32xf32>
    %110 = vector.extract_strided_slice %108 {offsets = [0, 0], sizes = [2, 32], strides = [1, 1]} : vector<2x384xf32> to vector<2x32xf32>
    %111 = arith.addf %109, %110 : vector<2x32xf32>
    %112 = arith.negf %111 : vector<2x32xf32>
    %113 = math.exp %112 : vector<2x32xf32>
    %cst_33 = arith.constant 1.000000e+00 : f32
    %114 = vector.broadcast %cst_33 : f32 to vector<2x32xf32>
    %115 = arith.addf %114, %113 : vector<2x32xf32>
    %116 = arith.divf %114, %115 : vector<2x32xf32>
    %117 = vector.extract_strided_slice %23 {offsets = [0, 128], sizes = [2, 32], strides = [1, 1]} : vector<2x384xf32> to vector<2x32xf32>
    %118 = vector.extract_strided_slice %108 {offsets = [0, 128], sizes = [2, 32], strides = [1, 1]} : vector<2x384xf32> to vector<2x32xf32>
    %119 = arith.addf %117, %118 : vector<2x32xf32>
    %120 = arith.negf %119 : vector<2x32xf32>
    %121 = math.exp %120 : vector<2x32xf32>
    %cst_34 = arith.constant 1.000000e+00 : f32
    %122 = vector.broadcast %cst_34 : f32 to vector<2x32xf32>
    %123 = arith.addf %122, %121 : vector<2x32xf32>
    %124 = arith.divf %122, %123 : vector<2x32xf32>
    %125 = vector.extract_strided_slice %23 {offsets = [0, 256], sizes = [2, 32], strides = [1, 1]} : vector<2x384xf32> to vector<2x32xf32>
    %126 = vector.extract_strided_slice %108 {offsets = [0, 256], sizes = [2, 32], strides = [1, 1]} : vector<2x384xf32> to vector<2x32xf32>
    %127 = arith.addf %126, %43 : vector<2x32xf32>
    %128 = arith.mulf %116, %127 : vector<2x32xf32>
    %129 = arith.addf %125, %128 : vector<2x32xf32>
    %130 = math.tanh %129 : vector<2x32xf32>
    %cst_35 = arith.constant 1.000000e+00 : f32
    %131 = vector.broadcast %cst_35 : f32 to vector<2x32xf32>
    %132 = arith.subf %131, %124 : vector<2x32xf32>
    %133 = arith.mulf %132, %130 : vector<2x32xf32>
    %134 = arith.mulf %124, %77 : vector<2x32xf32>
    %135 = arith.addf %133, %134 : vector<2x32xf32>
    %cst_36 = arith.constant dense<0.000000e+00> : vector<2x384xf32>
    %136 = tpu.matmul %135, %4, %cst_36 {dimension_numbers = #tpu.dot_dimension_numbers<[1], [0], [0], [1], [0, 0, 1, 1], [], []>} : vector<2x32xf32>, vector<32x384xf32>, vector<2x384xf32> -> vector<2x384xf32>
    %137 = arith.addf %136, %47 : vector<2x384xf32>
    %cst_37 = arith.constant dense<0.000000e+00> : vector<2x384xf32>
    %138 = tpu.matmul %107, %5, %cst_37 {dimension_numbers = #tpu.dot_dimension_numbers<[1], [0], [0], [1], [0, 0, 1, 1], [], []>} : vector<2x32xf32>, vector<32x384xf32>, vector<2x384xf32> -> vector<2x384xf32>
    %139 = vector.extract_strided_slice %137 {offsets = [0, 0], sizes = [2, 32], strides = [1, 1]} : vector<2x384xf32> to vector<2x32xf32>
    %140 = vector.extract_strided_slice %138 {offsets = [0, 0], sizes = [2, 32], strides = [1, 1]} : vector<2x384xf32> to vector<2x32xf32>
    %141 = arith.addf %139, %140 : vector<2x32xf32>
    %142 = arith.negf %141 : vector<2x32xf32>
    %143 = math.exp %142 : vector<2x32xf32>
    %cst_38 = arith.constant 1.000000e+00 : f32
    %144 = vector.broadcast %cst_38 : f32 to vector<2x32xf32>
    %145 = arith.addf %144, %143 : vector<2x32xf32>
    %146 = arith.divf %144, %145 : vector<2x32xf32>
    %147 = vector.extract_strided_slice %137 {offsets = [0, 128], sizes = [2, 32], strides = [1, 1]} : vector<2x384xf32> to vector<2x32xf32>
    %148 = vector.extract_strided_slice %138 {offsets = [0, 128], sizes = [2, 32], strides = [1, 1]} : vector<2x384xf32> to vector<2x32xf32>
    %149 = arith.addf %147, %148 : vector<2x32xf32>
    %150 = arith.negf %149 : vector<2x32xf32>
    %151 = math.exp %150 : vector<2x32xf32>
    %cst_39 = arith.constant 1.000000e+00 : f32
    %152 = vector.broadcast %cst_39 : f32 to vector<2x32xf32>
    %153 = arith.addf %152, %151 : vector<2x32xf32>
    %154 = arith.divf %152, %153 : vector<2x32xf32>
    %155 = vector.extract_strided_slice %137 {offsets = [0, 256], sizes = [2, 32], strides = [1, 1]} : vector<2x384xf32> to vector<2x32xf32>
    %156 = vector.extract_strided_slice %138 {offsets = [0, 256], sizes = [2, 32], strides = [1, 1]} : vector<2x384xf32> to vector<2x32xf32>
    %157 = arith.addf %156, %45 : vector<2x32xf32>
    %158 = arith.mulf %146, %157 : vector<2x32xf32>
    %159 = arith.addf %155, %158 : vector<2x32xf32>
    %160 = math.tanh %159 : vector<2x32xf32>
    %cst_40 = arith.constant 1.000000e+00 : f32
    %161 = vector.broadcast %cst_40 : f32 to vector<2x32xf32>
    %162 = arith.subf %161, %154 : vector<2x32xf32>
    %163 = arith.mulf %162, %160 : vector<2x32xf32>
    %164 = arith.mulf %154, %107 : vector<2x32xf32>
    %165 = arith.addf %163, %164 : vector<2x32xf32>
    %cst_41 = arith.constant dense<0.000000e+00> : vector<2x384xf32>
    %166 = tpu.matmul %135, %1, %cst_41 {dimension_numbers = #tpu.dot_dimension_numbers<[1], [0], [0], [1], [0, 0, 1, 1], [], []>} : vector<2x32xf32>, vector<32x384xf32>, vector<2x384xf32> -> vector<2x384xf32>
    %167 = vector.extract_strided_slice %26 {offsets = [0, 0], sizes = [2, 32], strides = [1, 1]} : vector<2x384xf32> to vector<2x32xf32>
    %168 = vector.extract_strided_slice %166 {offsets = [0, 0], sizes = [2, 32], strides = [1, 1]} : vector<2x384xf32> to vector<2x32xf32>
    %169 = arith.addf %167, %168 : vector<2x32xf32>
    %170 = arith.negf %169 : vector<2x32xf32>
    %171 = math.exp %170 : vector<2x32xf32>
    %cst_42 = arith.constant 1.000000e+00 : f32
    %172 = vector.broadcast %cst_42 : f32 to vector<2x32xf32>
    %173 = arith.addf %172, %171 : vector<2x32xf32>
    %174 = arith.divf %172, %173 : vector<2x32xf32>
    %175 = vector.extract_strided_slice %26 {offsets = [0, 128], sizes = [2, 32], strides = [1, 1]} : vector<2x384xf32> to vector<2x32xf32>
    %176 = vector.extract_strided_slice %166 {offsets = [0, 128], sizes = [2, 32], strides = [1, 1]} : vector<2x384xf32> to vector<2x32xf32>
    %177 = arith.addf %175, %176 : vector<2x32xf32>
    %178 = arith.negf %177 : vector<2x32xf32>
    %179 = math.exp %178 : vector<2x32xf32>
    %cst_43 = arith.constant 1.000000e+00 : f32
    %180 = vector.broadcast %cst_43 : f32 to vector<2x32xf32>
    %181 = arith.addf %180, %179 : vector<2x32xf32>
    %182 = arith.divf %180, %181 : vector<2x32xf32>
    %183 = vector.extract_strided_slice %26 {offsets = [0, 256], sizes = [2, 32], strides = [1, 1]} : vector<2x384xf32> to vector<2x32xf32>
    %184 = vector.extract_strided_slice %166 {offsets = [0, 256], sizes = [2, 32], strides = [1, 1]} : vector<2x384xf32> to vector<2x32xf32>
    %185 = arith.addf %184, %43 : vector<2x32xf32>
    %186 = arith.mulf %174, %185 : vector<2x32xf32>
    %187 = arith.addf %183, %186 : vector<2x32xf32>
    %188 = math.tanh %187 : vector<2x32xf32>
    %cst_44 = arith.constant 1.000000e+00 : f32
    %189 = vector.broadcast %cst_44 : f32 to vector<2x32xf32>
    %190 = arith.subf %189, %182 : vector<2x32xf32>
    %191 = arith.mulf %190, %188 : vector<2x32xf32>
    %192 = arith.mulf %182, %135 : vector<2x32xf32>
    %193 = arith.addf %191, %192 : vector<2x32xf32>
    %cst_45 = arith.constant dense<0.000000e+00> : vector<2x384xf32>
    %194 = tpu.matmul %193, %4, %cst_45 {dimension_numbers = #tpu.dot_dimension_numbers<[1], [0], [0], [1], [0, 0, 1, 1], [], []>} : vector<2x32xf32>, vector<32x384xf32>, vector<2x384xf32> -> vector<2x384xf32>
    %195 = arith.addf %194, %47 : vector<2x384xf32>
    %cst_46 = arith.constant dense<0.000000e+00> : vector<2x384xf32>
    %196 = tpu.matmul %165, %5, %cst_46 {dimension_numbers = #tpu.dot_dimension_numbers<[1], [0], [0], [1], [0, 0, 1, 1], [], []>} : vector<2x32xf32>, vector<32x384xf32>, vector<2x384xf32> -> vector<2x384xf32>
    %197 = vector.extract_strided_slice %195 {offsets = [0, 0], sizes = [2, 32], strides = [1, 1]} : vector<2x384xf32> to vector<2x32xf32>
    %198 = vector.extract_strided_slice %196 {offsets = [0, 0], sizes = [2, 32], strides = [1, 1]} : vector<2x384xf32> to vector<2x32xf32>
    %199 = arith.addf %197, %198 : vector<2x32xf32>
    %200 = arith.negf %199 : vector<2x32xf32>
    %201 = math.exp %200 : vector<2x32xf32>
    %cst_47 = arith.constant 1.000000e+00 : f32
    %202 = vector.broadcast %cst_47 : f32 to vector<2x32xf32>
    %203 = arith.addf %202, %201 : vector<2x32xf32>
    %204 = arith.divf %202, %203 : vector<2x32xf32>
    %205 = vector.extract_strided_slice %195 {offsets = [0, 128], sizes = [2, 32], strides = [1, 1]} : vector<2x384xf32> to vector<2x32xf32>
    %206 = vector.extract_strided_slice %196 {offsets = [0, 128], sizes = [2, 32], strides = [1, 1]} : vector<2x384xf32> to vector<2x32xf32>
    %207 = arith.addf %205, %206 : vector<2x32xf32>
    %208 = arith.negf %207 : vector<2x32xf32>
    %209 = math.exp %208 : vector<2x32xf32>
    %cst_48 = arith.constant 1.000000e+00 : f32
    %210 = vector.broadcast %cst_48 : f32 to vector<2x32xf32>
    %211 = arith.addf %210, %209 : vector<2x32xf32>
    %212 = arith.divf %210, %211 : vector<2x32xf32>
    %213 = vector.extract_strided_slice %195 {offsets = [0, 256], sizes = [2, 32], strides = [1, 1]} : vector<2x384xf32> to vector<2x32xf32>
    %214 = vector.extract_strided_slice %196 {offsets = [0, 256], sizes = [2, 32], strides = [1, 1]} : vector<2x384xf32> to vector<2x32xf32>
    %215 = arith.addf %214, %45 : vector<2x32xf32>
    %216 = arith.mulf %204, %215 : vector<2x32xf32>
    %217 = arith.addf %213, %216 : vector<2x32xf32>
    %218 = math.tanh %217 : vector<2x32xf32>
    %cst_49 = arith.constant 1.000000e+00 : f32
    %219 = vector.broadcast %cst_49 : f32 to vector<2x32xf32>
    %220 = arith.subf %219, %212 : vector<2x32xf32>
    %221 = arith.mulf %220, %218 : vector<2x32xf32>
    %222 = arith.mulf %212, %165 : vector<2x32xf32>
    %223 = arith.addf %221, %222 : vector<2x32xf32>
    %cst_50 = arith.constant dense<0.000000e+00> : vector<2x384xf32>
    %224 = tpu.matmul %193, %1, %cst_50 {dimension_numbers = #tpu.dot_dimension_numbers<[1], [0], [0], [1], [0, 0, 1, 1], [], []>} : vector<2x32xf32>, vector<32x384xf32>, vector<2x384xf32> -> vector<2x384xf32>
    %225 = vector.extract_strided_slice %29 {offsets = [0, 0], sizes = [2, 32], strides = [1, 1]} : vector<2x384xf32> to vector<2x32xf32>
    %226 = vector.extract_strided_slice %224 {offsets = [0, 0], sizes = [2, 32], strides = [1, 1]} : vector<2x384xf32> to vector<2x32xf32>
    %227 = arith.addf %225, %226 : vector<2x32xf32>
    %228 = arith.negf %227 : vector<2x32xf32>
    %229 = math.exp %228 : vector<2x32xf32>
    %cst_51 = arith.constant 1.000000e+00 : f32
    %230 = vector.broadcast %cst_51 : f32 to vector<2x32xf32>
    %231 = arith.addf %230, %229 : vector<2x32xf32>
    %232 = arith.divf %230, %231 : vector<2x32xf32>
    %233 = vector.extract_strided_slice %29 {offsets = [0, 128], sizes = [2, 32], strides = [1, 1]} : vector<2x384xf32> to vector<2x32xf32>
    %234 = vector.extract_strided_slice %224 {offsets = [0, 128], sizes = [2, 32], strides = [1, 1]} : vector<2x384xf32> to vector<2x32xf32>
    %235 = arith.addf %233, %234 : vector<2x32xf32>
    %236 = arith.negf %235 : vector<2x32xf32>
    %237 = math.exp %236 : vector<2x32xf32>
    %cst_52 = arith.constant 1.000000e+00 : f32
    %238 = vector.broadcast %cst_52 : f32 to vector<2x32xf32>
    %239 = arith.addf %238, %237 : vector<2x32xf32>
    %240 = arith.divf %238, %239 : vector<2x32xf32>
    %241 = vector.extract_strided_slice %29 {offsets = [0, 256], sizes = [2, 32], strides = [1, 1]} : vector<2x384xf32> to vector<2x32xf32>
    %242 = vector.extract_strided_slice %224 {offsets = [0, 256], sizes = [2, 32], strides = [1, 1]} : vector<2x384xf32> to vector<2x32xf32>
    %243 = arith.addf %242, %43 : vector<2x32xf32>
    %244 = arith.mulf %232, %243 : vector<2x32xf32>
    %245 = arith.addf %241, %244 : vector<2x32xf32>
    %246 = math.tanh %245 : vector<2x32xf32>
    %cst_53 = arith.constant 1.000000e+00 : f32
    %247 = vector.broadcast %cst_53 : f32 to vector<2x32xf32>
    %248 = arith.subf %247, %240 : vector<2x32xf32>
    %249 = arith.mulf %248, %246 : vector<2x32xf32>
    %250 = arith.mulf %240, %193 : vector<2x32xf32>
    %251 = arith.addf %249, %250 : vector<2x32xf32>
    %cst_54 = arith.constant dense<0.000000e+00> : vector<2x384xf32>
    %252 = tpu.matmul %251, %4, %cst_54 {dimension_numbers = #tpu.dot_dimension_numbers<[1], [0], [0], [1], [0, 0, 1, 1], [], []>} : vector<2x32xf32>, vector<32x384xf32>, vector<2x384xf32> -> vector<2x384xf32>
    %253 = arith.addf %252, %47 : vector<2x384xf32>
    %cst_55 = arith.constant dense<0.000000e+00> : vector<2x384xf32>
    %254 = tpu.matmul %223, %5, %cst_55 {dimension_numbers = #tpu.dot_dimension_numbers<[1], [0], [0], [1], [0, 0, 1, 1], [], []>} : vector<2x32xf32>, vector<32x384xf32>, vector<2x384xf32> -> vector<2x384xf32>
    %255 = vector.extract_strided_slice %253 {offsets = [0, 0], sizes = [2, 32], strides = [1, 1]} : vector<2x384xf32> to vector<2x32xf32>
    %256 = vector.extract_strided_slice %254 {offsets = [0, 0], sizes = [2, 32], strides = [1, 1]} : vector<2x384xf32> to vector<2x32xf32>
    %257 = arith.addf %255, %256 : vector<2x32xf32>
    %258 = arith.negf %257 : vector<2x32xf32>
    %259 = math.exp %258 : vector<2x32xf32>
    %cst_56 = arith.constant 1.000000e+00 : f32
    %260 = vector.broadcast %cst_56 : f32 to vector<2x32xf32>
    %261 = arith.addf %260, %259 : vector<2x32xf32>
    %262 = arith.divf %260, %261 : vector<2x32xf32>
    %263 = vector.extract_strided_slice %253 {offsets = [0, 128], sizes = [2, 32], strides = [1, 1]} : vector<2x384xf32> to vector<2x32xf32>
    %264 = vector.extract_strided_slice %254 {offsets = [0, 128], sizes = [2, 32], strides = [1, 1]} : vector<2x384xf32> to vector<2x32xf32>
    %265 = arith.addf %263, %264 : vector<2x32xf32>
    %266 = arith.negf %265 : vector<2x32xf32>
    %267 = math.exp %266 : vector<2x32xf32>
    %cst_57 = arith.constant 1.000000e+00 : f32
    %268 = vector.broadcast %cst_57 : f32 to vector<2x32xf32>
    %269 = arith.addf %268, %267 : vector<2x32xf32>
    %270 = arith.divf %268, %269 : vector<2x32xf32>
    %271 = vector.extract_strided_slice %253 {offsets = [0, 256], sizes = [2, 32], strides = [1, 1]} : vector<2x384xf32> to vector<2x32xf32>
    %272 = vector.extract_strided_slice %254 {offsets = [0, 256], sizes = [2, 32], strides = [1, 1]} : vector<2x384xf32> to vector<2x32xf32>
    %273 = arith.addf %272, %45 : vector<2x32xf32>
    %274 = arith.mulf %262, %273 : vector<2x32xf32>
    %275 = arith.addf %271, %274 : vector<2x32xf32>
    %276 = math.tanh %275 : vector<2x32xf32>
    %cst_58 = arith.constant 1.000000e+00 : f32
    %277 = vector.broadcast %cst_58 : f32 to vector<2x32xf32>
    %278 = arith.subf %277, %270 : vector<2x32xf32>
    %279 = arith.mulf %278, %276 : vector<2x32xf32>
    %280 = arith.mulf %270, %223 : vector<2x32xf32>
    %281 = arith.addf %279, %280 : vector<2x32xf32>
    %cst_59 = arith.constant dense<0.000000e+00> : vector<2x384xf32>
    %282 = tpu.matmul %251, %1, %cst_59 {dimension_numbers = #tpu.dot_dimension_numbers<[1], [0], [0], [1], [0, 0, 1, 1], [], []>} : vector<2x32xf32>, vector<32x384xf32>, vector<2x384xf32> -> vector<2x384xf32>
    %283 = vector.extract_strided_slice %32 {offsets = [0, 0], sizes = [2, 32], strides = [1, 1]} : vector<2x384xf32> to vector<2x32xf32>
    %284 = vector.extract_strided_slice %282 {offsets = [0, 0], sizes = [2, 32], strides = [1, 1]} : vector<2x384xf32> to vector<2x32xf32>
    %285 = arith.addf %283, %284 : vector<2x32xf32>
    %286 = arith.negf %285 : vector<2x32xf32>
    %287 = math.exp %286 : vector<2x32xf32>
    %cst_60 = arith.constant 1.000000e+00 : f32
    %288 = vector.broadcast %cst_60 : f32 to vector<2x32xf32>
    %289 = arith.addf %288, %287 : vector<2x32xf32>
    %290 = arith.divf %288, %289 : vector<2x32xf32>
    %291 = vector.extract_strided_slice %32 {offsets = [0, 128], sizes = [2, 32], strides = [1, 1]} : vector<2x384xf32> to vector<2x32xf32>
    %292 = vector.extract_strided_slice %282 {offsets = [0, 128], sizes = [2, 32], strides = [1, 1]} : vector<2x384xf32> to vector<2x32xf32>
    %293 = arith.addf %291, %292 : vector<2x32xf32>
    %294 = arith.negf %293 : vector<2x32xf32>
    %295 = math.exp %294 : vector<2x32xf32>
    %cst_61 = arith.constant 1.000000e+00 : f32
    %296 = vector.broadcast %cst_61 : f32 to vector<2x32xf32>
    %297 = arith.addf %296, %295 : vector<2x32xf32>
    %298 = arith.divf %296, %297 : vector<2x32xf32>
    %299 = vector.extract_strided_slice %32 {offsets = [0, 256], sizes = [2, 32], strides = [1, 1]} : vector<2x384xf32> to vector<2x32xf32>
    %300 = vector.extract_strided_slice %282 {offsets = [0, 256], sizes = [2, 32], strides = [1, 1]} : vector<2x384xf32> to vector<2x32xf32>
    %301 = arith.addf %300, %43 : vector<2x32xf32>
    %302 = arith.mulf %290, %301 : vector<2x32xf32>
    %303 = arith.addf %299, %302 : vector<2x32xf32>
    %304 = math.tanh %303 : vector<2x32xf32>
    %cst_62 = arith.constant 1.000000e+00 : f32
    %305 = vector.broadcast %cst_62 : f32 to vector<2x32xf32>
    %306 = arith.subf %305, %298 : vector<2x32xf32>
    %307 = arith.mulf %306, %304 : vector<2x32xf32>
    %308 = arith.mulf %298, %251 : vector<2x32xf32>
    %309 = arith.addf %307, %308 : vector<2x32xf32>
    %cst_63 = arith.constant dense<0.000000e+00> : vector<2x384xf32>
    %310 = tpu.matmul %309, %4, %cst_63 {dimension_numbers = #tpu.dot_dimension_numbers<[1], [0], [0], [1], [0, 0, 1, 1], [], []>} : vector<2x32xf32>, vector<32x384xf32>, vector<2x384xf32> -> vector<2x384xf32>
    %311 = arith.addf %310, %47 : vector<2x384xf32>
    %cst_64 = arith.constant dense<0.000000e+00> : vector<2x384xf32>
    %312 = tpu.matmul %281, %5, %cst_64 {dimension_numbers = #tpu.dot_dimension_numbers<[1], [0], [0], [1], [0, 0, 1, 1], [], []>} : vector<2x32xf32>, vector<32x384xf32>, vector<2x384xf32> -> vector<2x384xf32>
    %313 = vector.extract_strided_slice %311 {offsets = [0, 0], sizes = [2, 32], strides = [1, 1]} : vector<2x384xf32> to vector<2x32xf32>
    %314 = vector.extract_strided_slice %312 {offsets = [0, 0], sizes = [2, 32], strides = [1, 1]} : vector<2x384xf32> to vector<2x32xf32>
    %315 = arith.addf %313, %314 : vector<2x32xf32>
    %316 = arith.negf %315 : vector<2x32xf32>
    %317 = math.exp %316 : vector<2x32xf32>
    %cst_65 = arith.constant 1.000000e+00 : f32
    %318 = vector.broadcast %cst_65 : f32 to vector<2x32xf32>
    %319 = arith.addf %318, %317 : vector<2x32xf32>
    %320 = arith.divf %318, %319 : vector<2x32xf32>
    %321 = vector.extract_strided_slice %311 {offsets = [0, 128], sizes = [2, 32], strides = [1, 1]} : vector<2x384xf32> to vector<2x32xf32>
    %322 = vector.extract_strided_slice %312 {offsets = [0, 128], sizes = [2, 32], strides = [1, 1]} : vector<2x384xf32> to vector<2x32xf32>
    %323 = arith.addf %321, %322 : vector<2x32xf32>
    %324 = arith.negf %323 : vector<2x32xf32>
    %325 = math.exp %324 : vector<2x32xf32>
    %cst_66 = arith.constant 1.000000e+00 : f32
    %326 = vector.broadcast %cst_66 : f32 to vector<2x32xf32>
    %327 = arith.addf %326, %325 : vector<2x32xf32>
    %328 = arith.divf %326, %327 : vector<2x32xf32>
    %329 = vector.extract_strided_slice %311 {offsets = [0, 256], sizes = [2, 32], strides = [1, 1]} : vector<2x384xf32> to vector<2x32xf32>
    %330 = vector.extract_strided_slice %312 {offsets = [0, 256], sizes = [2, 32], strides = [1, 1]} : vector<2x384xf32> to vector<2x32xf32>
    %331 = arith.addf %330, %45 : vector<2x32xf32>
    %332 = arith.mulf %320, %331 : vector<2x32xf32>
    %333 = arith.addf %329, %332 : vector<2x32xf32>
    %334 = math.tanh %333 : vector<2x32xf32>
    %cst_67 = arith.constant 1.000000e+00 : f32
    %335 = vector.broadcast %cst_67 : f32 to vector<2x32xf32>
    %336 = arith.subf %335, %328 : vector<2x32xf32>
    %337 = arith.mulf %336, %334 : vector<2x32xf32>
    %338 = arith.mulf %328, %281 : vector<2x32xf32>
    %339 = arith.addf %337, %338 : vector<2x32xf32>
    %cst_68 = arith.constant dense<0.000000e+00> : vector<2x384xf32>
    %340 = tpu.matmul %309, %1, %cst_68 {dimension_numbers = #tpu.dot_dimension_numbers<[1], [0], [0], [1], [0, 0, 1, 1], [], []>} : vector<2x32xf32>, vector<32x384xf32>, vector<2x384xf32> -> vector<2x384xf32>
    %341 = vector.extract_strided_slice %35 {offsets = [0, 0], sizes = [2, 32], strides = [1, 1]} : vector<2x384xf32> to vector<2x32xf32>
    %342 = vector.extract_strided_slice %340 {offsets = [0, 0], sizes = [2, 32], strides = [1, 1]} : vector<2x384xf32> to vector<2x32xf32>
    %343 = arith.addf %341, %342 : vector<2x32xf32>
    %344 = arith.negf %343 : vector<2x32xf32>
    %345 = math.exp %344 : vector<2x32xf32>
    %cst_69 = arith.constant 1.000000e+00 : f32
    %346 = vector.broadcast %cst_69 : f32 to vector<2x32xf32>
    %347 = arith.addf %346, %345 : vector<2x32xf32>
    %348 = arith.divf %346, %347 : vector<2x32xf32>
    %349 = vector.extract_strided_slice %35 {offsets = [0, 128], sizes = [2, 32], strides = [1, 1]} : vector<2x384xf32> to vector<2x32xf32>
    %350 = vector.extract_strided_slice %340 {offsets = [0, 128], sizes = [2, 32], strides = [1, 1]} : vector<2x384xf32> to vector<2x32xf32>
    %351 = arith.addf %349, %350 : vector<2x32xf32>
    %352 = arith.negf %351 : vector<2x32xf32>
    %353 = math.exp %352 : vector<2x32xf32>
    %cst_70 = arith.constant 1.000000e+00 : f32
    %354 = vector.broadcast %cst_70 : f32 to vector<2x32xf32>
    %355 = arith.addf %354, %353 : vector<2x32xf32>
    %356 = arith.divf %354, %355 : vector<2x32xf32>
    %357 = vector.extract_strided_slice %35 {offsets = [0, 256], sizes = [2, 32], strides = [1, 1]} : vector<2x384xf32> to vector<2x32xf32>
    %358 = vector.extract_strided_slice %340 {offsets = [0, 256], sizes = [2, 32], strides = [1, 1]} : vector<2x384xf32> to vector<2x32xf32>
    %359 = arith.addf %358, %43 : vector<2x32xf32>
    %360 = arith.mulf %348, %359 : vector<2x32xf32>
    %361 = arith.addf %357, %360 : vector<2x32xf32>
    %362 = math.tanh %361 : vector<2x32xf32>
    %cst_71 = arith.constant 1.000000e+00 : f32
    %363 = vector.broadcast %cst_71 : f32 to vector<2x32xf32>
    %364 = arith.subf %363, %356 : vector<2x32xf32>
    %365 = arith.mulf %364, %362 : vector<2x32xf32>
    %366 = arith.mulf %356, %309 : vector<2x32xf32>
    %367 = arith.addf %365, %366 : vector<2x32xf32>
    %cst_72 = arith.constant dense<0.000000e+00> : vector<2x384xf32>
    %368 = tpu.matmul %367, %4, %cst_72 {dimension_numbers = #tpu.dot_dimension_numbers<[1], [0], [0], [1], [0, 0, 1, 1], [], []>} : vector<2x32xf32>, vector<32x384xf32>, vector<2x384xf32> -> vector<2x384xf32>
    %369 = arith.addf %368, %47 : vector<2x384xf32>
    %cst_73 = arith.constant dense<0.000000e+00> : vector<2x384xf32>
    %370 = tpu.matmul %339, %5, %cst_73 {dimension_numbers = #tpu.dot_dimension_numbers<[1], [0], [0], [1], [0, 0, 1, 1], [], []>} : vector<2x32xf32>, vector<32x384xf32>, vector<2x384xf32> -> vector<2x384xf32>
    %371 = vector.extract_strided_slice %369 {offsets = [0, 0], sizes = [2, 32], strides = [1, 1]} : vector<2x384xf32> to vector<2x32xf32>
    %372 = vector.extract_strided_slice %370 {offsets = [0, 0], sizes = [2, 32], strides = [1, 1]} : vector<2x384xf32> to vector<2x32xf32>
    %373 = arith.addf %371, %372 : vector<2x32xf32>
    %374 = arith.negf %373 : vector<2x32xf32>
    %375 = math.exp %374 : vector<2x32xf32>
    %cst_74 = arith.constant 1.000000e+00 : f32
    %376 = vector.broadcast %cst_74 : f32 to vector<2x32xf32>
    %377 = arith.addf %376, %375 : vector<2x32xf32>
    %378 = arith.divf %376, %377 : vector<2x32xf32>
    %379 = vector.extract_strided_slice %369 {offsets = [0, 128], sizes = [2, 32], strides = [1, 1]} : vector<2x384xf32> to vector<2x32xf32>
    %380 = vector.extract_strided_slice %370 {offsets = [0, 128], sizes = [2, 32], strides = [1, 1]} : vector<2x384xf32> to vector<2x32xf32>
    %381 = arith.addf %379, %380 : vector<2x32xf32>
    %382 = arith.negf %381 : vector<2x32xf32>
    %383 = math.exp %382 : vector<2x32xf32>
    %cst_75 = arith.constant 1.000000e+00 : f32
    %384 = vector.broadcast %cst_75 : f32 to vector<2x32xf32>
    %385 = arith.addf %384, %383 : vector<2x32xf32>
    %386 = arith.divf %384, %385 : vector<2x32xf32>
    %387 = vector.extract_strided_slice %369 {offsets = [0, 256], sizes = [2, 32], strides = [1, 1]} : vector<2x384xf32> to vector<2x32xf32>
    %388 = vector.extract_strided_slice %370 {offsets = [0, 256], sizes = [2, 32], strides = [1, 1]} : vector<2x384xf32> to vector<2x32xf32>
    %389 = arith.addf %388, %45 : vector<2x32xf32>
    %390 = arith.mulf %378, %389 : vector<2x32xf32>
    %391 = arith.addf %387, %390 : vector<2x32xf32>
    %392 = math.tanh %391 : vector<2x32xf32>
    %cst_76 = arith.constant 1.000000e+00 : f32
    %393 = vector.broadcast %cst_76 : f32 to vector<2x32xf32>
    %394 = arith.subf %393, %386 : vector<2x32xf32>
    %395 = arith.mulf %394, %392 : vector<2x32xf32>
    %396 = arith.mulf %386, %339 : vector<2x32xf32>
    %397 = arith.addf %395, %396 : vector<2x32xf32>
    %cst_77 = arith.constant dense<0.000000e+00> : vector<2x384xf32>
    %398 = tpu.matmul %367, %1, %cst_77 {dimension_numbers = #tpu.dot_dimension_numbers<[1], [0], [0], [1], [0, 0, 1, 1], [], []>} : vector<2x32xf32>, vector<32x384xf32>, vector<2x384xf32> -> vector<2x384xf32>
    %399 = vector.extract_strided_slice %38 {offsets = [0, 0], sizes = [2, 32], strides = [1, 1]} : vector<2x384xf32> to vector<2x32xf32>
    %400 = vector.extract_strided_slice %398 {offsets = [0, 0], sizes = [2, 32], strides = [1, 1]} : vector<2x384xf32> to vector<2x32xf32>
    %401 = arith.addf %399, %400 : vector<2x32xf32>
    %402 = arith.negf %401 : vector<2x32xf32>
    %403 = math.exp %402 : vector<2x32xf32>
    %cst_78 = arith.constant 1.000000e+00 : f32
    %404 = vector.broadcast %cst_78 : f32 to vector<2x32xf32>
    %405 = arith.addf %404, %403 : vector<2x32xf32>
    %406 = arith.divf %404, %405 : vector<2x32xf32>
    %407 = vector.extract_strided_slice %38 {offsets = [0, 128], sizes = [2, 32], strides = [1, 1]} : vector<2x384xf32> to vector<2x32xf32>
    %408 = vector.extract_strided_slice %398 {offsets = [0, 128], sizes = [2, 32], strides = [1, 1]} : vector<2x384xf32> to vector<2x32xf32>
    %409 = arith.addf %407, %408 : vector<2x32xf32>
    %410 = arith.negf %409 : vector<2x32xf32>
    %411 = math.exp %410 : vector<2x32xf32>
    %cst_79 = arith.constant 1.000000e+00 : f32
    %412 = vector.broadcast %cst_79 : f32 to vector<2x32xf32>
    %413 = arith.addf %412, %411 : vector<2x32xf32>
    %414 = arith.divf %412, %413 : vector<2x32xf32>
    %415 = vector.extract_strided_slice %38 {offsets = [0, 256], sizes = [2, 32], strides = [1, 1]} : vector<2x384xf32> to vector<2x32xf32>
    %416 = vector.extract_strided_slice %398 {offsets = [0, 256], sizes = [2, 32], strides = [1, 1]} : vector<2x384xf32> to vector<2x32xf32>
    %417 = arith.addf %416, %43 : vector<2x32xf32>
    %418 = arith.mulf %406, %417 : vector<2x32xf32>
    %419 = arith.addf %415, %418 : vector<2x32xf32>
    %420 = math.tanh %419 : vector<2x32xf32>
    %cst_80 = arith.constant 1.000000e+00 : f32
    %421 = vector.broadcast %cst_80 : f32 to vector<2x32xf32>
    %422 = arith.subf %421, %414 : vector<2x32xf32>
    %423 = arith.mulf %422, %420 : vector<2x32xf32>
    %424 = arith.mulf %414, %367 : vector<2x32xf32>
    %425 = arith.addf %423, %424 : vector<2x32xf32>
    %cst_81 = arith.constant dense<0.000000e+00> : vector<2x384xf32>
    %426 = tpu.matmul %425, %4, %cst_81 {dimension_numbers = #tpu.dot_dimension_numbers<[1], [0], [0], [1], [0, 0, 1, 1], [], []>} : vector<2x32xf32>, vector<32x384xf32>, vector<2x384xf32> -> vector<2x384xf32>
    %427 = arith.addf %426, %47 : vector<2x384xf32>
    %cst_82 = arith.constant dense<0.000000e+00> : vector<2x384xf32>
    %428 = tpu.matmul %397, %5, %cst_82 {dimension_numbers = #tpu.dot_dimension_numbers<[1], [0], [0], [1], [0, 0, 1, 1], [], []>} : vector<2x32xf32>, vector<32x384xf32>, vector<2x384xf32> -> vector<2x384xf32>
    %429 = vector.extract_strided_slice %427 {offsets = [0, 0], sizes = [2, 32], strides = [1, 1]} : vector<2x384xf32> to vector<2x32xf32>
    %430 = vector.extract_strided_slice %428 {offsets = [0, 0], sizes = [2, 32], strides = [1, 1]} : vector<2x384xf32> to vector<2x32xf32>
    %431 = arith.addf %429, %430 : vector<2x32xf32>
    %432 = arith.negf %431 : vector<2x32xf32>
    %433 = math.exp %432 : vector<2x32xf32>
    %cst_83 = arith.constant 1.000000e+00 : f32
    %434 = vector.broadcast %cst_83 : f32 to vector<2x32xf32>
    %435 = arith.addf %434, %433 : vector<2x32xf32>
    %436 = arith.divf %434, %435 : vector<2x32xf32>
    %437 = vector.extract_strided_slice %427 {offsets = [0, 128], sizes = [2, 32], strides = [1, 1]} : vector<2x384xf32> to vector<2x32xf32>
    %438 = vector.extract_strided_slice %428 {offsets = [0, 128], sizes = [2, 32], strides = [1, 1]} : vector<2x384xf32> to vector<2x32xf32>
    %439 = arith.addf %437, %438 : vector<2x32xf32>
    %440 = arith.negf %439 : vector<2x32xf32>
    %441 = math.exp %440 : vector<2x32xf32>
    %cst_84 = arith.constant 1.000000e+00 : f32
    %442 = vector.broadcast %cst_84 : f32 to vector<2x32xf32>
    %443 = arith.addf %442, %441 : vector<2x32xf32>
    %444 = arith.divf %442, %443 : vector<2x32xf32>
    %445 = vector.extract_strided_slice %427 {offsets = [0, 256], sizes = [2, 32], strides = [1, 1]} : vector<2x384xf32> to vector<2x32xf32>
    %446 = vector.extract_strided_slice %428 {offsets = [0, 256], sizes = [2, 32], strides = [1, 1]} : vector<2x384xf32> to vector<2x32xf32>
    %447 = arith.addf %446, %45 : vector<2x32xf32>
    %448 = arith.mulf %436, %447 : vector<2x32xf32>
    %449 = arith.addf %445, %448 : vector<2x32xf32>
    %450 = math.tanh %449 : vector<2x32xf32>
    %cst_85 = arith.constant 1.000000e+00 : f32
    %451 = vector.broadcast %cst_85 : f32 to vector<2x32xf32>
    %452 = arith.subf %451, %444 : vector<2x32xf32>
    %453 = arith.mulf %452, %450 : vector<2x32xf32>
    %454 = arith.mulf %444, %397 : vector<2x32xf32>
    %455 = arith.addf %453, %454 : vector<2x32xf32>
    %cst_86 = arith.constant dense<0.000000e+00> : vector<2x384xf32>
    %456 = tpu.matmul %425, %1, %cst_86 {dimension_numbers = #tpu.dot_dimension_numbers<[1], [0], [0], [1], [0, 0, 1, 1], [], []>} : vector<2x32xf32>, vector<32x384xf32>, vector<2x384xf32> -> vector<2x384xf32>
    %457 = vector.extract_strided_slice %41 {offsets = [0, 0], sizes = [2, 32], strides = [1, 1]} : vector<2x384xf32> to vector<2x32xf32>
    %458 = vector.extract_strided_slice %456 {offsets = [0, 0], sizes = [2, 32], strides = [1, 1]} : vector<2x384xf32> to vector<2x32xf32>
    %459 = arith.addf %457, %458 : vector<2x32xf32>
    %460 = arith.negf %459 : vector<2x32xf32>
    %461 = math.exp %460 : vector<2x32xf32>
    %cst_87 = arith.constant 1.000000e+00 : f32
    %462 = vector.broadcast %cst_87 : f32 to vector<2x32xf32>
    %463 = arith.addf %462, %461 : vector<2x32xf32>
    %464 = arith.divf %462, %463 : vector<2x32xf32>
    %465 = vector.extract_strided_slice %41 {offsets = [0, 128], sizes = [2, 32], strides = [1, 1]} : vector<2x384xf32> to vector<2x32xf32>
    %466 = vector.extract_strided_slice %456 {offsets = [0, 128], sizes = [2, 32], strides = [1, 1]} : vector<2x384xf32> to vector<2x32xf32>
    %467 = arith.addf %465, %466 : vector<2x32xf32>
    %468 = arith.negf %467 : vector<2x32xf32>
    %469 = math.exp %468 : vector<2x32xf32>
    %cst_88 = arith.constant 1.000000e+00 : f32
    %470 = vector.broadcast %cst_88 : f32 to vector<2x32xf32>
    %471 = arith.addf %470, %469 : vector<2x32xf32>
    %472 = arith.divf %470, %471 : vector<2x32xf32>
    %473 = vector.extract_strided_slice %41 {offsets = [0, 256], sizes = [2, 32], strides = [1, 1]} : vector<2x384xf32> to vector<2x32xf32>
    %474 = vector.extract_strided_slice %456 {offsets = [0, 256], sizes = [2, 32], strides = [1, 1]} : vector<2x384xf32> to vector<2x32xf32>
    %475 = arith.addf %474, %43 : vector<2x32xf32>
    %476 = arith.mulf %464, %475 : vector<2x32xf32>
    %477 = arith.addf %473, %476 : vector<2x32xf32>
    %478 = math.tanh %477 : vector<2x32xf32>
    %cst_89 = arith.constant 1.000000e+00 : f32
    %479 = vector.broadcast %cst_89 : f32 to vector<2x32xf32>
    %480 = arith.subf %479, %472 : vector<2x32xf32>
    %481 = arith.mulf %480, %478 : vector<2x32xf32>
    %482 = arith.mulf %472, %425 : vector<2x32xf32>
    %483 = arith.addf %481, %482 : vector<2x32xf32>
    %cst_90 = arith.constant dense<0.000000e+00> : vector<2x384xf32>
    %484 = tpu.matmul %483, %4, %cst_90 {dimension_numbers = #tpu.dot_dimension_numbers<[1], [0], [0], [1], [0, 0, 1, 1], [], []>} : vector<2x32xf32>, vector<32x384xf32>, vector<2x384xf32> -> vector<2x384xf32>
    %485 = arith.addf %484, %47 : vector<2x384xf32>
    %cst_91 = arith.constant dense<0.000000e+00> : vector<2x384xf32>
    %486 = tpu.matmul %455, %5, %cst_91 {dimension_numbers = #tpu.dot_dimension_numbers<[1], [0], [0], [1], [0, 0, 1, 1], [], []>} : vector<2x32xf32>, vector<32x384xf32>, vector<2x384xf32> -> vector<2x384xf32>
    %487 = vector.extract_strided_slice %485 {offsets = [0, 0], sizes = [2, 32], strides = [1, 1]} : vector<2x384xf32> to vector<2x32xf32>
    %488 = vector.extract_strided_slice %486 {offsets = [0, 0], sizes = [2, 32], strides = [1, 1]} : vector<2x384xf32> to vector<2x32xf32>
    %489 = arith.addf %487, %488 : vector<2x32xf32>
    %490 = arith.negf %489 : vector<2x32xf32>
    %491 = math.exp %490 : vector<2x32xf32>
    %cst_92 = arith.constant 1.000000e+00 : f32
    %492 = vector.broadcast %cst_92 : f32 to vector<2x32xf32>
    %493 = arith.addf %492, %491 : vector<2x32xf32>
    %494 = arith.divf %492, %493 : vector<2x32xf32>
    %495 = vector.extract_strided_slice %485 {offsets = [0, 128], sizes = [2, 32], strides = [1, 1]} : vector<2x384xf32> to vector<2x32xf32>
    %496 = vector.extract_strided_slice %486 {offsets = [0, 128], sizes = [2, 32], strides = [1, 1]} : vector<2x384xf32> to vector<2x32xf32>
    %497 = arith.addf %495, %496 : vector<2x32xf32>
    %498 = arith.negf %497 : vector<2x32xf32>
    %499 = math.exp %498 : vector<2x32xf32>
    %cst_93 = arith.constant 1.000000e+00 : f32
    %500 = vector.broadcast %cst_93 : f32 to vector<2x32xf32>
    %501 = arith.addf %500, %499 : vector<2x32xf32>
    %502 = arith.divf %500, %501 : vector<2x32xf32>
    %503 = vector.extract_strided_slice %485 {offsets = [0, 256], sizes = [2, 32], strides = [1, 1]} : vector<2x384xf32> to vector<2x32xf32>
    %504 = vector.extract_strided_slice %486 {offsets = [0, 256], sizes = [2, 32], strides = [1, 1]} : vector<2x384xf32> to vector<2x32xf32>
    %505 = arith.addf %504, %45 : vector<2x32xf32>
    %506 = arith.mulf %494, %505 : vector<2x32xf32>
    %507 = arith.addf %503, %506 : vector<2x32xf32>
    %508 = math.tanh %507 : vector<2x32xf32>
    %cst_94 = arith.constant 1.000000e+00 : f32
    %509 = vector.broadcast %cst_94 : f32 to vector<2x32xf32>
    %510 = arith.subf %509, %502 : vector<2x32xf32>
    %511 = arith.mulf %510, %508 : vector<2x32xf32>
    %512 = arith.mulf %502, %455 : vector<2x32xf32>
    %513 = arith.addf %511, %512 : vector<2x32xf32>
    %c0_95 = arith.constant 0 : index
    %c0_96 = arith.constant 0 : index
    %514 = vector.load %arg9[%c0_95, %c0_96] : memref<32x16xf32, #tpu.memory_space<vmem>>, vector<32x16xf32>
    %c0_97 = arith.constant 0 : index
    %c0_98 = arith.constant 0 : index
    %515 = vector.load %arg10[%c0_97, %c0_98] : memref<1x16xf32, #tpu.memory_space<vmem>>, vector<1x16xf32>
    %516 = vector.extract_strided_slice %107 {offsets = [0, 0], sizes = [1, 32], strides = [1, 1]} : vector<2x32xf32> to vector<1x32xf32>
    %517 = vector.extract_strided_slice %165 {offsets = [0, 0], sizes = [1, 32], strides = [1, 1]} : vector<2x32xf32> to vector<1x32xf32>
    %518 = vector.extract_strided_slice %223 {offsets = [0, 0], sizes = [1, 32], strides = [1, 1]} : vector<2x32xf32> to vector<1x32xf32>
    %519 = vector.extract_strided_slice %281 {offsets = [0, 0], sizes = [1, 32], strides = [1, 1]} : vector<2x32xf32> to vector<1x32xf32>
    %520 = vector.extract_strided_slice %339 {offsets = [0, 0], sizes = [1, 32], strides = [1, 1]} : vector<2x32xf32> to vector<1x32xf32>
    %521 = vector.extract_strided_slice %397 {offsets = [0, 0], sizes = [1, 32], strides = [1, 1]} : vector<2x32xf32> to vector<1x32xf32>
    %522 = vector.extract_strided_slice %455 {offsets = [0, 0], sizes = [1, 32], strides = [1, 1]} : vector<2x32xf32> to vector<1x32xf32>
    %523 = vector.extract_strided_slice %513 {offsets = [0, 0], sizes = [1, 32], strides = [1, 1]} : vector<2x32xf32> to vector<1x32xf32>
    %524 = tpu.concatenate %516, %517, %518, %519, %520, %521, %522, %523 in 0 : vector<1x32xf32>, vector<1x32xf32>, vector<1x32xf32>, vector<1x32xf32>, vector<1x32xf32>, vector<1x32xf32>, vector<1x32xf32>, vector<1x32xf32> -> vector<8x32xf32>
    %cst_99 = arith.constant dense<0.000000e+00> : vector<8x16xf32>
    %525 = tpu.matmul %524, %514, %cst_99 {dimension_numbers = #tpu.dot_dimension_numbers<[1], [0], [0], [1], [0, 0, 1, 1], [], []>} : vector<8x32xf32>, vector<32x16xf32>, vector<8x16xf32> -> vector<8x16xf32>
    %526 = vector.broadcast %515 : vector<1x16xf32> to vector<8x16xf32>
    %527 = arith.addf %525, %526 : vector<8x16xf32>
    %c0_100 = arith.constant 0 : index
    %c0_101 = arith.constant 0 : index
    %c0_102 = arith.constant 0 : index
    %528 = vector.load %arg11[%c0_100, %c0_101, %c0_102] : memref<2x8x16xf32, #tpu.memory_space<vmem>>, vector<1x8x16xf32>
    %529 = vector.shape_cast %528 : vector<1x8x16xf32> to vector<8x16xf32>
    %530 = vector.shape_cast %527 : vector<8x16xf32> to vector<1x8x16xf32>
    tpu.vector_store %arg11[%c0_100, %c0_101, %c0_102], %530 {strides = array<i32>} : memref<2x8x16xf32, #tpu.memory_space<vmem>>, vector<1x8x16xf32>,
    %531 = vector.extract_strided_slice %107 {offsets = [1, 0], sizes = [1, 32], strides = [1, 1]} : vector<2x32xf32> to vector<1x32xf32>
    %532 = vector.extract_strided_slice %165 {offsets = [1, 0], sizes = [1, 32], strides = [1, 1]} : vector<2x32xf32> to vector<1x32xf32>
    %533 = vector.extract_strided_slice %223 {offsets = [1, 0], sizes = [1, 32], strides = [1, 1]} : vector<2x32xf32> to vector<1x32xf32>
    %534 = vector.extract_strided_slice %281 {offsets = [1, 0], sizes = [1, 32], strides = [1, 1]} : vector<2x32xf32> to vector<1x32xf32>
    %535 = vector.extract_strided_slice %339 {offsets = [1, 0], sizes = [1, 32], strides = [1, 1]} : vector<2x32xf32> to vector<1x32xf32>
    %536 = vector.extract_strided_slice %397 {offsets = [1, 0], sizes = [1, 32], strides = [1, 1]} : vector<2x32xf32> to vector<1x32xf32>
    %537 = vector.extract_strided_slice %455 {offsets = [1, 0], sizes = [1, 32], strides = [1, 1]} : vector<2x32xf32> to vector<1x32xf32>
    %538 = vector.extract_strided_slice %513 {offsets = [1, 0], sizes = [1, 32], strides = [1, 1]} : vector<2x32xf32> to vector<1x32xf32>
    %539 = tpu.concatenate %531, %532, %533, %534, %535, %536, %537, %538 in 0 : vector<1x32xf32>, vector<1x32xf32>, vector<1x32xf32>, vector<1x32xf32>, vector<1x32xf32>, vector<1x32xf32>, vector<1x32xf32>, vector<1x32xf32> -> vector<8x32xf32>
    %cst_103 = arith.constant dense<0.000000e+00> : vector<8x16xf32>
    %540 = tpu.matmul %539, %514, %cst_103 {dimension_numbers = #tpu.dot_dimension_numbers<[1], [0], [0], [1], [0, 0, 1, 1], [], []>} : vector<8x32xf32>, vector<32x16xf32>, vector<8x16xf32> -> vector<8x16xf32>
    %541 = vector.broadcast %515 : vector<1x16xf32> to vector<8x16xf32>
    %542 = arith.addf %540, %541 : vector<8x16xf32>
    %c1_104 = arith.constant 1 : index
    %c0_105 = arith.constant 0 : index
    %c0_106 = arith.constant 0 : index
    %543 = vector.load %arg11[%c1_104, %c0_105, %c0_106] : memref<2x8x16xf32, #tpu.memory_space<vmem>>, vector<1x8x16xf32>
    %544 = vector.shape_cast %543 : vector<1x8x16xf32> to vector<8x16xf32>
    %545 = vector.shape_cast %542 : vector<8x16xf32> to vector<1x8x16xf32>
    tpu.vector_store %arg11[%c1_104, %c0_105, %c0_106], %545 {strides = array<i32>} : memref<2x8x16xf32, #tpu.memory_space<vmem>>, vector<1x8x16xf32>,
    return
  }
}

</mosaic_0001>

<bundles_post_ra>
// kernel: tpu_custom_call.1
= control target key start
LH: loop header
LB: loop body
LE: loop exit
PB: predicated region body
PF: predicated region fallthrough
CT: control target
= control target key end

     0   :  { %16 = vsyncpa [#allocation3], 0  ;;  %s4452_s0 = inlined_call_operand.hbm [shape: f32[2,8,16], index: 0, kind: input, shape index: {}]   ;;  %s4453_s1 = inlined_call_operand.vmem [shape: f32[16,384], index: 1, kind: input, shape index: {}]   ;;  %s4454_s2 = inlined_call_operand.hbm [shape: f32[32,384], index: 2, kind: input, shape index: {}]   ;;  %s4455_s3 = inlined_call_operand.hbm [shape: f32[1,384], index: 3, kind: input, shape index: {}]   ;;  %s4456_s4 = inlined_call_operand.hbm [shape: f32[1,32], index: 4, kind: input, shape index: {}]   ;;  %s4457_s5 = inlined_call_operand.hbm [shape: f32[32,384], index: 5, kind: input, shape index: {}]   ;;  %s4458_s6 = inlined_call_operand.hbm [shape: f32[32,384], index: 6, kind: input, shape index: {}]   ;;  %s4459_s7 = inlined_call_operand.vmem [shape: f32[1,384], index: 7, kind: input, shape index: {}]   ;;  %s4460_s8 = inlined_call_operand.vmem [shape: f32[1,32], index: 8, kind: input, shape index: {}]   ;;  %s4461_s9 = inlined_call_operand.vmem [shape: f32[32,16], index: 9, kind: input, shape index: {}]   ;;  %s4462_s10 = inlined_call_operand.vmem [shape: f32[1,16], index: 10, kind: input, shape index: {}]   ;;  %s4463_s11 = inlined_call_operand.hbm [shape: f32[2,8,16], index: 11, kind: output, shape index: {}]  }
   0x1   :  { %17 = vsyncpa [#allocation6], 0 }
   0x2   :  { %18 = vsyncpa [#allocation9], 0 }
   0x3   :  { %19 = vsyncpa [#allocation12], 0  ;;  %s40_s19 = sshll.u32 %s4454_s2, 4  ;;  %s41_s19 = int_to_ptr.hbm [resolvable:$true] %s40_s19 }
   0x4   :  { %20 = vsyncpa [#allocation4], 0  ;;  %s3326_s20 = smov [#allocation5]   ;;  %s65_s24 = sshll.u32 %s4456_s4, 4  ;;  %s66_s24 = int_to_ptr.hbm [resolvable:$true] %s65_s24 }
   0x5   :  { %s42_s21 = sshll.u32 %s3326_s20, 4  ;;  %s3327_s25 = smov 384   ;;  %s43_s21 = int_to_ptr.vmem [resolvable:$true] %s42_s21 }
   0x6   :  { %s3328_s26 = smov 24   ;;  %s3329_s27 = smov [#allocation8]  }
   0x7   :  { %48 = dma.hbm_to_vmem [thread:$0]  %s41_s19, 1536, %s43_s21, [#allocation6], %s3327_s25, %s3327_s25, %s3328_s26  }
   0x8   :  { %s67_s28 = sshll.u32 %s3329_s27, 4  ;;  %s25_s30 = sshll.u32 %s4452_s0, 4  ;;  %s68_s28 = int_to_ptr.vmem [resolvable:$true] %s67_s28  ;;  %s26_s30 = int_to_ptr.hbm [resolvable:$true] %s25_s30 }
   0x9   :  { %70 = dma.hbm_to_vmem [thread:$0]  %s66_s24, 16, %s68_s28, [#allocation9]  }
   0xa   :  { %s3330_s12 = smov [#allocation2]   ;;  %s54_s15 = sshll.u32 %s4455_s3, 4  ;;  %s55_s15 = int_to_ptr.hbm [resolvable:$true] %s54_s15 }
   0xb   :  { %s27_s13 = sshll.u32 %s3330_s12, 4  ;;  %s3331_s16 = smov 128   ;;  %s28_s13 = int_to_ptr.vmem [resolvable:$true] %s27_s13 }
   0xc   :  { %s3332_s17 = smov 8   ;;  %s3333_s18 = smov [#allocation7]  }
   0xd   :  { %33 = dma.hbm_to_vmem [thread:$0]  %s26_s30, 256, %s28_s13, [#allocation3], %s3331_s16, %s3331_s16, %s3332_s17  }
   0xe   :  { %s56_s19 = sshll.u32 %s3333_s18, 4  ;;  %s75_s21 = sshll.u32 %s4457_s5, 4  ;;  %s57_s19 = int_to_ptr.vmem [resolvable:$true] %s56_s19  ;;  %s76_s21 = int_to_ptr.hbm [resolvable:$true] %s75_s21 }
   0xf   :  { %59 = dma.hbm_to_vmem [thread:$0]  %s55_s15, 48, %s57_s19, [#allocation6]  }
  0x10   :  { %s88_s3 = sshll.u32 %s4458_s6, 4  ;;  %s3334_s24 = smov [#allocation10]   ;;  %s89_s3 = int_to_ptr.hbm [resolvable:$true] %s88_s3 }
  0x11   :  { %s77_s27 = sshll.u32 %s3334_s24, 4  ;;  %s3335_s28 = smov [#allocation11]   ;;  %s78_s27 = int_to_ptr.vmem [resolvable:$true] %s77_s27 }
  0x12   :  { %83 = dma.hbm_to_vmem [thread:$0]  %s76_s21, 1536, %s78_s27, [#allocation9], %s3327_s25, %s3327_s25, %s3328_s26  }
  0x13   :  { %s90_s29 = sshll.u32 %s3335_s28, 4  ;;  %s91_s29 = int_to_ptr.vmem [resolvable:$true] %s90_s29 }
  0x14   :  { %96 = dma.hbm_to_vmem [thread:$0]  %s89_s3, 1536, %s91_s29, [#allocation12], %s3327_s25, %s3327_s25, %s3328_s26  }
  0x15   :  { %3316 = dma.done.wait [#allocation3], 256  }
  0x16   :  { %3317 = vsyncadd [#allocation3], 4294967040 }
  0x17   :  { %3318 = dma.done.wait [#allocation6], 1584  }
  0x18   :  { %3319 = vsyncadd [#allocation6], 4294965712 }
  0x19   :  { %3320 = dma.done.wait [#allocation9], 1552  }
  0x1a   :  { %3321 = vsyncadd [#allocation9], 4294965744 }
  0x1b   :  { %3322 = dma.done.wait [#allocation12], 1536  }
  0x1c   :  { %3323 = vsyncadd [#allocation12], 4294965760  ;;  %v133_v0 = vld [vmem:[%s4453_s1 + $0x20] sm:$0xff]  ;;  %v134_v1 = vld [vmem:[%s4453_s1 + $0x28] sm:$0xff]  ;;  %vm183_vm0 = vcmask 130048   ;;  %v4464_v18 = vmov 0.0  }
  0x1d   :  { %v132_v2 = vld [vmem:[%s4453_s1 + $0x18] sm:$0xff]  ;;  %221 = vmatpush.msra.mxu1 %v133_v0  ;;  %241 = vmatpush.msra.mxu2 %v134_v1  ;;  %v130_v3 = vld [vmem:[%s4453_s1 + $0x8] sm:$0xff]  ;;  %v131_v4 = vld [vmem:[%s4453_s1 + $0x10] sm:$0xff]  ;;  %vm321_vm1 = vcmask 1040384   ;;  %vm440_vm10 = vcmask 261120   ;;  %s3337_s6 = smov [#allocation13]  }
  0x1e   :  { %v129_v5 = vld [vmem:[%s4453_s1] sm:$0xff]  ;;  %266 = vmatpush.msra.mxu3 %v132_v2  ;;  %201 = vmatpush.msra.mxu0 %v132_v2  ;;  %v248_v7 = vld [vmem:[#allocation2 + $0x8] sm:$0xff]  ;;  %v3446_v8 = vld [vmem:[#allocation5 + $0x48] sm:$0xff]  ;;  %s2807_s2 = sshll.u32 %s3337_s6, 4  ;;  %s2809_s13 = sshll.u32 %s4463_s11, 4  ;;  %s2808_s2 = int_to_ptr.vmem [resolvable:$true] %s2807_s2  ;;  %s2810_s13 = int_to_ptr.hbm [resolvable:$true] %s2809_s13 }
  0x1f   :  { %v175_v6 = vld [vmem:[#allocation2] sm:$0xff]  ;;  %222 = vmatpush.msra.mxu1 %v130_v3  ;;  %242 = vmatpush.msra.mxu2 %v131_v4  ;;  %v3456_v11 = vld [vmem:[#allocation5 + $0x38] sm:$0xff]  ;;  %v3463_v13 = vld [vmem:[#allocation5 + $0x20] sm:$0xff] }
  0x20   :  { %267 = vmatpush.msra.mxu3 %v129_v5  ;;  %202 = vmatpush.msra.mxu0 %v129_v5  ;;  %v3448_v9 = vld [vmem:[#allocation5 + $0x50] sm:$0xff]  ;;  %4493 = vst [vmem:[#allocation19_spill] sm:$0xff] %v3456_v11  ;;  %v3460_v12 = vld [vmem:[#allocation5 + $0x18] sm:$0xff]  ;;  %v3466_v14 = vld [vmem:[#allocation5] sm:$0xff] }
  0x21   :  { %2826 = vmatmul.msk.f32.vlgmr.msra.gmra.mxu1 %vm183_vm0, %v175_v6  ;;  %2827 = vmatmul.msk.f32.vlgmr.msra.gmra.mxu2 %vm183_vm0, %v175_v6  ;;  %v3452_v10 = vld [vmem:[#allocation5 + $0x30] sm:$0xff]  ;;  %4494 = vst [vmem:[#allocation20_spill] sm:$0xff] %v3463_v13  ;;  %v3468_v15 = vld [vmem:[#allocation5 + $0x58] sm:$0xff]  ;;  %v3471_v16 = vld [vmem:[#allocation5 + $0x8] sm:$0xff] }
  0x22   :  { %2828 = vmatmul.msk.f32.vlgmr.msra.gmra.mxu3 %vm183_vm0, %v248_v7  ;;  %456 = vmatpush.msrb.mxu2 %v3446_v8  ;;  %4495 = vst [vmem:[#allocation21_spill] sm:$0xff] %v3471_v16  ;;  %v3478_v17 = vld [vmem:[#allocation5 + $0x40] sm:$0xff]  ;;  %v3483_v19 = vld [vmem:[#allocation5 + $0x28] sm:$0xff]  ;;  %v3486_v20 = vld [vmem:[#allocation5 + $0x10] sm:$0xff] }
  0x23   :  { %2825 = vmatmul.msk.f32.vlgmr.msra.gmra.mxu0 %vm183_vm0, %v175_v6  ;;  %476 = vmatpush.msrb.mxu3 %v3448_v9  ;;  %v147_v21 = vld [vmem:[#allocation7] sm:$0x7]  ;;  %v3546_v2 = vld [vmem:[#allocation11 + $0x48] sm:$0xff] }
  0x24   :  { %457 = vmatpush.msrb.mxu2 %v3452_v10  ;;  %306 = vmatpush.msrb.mxu1 %v134_v1  ;;  %v177_v22 = vperm.slane %v147_v21, 0  ;;  %v178_v24 = vperm.slane %v147_v21, 1  ;;  %v179_v28 = vperm.slane %v147_v21, 2 }
  0x25   :  { %477 = vmatpush.msrb.mxu3 %v3456_v11  ;;  %286 = vmatpush.msrb.mxu0 %v133_v0 }
  0x26   :  { %458 = vmatpush.msrb.mxu2 %v3460_v12  ;;  %307 = vmatpush.msrb.mxu1 %v131_v4 }
  0x27   :  { %478 = vmatpush.msrb.mxu3 %v3463_v13  ;;  %287 = vmatpush.msrb.mxu0 %v130_v3 }
  0x28   :  { %459 = vmatpush.msrb.mxu2 %v3466_v14 }
  0x29   :  { %496 = vmatpush.msra.mxu0 %v3468_v15  ;;  %479 = vmatpush.msrb.mxu3 %v3471_v16 }
  0x2a   :  { %2830 = vmatmul.msk.f32.vlgmr.msrb.gmra.mxu1 %vm183_vm0, %v248_v7  ;;  %460 = vmatmul.f32.vlgmr.msrb.gmra.mxu2 %v4464_v18 }
  0x2b   :  { %480 = vmatmul.f32.vlgmr.msrb.gmra.mxu3 %v4464_v18  ;;  %2829 = vmatmul.msk.f32.vlgmr.msrb.gmra.mxu0 %vm183_vm0, %v248_v7 }
  0x2c   :  { %497 = vmatpush.msra.mxu0 %v3478_v17 }
  0x2e   :  { %498 = vmatpush.msra.mxu0 %v3483_v19 }
  0x30   :  { %499 = vmatpush.msra.mxu0 %v3486_v20 }
  0x32   :  { %627 = vmatpush.msrb.mxu0 %v3546_v2 }
  0x33   :  { %500 = vmatmul.f32.vlgmr.msra.gmra.mxu0 %v4464_v18 }
  0x9e   :  { %v224_v23 = vpop.f32.mrf.mxu1 }
  0x9f   :  { %v3491_v26 = vadd.f32 %v224_v23, %v178_v24 }
  0xa0   :  { %v204_v25 = vpop.f32.mrf.mxu0 }
  0xa1   :  { %v3493_v27 = vadd.f32 %v204_v25, %v177_v22  ;;  %v329_v29 = vrot.slane %v3491_v26, 1  ;;  %v338_v32 = vrot.slane %v3491_v26, 2  ;;  %v353_v33 = vrot.slane %v3491_v26, 3 }
  0xa2   :  { %v368_v34 = vrot.slane %v3491_v26, 4  ;;  %v383_v37 = vrot.slane %v3491_v26, 5  ;;  %v398_v38 = vrot.slane %v3491_v26, 6  ;;  %v413_v39 = vrot.slane %v3491_v26, 7 }
  0xa3   :  { %v328_v31 = vrot.slane %v3493_v27, 1  ;;  %v337_v42 = vrot.slane %v3493_v27, 2  ;;  %v352_v43 = vrot.slane %v3493_v27, 3  ;;  %v367_v44 = vrot.slane %v3493_v27, 4 }
  0xa4   :  { %v244_v30 = vpop.f32.mrf.mxu2  ;;  %v382_v47 = vrot.slane %v3493_v27, 5  ;;  %v397_v48 = vrot.slane %v3493_v27, 6 }
  0xa5   :  { %v3500_v35 = vadd.f32 %v244_v30, %v179_v28  ;;  %v269_v36 = vpop.f32.mrf.mxu3  ;;  %v3564_v30 = vld [vmem:[#allocation11 + $0x30] sm:$0xff] }
  0xa6   :  { %v3505_v40 = vadd.f32 %v269_v36, %v177_v22  ;;  %628 = vmatpush.msrb.mxu0 %v3564_v30 }
  0xa7   :  { %v309_v41 = vpop.f32.mrf.mxu1  ;;  %v330_v46 = vrot.slane %v3500_v35, 1  ;;  %v339_v56 = vrot.slane %v3500_v35, 2  ;;  %v354_v60 = vrot.slane %v3500_v35, 3  ;;  %v369_v25 = vrot.slane %v3500_v35, 4 }
  0xa8   :  { %v3510_v45 = vadd.f32 %v309_v41, %v179_v28  ;;  %v289_v49 = vpop.f32.mrf.mxu0  ;;  %v315_v50 = vrot.slane %v3505_v40, 7  ;;  %v3518_v51 = vsel %vm321_vm1, %v328_v31, %v3505_v40  ;;  %v343_v52 = vrot.slane %v3505_v40, 1 }
  0xa9   :  { %v358_v53 = vrot.slane %v3505_v40, 2  ;;  %v3522_v54 = vadd.f32 %v289_v49, %v178_v24  ;;  %v373_v6 = vrot.slane %v3505_v40, 3 }
  0xaa   :  { %v3526_v55 = vsel %vm321_vm1, %v330_v46, %v3510_v45  ;;  %v345_v57 = vrot.slane %v3510_v45, 1  ;;  %v3531_v58 = vsel %vm321_vm1, %v337_v42, %v343_v52  ;;  %v360_v61 = vrot.slane %v3510_v45, 2 }
  0xab   :  { %4496 = vst [vmem:[#allocation22_spill] sm:$0xff] %v3531_v58  ;;  %v3534_v59 = vsel %vm321_vm1, %v352_v43, %v358_v53  ;;  %v322_v62 = vsel %vm321_vm1, %v3493_v27, %v315_v50  ;;  %v316_v63 = vrot.slane %v3522_v54, 7  ;;  %v3543_v0 = vsel %vm321_vm1, %v329_v29, %v3522_v54  ;;  %v3579_v50 = vld [vmem:[#allocation11 + $0x18] sm:$0xff] }
  0xac   :  { %4497 = vst [vmem:[#allocation23_spill] sm:$0xff] %v3534_v59  ;;  %v344_v1 = vrot.slane %v3522_v54, 1  ;;  %v3549_v3 = vsel %vm321_vm1, %v339_v56, %v345_v57  ;;  %v359_v4 = vrot.slane %v3522_v54, 2  ;;  %v3553_v5 = vsel %vm321_vm1, %v354_v60, %v360_v61  ;;  %629 = vmatpush.msrb.mxu0 %v3579_v50  ;;  %v3593_v56 = vld [vmem:[#allocation11] sm:$0xff] }
  0xad   :  { %4498 = vst [vmem:[#allocation24_spill] sm:$0xff] %v3549_v3  ;;  %v461_v7 = vpop.f32.mrf.mxu2  ;;  %v323_v21 = vsel %vm321_vm1, %v3491_v26, %v316_v63  ;;  %v374_v24 = vrot.slane %v3522_v54, 3  ;;  %v3570_v36 = vsel %vm321_vm1, %v367_v44, %v373_v6  ;;  %v389_v42 = vrot.slane %v3522_v54, 4  ;;  %v3602_v63 = vld [vmem:[#allocation10 + $0x58] sm:$0xff]  ;;  %v3657_v26 = vld [vmem:[#allocation10 + $0x20] sm:$0xff] }
  0xae   :  { %4499 = vst [vmem:[#allocation25_spill] sm:$0xff] %v3553_v5  ;;  %v481_v22 = vpop.f32.mrf.mxu3  ;;  %v3560_v23 = vsel %vm321_vm1, %v338_v32, %v344_v1  ;;  %v504_v28 = vadd.f32 %v461_v7, %v322_v62  ;;  %v3567_v31 = vsel %vm321_vm1, %v353_v33, %v359_v4  ;;  %v375_v32 = vrot.slane %v3510_v45, 3  ;;  %630 = vmatpush.msrb.mxu0 %v3593_v56  ;;  %v3605_v1 = vld [vmem:[#allocation10 + $0x48] sm:$0xff]  ;;  %v3607_v4 = vld [vmem:[#allocation10 + $0x50] sm:$0xff] }
  0xaf   :  { %4500 = vst [vmem:[#allocation26_spill] sm:$0xff] %v3560_v23  ;;  %v524_v29 = vadd.f32 %v481_v22, %v323_v21  ;;  %v3574_v41 = vsel %vm321_vm1, %v368_v34, %v374_v24  ;;  %v388_v43 = vrot.slane %v3505_v40, 4  ;;  %v412_v33 = vrot.slane %v3493_v27, 7  ;;  %631 = vmatmul.f32.vlgmr.msrb.gmra.mxu0 %v4464_v18  ;;  %607 = vmatpush.msra.mxu3 %v3602_v63  ;;  %v3635_v27 = vld [vmem:[#allocation10 + $0x40] sm:$0xff] }
  0xb0   :  { %4501 = vst [vmem:[#allocation27_spill] sm:$0xff] %v3567_v31  ;;  %v2831_v46 = vmul.f32 -1.442695, %v504_v28  ;;  %v3584_v44 = vsel %vm321_vm1, %v369_v25, %v375_v32  ;;  %v3587_v34 = vsel %vm321_vm1, %v383_v37, %v389_v42  ;;  %v384_v53 = vrot.slane %v3500_v35, 5  ;;  %567 = vmatpush.msra.mxu1 %v3605_v1  ;;  %587 = vmatpush.msra.mxu2 %v3607_v4  ;;  %v3653_v42 = vld [vmem:[#allocation10 + $0x28] sm:$0xff] }
  0xb1   :  { %4502 = vst [vmem:[#allocation28_spill] sm:$0xff] %v3570_v36  ;;  %v2832_v49 = vmul.f32 -1.442695, %v524_v29  ;;  %v3590_v52 = vsel %vm321_vm1, %v382_v47, %v388_v43  ;;  %v390_v57 = vrot.slane %v3510_v45, 4  ;;  %v404_v60 = vrot.slane %v3522_v54, 5  ;;  %755 = vmatpush.msra.mxu0 %v3448_v9  ;;  %608 = vmatpush.msra.mxu3 %v3635_v27  ;;  %v3655_v43 = vld [vmem:[#allocation10 + $0x18] sm:$0xff] }
  0xb2   :  { %4503 = vst [vmem:[#allocation29_spill] sm:$0xff] %v3574_v41  ;;  %2946 = vpow2.f32 %v2831_v46  ;;  %v403_v61 = vrot.slane %v3505_v40, 5  ;;  %v399_v37 = vrot.slane %v3500_v35, 6  ;;  %v405_v62 = vrot.slane %v3510_v45, 5  ;;  %v3702_v36 = vld [vmem:[#allocation11 + $0x58] sm:$0xff] }
  0xb3   :  { %4504 = vst [vmem:[#allocation30_spill] sm:$0xff] %v3584_v44  ;;  %2948 = vpow2.f32 %v2832_v49  ;;  %v418_v47 = vrot.slane %v3505_v40, 6  ;;  %v3610_v6 = vsel %vm321_vm1, %v384_v53, %v390_v57  ;;  %v3615_v7 = vsel %vm321_vm1, %v398_v38, %v404_v60  ;;  %756 = vmatpush.msra.mxu0 %v3456_v11  ;;  %609 = vmatpush.msra.mxu3 %v3653_v42  ;;  %v3661_v49 = vld [vmem:[#allocation10 + $0x10] sm:$0xff]  ;;  %v3665_v53 = vld [vmem:[#allocation10 + $0x8] sm:$0xff] }
  0xb4   :  { %4505 = vst [vmem:[#allocation31_spill] sm:$0xff] %v3587_v34  ;;  %v3620_v40 = vsel %vm321_vm1, %v397_v48, %v403_v61  ;;  %v419_v21 = vrot.slane %v3522_v54, 6  ;;  %v3626_v22 = vsel %vm321_vm1, %v399_v37, %v405_v62  ;;  %v414_v38 = vrot.slane %v3500_v35, 7  ;;  %v3637_v48 = vld [vmem:[#allocation10 + $0x30] sm:$0xff]  ;;  %v3639_v54 = vld [vmem:[#allocation10 + $0x38] sm:$0xff]  ;;  %v3682_v37 = vld [vmem:[#allocation11 + $0x20] sm:$0xff] }
  0xb5   :  { %4506 = vst [vmem:[#allocation32_spill] sm:$0xff] %v3590_v52  ;;  %v3629_v24 = vsel %vm321_vm1, %v412_v33, %v418_v47  ;;  %v420_v25 = vrot.slane %v3510_v45, 6  ;;  %568 = vmatpush.msra.mxu1 %v3637_v48  ;;  %588 = vmatpush.msra.mxu2 %v3639_v54  ;;  %v3663_v33 = vld [vmem:[#allocation10] sm:$0xff]  ;;  %v3676_v60 = vld [vmem:[#allocation11 + $0x50] sm:$0xff]  ;;  %v3678_v61 = vld [vmem:[#allocation11 + $0x38] sm:$0xff]  ;;  %v317_v52 = vrot.slane %v3510_v45, 7 }
  0xb6   :  { %4507 = vst [vmem:[#allocation33_spill] sm:$0xff] %v3610_v6  ;;  %v3644_v28 = vsel %vm321_vm1, %v413_v39, %v419_v21  ;;  %757 = vmatpush.msra.mxu0 %v3463_v13  ;;  %610 = vmatpush.msra.mxu3 %v3661_v49  ;;  %v3687_v62 = vld [vmem:[#allocation11 + $0x8] sm:$0xff] }
  0xb7   :  { %4508 = vst [vmem:[#allocation34_spill] sm:$0xff] %v3615_v7  ;;  %v3649_v29 = vsel %vm321_vm1, %v414_v38, %v420_v25  ;;  %569 = vmatpush.msra.mxu1 %v3655_v43  ;;  %589 = vmatpush.msra.mxu2 %v3657_v26 }
  0xb8   :  { %4509 = vst [vmem:[#allocation35_spill] sm:$0xff] %v3620_v40  ;;  %v2947_v32 = vpop.eup %2946  ;;  %758 = vmatpush.msra.mxu0 %v3471_v16  ;;  %735 = vmatpush.msrb.mxu3 %v3446_v8 }
  0xb9   :  { %4510 = vst [vmem:[#allocation36_spill] sm:$0xff] %v3626_v22  ;;  %v2949_v39 = vpop.eup %2948  ;;  %v508_v46 = vadd.f32 1.0, %v2947_v32  ;;  %570 = vmatpush.msra.mxu1 %v3663_v33  ;;  %590 = vmatpush.msra.mxu2 %v3665_v53  ;;  %v3696_v32 = vld [vmem:[#allocation8] ss:$0 sm:$0xff] }
  0xba   :  { %4511 = vst [vmem:[#allocation37_spill] sm:$0xff] %v3629_v24  ;;  %v3667_v57 = vadd.f32 1.0, %v2949_v39  ;;  %886 = vmatpush.msrb.mxu0 %v3602_v63  ;;  %736 = vmatpush.msrb.mxu3 %v3452_v10 }
  0xbb   :  { %4512 = vst [vmem:[#allocation38_spill] sm:$0xff] %v3644_v28  ;;  %2950 = vrcp.f32 %v508_v46  ;;  %647 = vmatpush.msrb.mxu1 %v3676_v60  ;;  %v520_v28 = vand.u32 2147483648, %v508_v46  ;;  %v518_v22 = vand.u32 2147483647, %v508_v46  ;;  %vm514_vm3 = vweird.f32 %v508_v46  ;;  %667 = vmatpush.msrb.mxu2 %v3702_v36 }
  0xbc   :  { %4513 = vst [vmem:[#allocation39_spill] sm:$0xff] %v3649_v29  ;;  %2952 = vrcp.f32 %v3667_v57  ;;  %887 = vmatpush.msrb.mxu0 %v3635_v27  ;;  %737 = vmatpush.msrb.mxu3 %v3460_v12  ;;  %v501_v29 = vpop.f32.mrf.mxu0  ;;  %vm534_vm6 = vweird.f32 %v3667_v57  ;;  %v538_v45 = vand.u32 2147483647, %v3667_v57 }
  0xbd   :  { %648 = vmatpush.msrb.mxu1 %v3678_v61  ;;  %v544_v6 = vadd.f32 %v3696_v32, %v501_v29  ;;  %v521_v34 = vor.u32 1.1754944e-38, %v520_v28  ;;  %vm519_vm5 = vcmp.eq.f32.partialorder %v518_v22, 8.507059e+37  ;;  %v3711_v22 = vld [vmem:[#allocation11 + $0x28] sm:$0xff] }
  0xbe   :  { %888 = vmatpush.msrb.mxu0 %v3653_v42  ;;  %738 = vmatpush.msrb.mxu3 %v3466_v14  ;;  %vm539_vm9 = vcmp.eq.f32.partialorder %v538_v45, 8.507059e+37 }
  0xbf   :  { %649 = vmatpush.msrb.mxu1 %v3682_v37 }
  0xc0   :  { %889 = vmatpush.msrb.mxu0 %v3661_v49 }
  0xc1   :  { %v2951_v47 = vpop.eup %2950  ;;  %650 = vmatpush.msrb.mxu1 %v3687_v62 }
  0xc2   :  { %v2953_v21 = vpop.eup %2952  ;;  %v510_v38 = vmul.f32 %v2951_v47, %v508_v46  ;;  %vm515_vm2 = vweird.f32 %v2951_v47 }
  0xc3   :  { %v530_v25 = vmul.f32 %v2953_v21, %v3667_v57  ;;  %vm516_vm4 = vmor %vm514_vm3, %vm515_vm2  ;;  %vm535_vm7 = vweird.f32 %v2953_v21 }
  0xc4   :  { %v511_v39 = vsub.f32 1.0, %v510_v38  ;;  %vm536_vm8 = vmor %vm534_vm6, %vm535_vm7 }
  0xc5   :  { %v531_v18 = vsub.f32 1.0, %v530_v25 }
  0xc6   :  { %v512_v24 = vmul.f32 %v2951_v47, %v511_v39  ;;  %v3704_v39 = vld [vmem:[#allocation11 + $0x40] sm:$0xff] }
  0xc7   :  { %v532_v40 = vmul.f32 %v2953_v21, %v531_v18  ;;  %v540_v18 = vand.u32 2147483648, %v3667_v57  ;;  %668 = vmatpush.msrb.mxu2 %v3704_v39 }
  0xc8   :  { %v513_v7 = vadd.f32 %v2951_v47, %v512_v24 }
  0xc9   :  { %v533_v38 = vadd.f32 %v2953_v21, %v532_v40  ;;  %v541_v28 = vor.u32 1.1754944e-38, %v540_v18  ;;  %669 = vmatpush.msrb.mxu2 %v3711_v22 }
  0xca   :  { %v517_v44 = vsel %vm516_vm4, %v2951_v47, %v513_v7  ;;  %v324_v7 = vsel %vm321_vm1, %v3500_v35, %v317_v52  ;;  %v4515_v47 = vmov 0.0  }
  0xcb   :  { %v522_v25 = vsel %vm519_vm5, %v521_v34, %v517_v44  ;;  %v537_v44 = vsel %vm536_vm8, %v2953_v21, %v533_v38  ;;  %v3714_v34 = vld [vmem:[#allocation11 + $0x10] sm:$0xff]  ;;  %v173_v38 = vld [vmem:[%s4459_s7] sm:$0x7] }
  0xcc   :  { %v545_v24 = vmul.f32 %v544_v6, %v522_v25  ;;  %4514 = vst [vmem:[#allocation40_spill] sm:$0xff] %v3714_v34  ;;  %v542_v6 = vsel %vm539_vm9, %v541_v28, %v537_v44  ;;  %670 = vmatpush.msrb.mxu2 %v3714_v34  ;;  %v3769_v25 = vperm.slane %v173_v38, 0  ;;  %v3773_v44 = vperm.slane %v173_v38, 1 }
  0xcd   :  { %v548_v29 = vsub.f32 1.0, %v542_v6  ;;  %v550_v52 = vmul.f32 0.0, %v542_v6  ;;  %v3787_v59 = vperm.slane %v173_v38, 2 }
  0xce   :  { %v546_v40 = vadd.f32 %v545_v24, %v324_v7  ;;  %4516 = vst [vmem:[#allocation41_spill] sm:$0xff] %v3769_v25 }
  0xcf   :  { %4517 = vst [vmem:[#allocation42_spill] sm:$0xff] %v3773_v44 }
  0xd0   :  { %2954 = vtanh.f32 %v546_v40  ;;  %4519 = vst [vmem:[#allocation44_spill] sm:$0xff] %v3787_v59 }
  0xd6   :  { %v2955_v46 = vpop.eup %2954 }
  0xd7   :  { %v549_v35 = vmul.f32 %v2955_v46, %v548_v29 }
  0xd9   :  { %v3718_v57 = vadd.f32 %v550_v52, %v549_v35 }
  0xdb   :  { %2833 = vmatmul.msk.f32.vlgmr.msra.gmra.mxu1 %vm440_vm10, %v3718_v57  ;;  %2834 = vmatmul.msk.f32.vlgmr.msra.gmra.mxu2 %vm440_vm10, %v3718_v57 }
  0xdc   :  { %2835 = vmatmul.msk.f32.vlgmr.msra.gmra.mxu3 %vm440_vm10, %v3718_v57  ;;  %2839 = vmatmul.msk.f32.vlgmr.msra.gmra.mxu0 %vm440_vm10, %v3718_v57 }
  0xdd   :  { %775 = vmatpush.msra.mxu1 %v3468_v15  ;;  %846 = vmatpush.msra.mxu2 %v3605_v1 }
  0xde   :  { %866 = vmatpush.msra.mxu3 %v3607_v4  ;;  %1017 = vmatpush.msra.mxu0 %v3446_v8 }
  0xdf   :  { %776 = vmatpush.msra.mxu1 %v3478_v17  ;;  %847 = vmatpush.msra.mxu2 %v3637_v48 }
  0xe0   :  { %867 = vmatpush.msra.mxu3 %v3639_v54  ;;  %1018 = vmatpush.msra.mxu0 %v3452_v10 }
  0xe1   :  { %777 = vmatpush.msra.mxu1 %v3483_v19  ;;  %848 = vmatpush.msra.mxu2 %v3655_v43 }
  0xe2   :  { %868 = vmatpush.msra.mxu3 %v3657_v26  ;;  %1019 = vmatpush.msra.mxu0 %v3460_v12 }
  0xe3   :  { %651 = vmatmul.f32.vlgmr.msrb.gmra.mxu1 %v4515_v47  ;;  %671 = vmatmul.f32.vlgmr.msrb.gmra.mxu2 %v4515_v47 }
  0xe4   :  { %2838 = vmatmul.msk.f32.vlgmr.msrb.gmra.mxu3 %vm440_vm10, %v3718_v57  ;;  %778 = vmatpush.msra.mxu1 %v3486_v20 }
  0xe5   :  { %849 = vmatpush.msra.mxu2 %v3663_v33  ;;  %869 = vmatpush.msra.mxu3 %v3665_v53 }
  0xe6   :  { %909 = vmatpush.msrb.mxu1 %v3546_v2  ;;  %1020 = vmatpush.msra.mxu0 %v3466_v14 }
  0xe7   :  { %929 = vmatpush.msrb.mxu2 %v3676_v60  ;;  %949 = vmatpush.msrb.mxu3 %v3702_v36 }
  0xe8   :  { %910 = vmatpush.msrb.mxu1 %v3564_v30 }
  0xe9   :  { %930 = vmatpush.msrb.mxu2 %v3678_v61  ;;  %950 = vmatpush.msrb.mxu3 %v3704_v39 }
  0xea   :  { %911 = vmatpush.msrb.mxu1 %v3579_v50 }
  0xeb   :  { %931 = vmatpush.msrb.mxu2 %v3682_v37  ;;  %2840 = vmatmul.msk.f32.vlgmr.msra.gmra.mxu1 %vm440_vm10, %v3718_v57 }
  0xec   :  { %951 = vmatpush.msrb.mxu3 %v3711_v22  ;;  %912 = vmatpush.msrb.mxu1 %v3593_v56 }
  0xed   :  { %932 = vmatpush.msrb.mxu2 %v3687_v62 }
  0xee   :  { %1037 = vmatpush.msra.mxu1 %v3448_v9  ;;  %952 = vmatpush.msrb.mxu3 %v3714_v34 }
  0xf0   :  { %1038 = vmatpush.msra.mxu1 %v3456_v11 }
  0xf2   :  { %1039 = vmatpush.msra.mxu1 %v3463_v13 }
  0xf4   :  { %1040 = vmatpush.msra.mxu1 %v3471_v16 }
 0x12c   :  { %v632_v21 = vpop.f32.mrf.mxu0 }
 0x158   :  { %v572_v18 = vpop.f32.mrf.mxu1 }
 0x159   :  { %v573_v24 = vadd.f32 %v572_v18, %v3769_v25  ;;  %v760_v45 = vpop.f32.mrf.mxu0 }
 0x15a   :  { %v803_v40 = vadd.f32 %v760_v45, %v3543_v0 }
 0x15b   :  { %v675_v7 = vadd.f32 %v632_v21, %v573_v24 }
 0x15c   :  { %v2842_v29 = vmul.f32 -1.442695, %v803_v40 }
 0x15d   :  { %v2836_v28 = vmul.f32 -1.442695, %v675_v7 }
 0x15e   :  { %v592_v6 = vpop.f32.mrf.mxu2 }
 0x15f   :  { %2956 = vpow2.f32 %v2836_v28  ;;  %v593_v46 = vadd.f32 %v592_v6, %v3773_v44  ;;  %v612_v35 = vpop.f32.mrf.mxu3 }
 0x160   :  { %v652_v52 = vpop.f32.mrf.mxu1  ;;  %2958 = vpow2.f32 %v2842_v29  ;;  %v613_v16 = vadd.f32 %v612_v35, %v3787_v59 }
 0x161   :  { %v695_v47 = vadd.f32 %v652_v52, %v593_v46 }
 0x163   :  { %v2837_v41 = vmul.f32 -1.442695, %v695_v47 }
 0x165   :  { %v2957_v5 = vpop.eup %2956  ;;  %2960 = vpow2.f32 %v2837_v41 }
 0x166   :  { %v679_v18 = vadd.f32 1.0, %v2957_v5  ;;  %v2959_v21 = vpop.eup %2958  ;;  %v3783_v5 = vld [vmem:[%s4460_s8] ss:$0 sm:$0xff]  ;;  %v672_v52 = vpop.f32.mrf.mxu2 }
 0x167   :  { %v740_v31 = vpop.f32.mrf.mxu3  ;;  %v3777_v7 = vadd.f32 1.0, %v2959_v21  ;;  %4518 = vst [vmem:[#allocation43_spill] sm:$0xff] %v3783_v5 }
 0x168   :  { %2962 = vrcp.f32 %v679_v18  ;;  %v783_v0 = vadd.f32 %v740_v31, %v3518_v51  ;;  %v691_v47 = vand.u32 2147483648, %v679_v18  ;;  %v689_v21 = vand.u32 2147483647, %v679_v18 }
 0x169   :  { %vm685_vm12 = vweird.f32 %v679_v18 }
 0x16a   :  { %v2841_v24 = vmul.f32 -1.442695, %v783_v0  ;;  %v692_v3 = vor.u32 1.1754944e-38, %v691_v47  ;;  %vm690_vm14 = vcmp.eq.f32.partialorder %v689_v21, 8.507059e+37 }
 0x16b   :  { %v2961_v45 = vpop.eup %2960 }
 0x16c   :  { %v699_v40 = vadd.f32 1.0, %v2961_v45  ;;  %2964 = vpow2.f32 %v2841_v24 }
 0x16e   :  { %v2963_v28 = vpop.eup %2962  ;;  %2966 = vrcp.f32 %v699_v40  ;;  %v711_v38 = vand.u32 2147483648, %v699_v40  ;;  %vm705_vm2 = vweird.f32 %v699_v40 }
 0x16f   :  { %v681_v6 = vmul.f32 %v2963_v28, %v679_v18  ;;  %2968 = vrcp.f32 %v3777_v7  ;;  %vm686_vm11 = vweird.f32 %v2963_v28  ;;  %v709_v18 = vand.u32 2147483647, %v699_v40 }
 0x170   :  { %vm687_vm13 = vmor %vm685_vm12, %vm686_vm11  ;;  %v712_v34 = vor.u32 1.1754944e-38, %v711_v38  ;;  %vm813_vm11 = vweird.f32 %v3777_v7 }
 0x171   :  { %v682_v29 = vsub.f32 1.0, %v681_v6  ;;  %vm710_vm4 = vcmp.eq.f32.partialorder %v709_v18, 8.507059e+37 }
 0x172   :  { %v2965_v46 = vpop.eup %2964 }
 0x173   :  { %v787_v41 = vadd.f32 1.0, %v2965_v46  ;;  %v683_v51 = vmul.f32 %v2963_v28, %v682_v29  ;;  %v715_v46 = vadd.f32 %v3783_v5, %v672_v52 }
 0x174   :  { %v2967_v31 = vpop.eup %2966 }
 0x175   :  { %v701_v0 = vmul.f32 %v2967_v31, %v699_v40  ;;  %2970 = vrcp.f32 %v787_v41  ;;  %v3785_v24 = vpop.eup %2968  ;;  %v684_v45 = vadd.f32 %v2963_v28, %v683_v51  ;;  %vm706_vm15 = vweird.f32 %v2967_v31 }
 0x176   :  { %v809_v29 = vmul.f32 %v3785_v24, %v3777_v7  ;;  %vm707_vm3 = vmor %vm705_vm2, %vm706_vm15  ;;  %vm793_vm6 = vweird.f32 %v787_v41  ;;  %vm814_vm9 = vweird.f32 %v3785_v24 }
 0x177   :  { %v702_v6 = vsub.f32 1.0, %v701_v0  ;;  %v688_v58 = vsel %vm687_vm13, %v2963_v28, %v684_v45  ;;  %vm815_vm12 = vmor %vm813_vm11, %vm814_vm9 }
 0x178   :  { %v693_v25 = vsel %vm690_vm14, %v692_v3, %v688_v58  ;;  %v810_v52 = vsub.f32 1.0, %v809_v29  ;;  %v797_v58 = vand.u32 2147483647, %v787_v41 }
 0x179   :  { %v703_v44 = vmul.f32 %v2967_v31, %v702_v6  ;;  %v716_v13 = vmul.f32 %v715_v46, %v693_v25  ;;  %v799_v6 = vand.u32 2147483648, %v787_v41  ;;  %v819_v46 = vand.u32 2147483648, %v3777_v7 }
 0x17a   :  { %v811_v3 = vmul.f32 %v3785_v24, %v810_v52  ;;  %vm798_vm8 = vcmp.eq.f32.partialorder %v797_v58, 8.507059e+37  ;;  %v4526_v58 = vld [vmem:[#allocation41_spill] sm:$0xff] }
 0x17b   :  { %v2971_v23 = vpop.eup %2970  ;;  %v704_v51 = vadd.f32 %v2967_v31, %v703_v44  ;;  %v717_v47 = vadd.f32 %v716_v13, %v613_v16  ;;  %v780_v44 = vpop.f32.mrf.mxu1  ;;  %v800_v40 = vor.u32 1.1754944e-38, %v799_v6  ;;  %v820_v18 = vor.u32 1.1754944e-38, %v819_v46 }
 0x17c   :  { %v789_v0 = vmul.f32 %v2971_v23, %v787_v41  ;;  %vm794_vm5 = vweird.f32 %v2971_v23  ;;  %v823_v13 = vadd.f32 %v3696_v32, %v780_v44  ;;  %v812_v45 = vadd.f32 %v3785_v24, %v811_v3 }
 0x17d   :  { %v708_v11 = vsel %vm707_vm3, %v2967_v31, %v704_v51  ;;  %2972 = vtanh.f32 %v717_v47  ;;  %vm795_vm7 = vmor %vm793_vm6, %vm794_vm5 }
 0x17e   :  { %v790_v5 = vsub.f32 1.0, %v789_v0  ;;  %v713_v35 = vsel %vm710_vm4, %v712_v34, %v708_v11  ;;  %v817_v34 = vand.u32 2147483647, %v3777_v7  ;;  %v816_v38 = vsel %vm815_vm12, %v3785_v24, %v812_v45  ;;  %v4528_v45 = vld [vmem:[#allocation42_spill] sm:$0xff] }
 0x17f   :  { %v719_v16 = vsub.f32 1.0, %v713_v35  ;;  %v721_v11 = vmul.f32 0.0, %v713_v35  ;;  %v4527_v35 = vld [vmem:[#allocation22_spill] sm:$0xff] }
 0x180   :  { %v791_v28 = vmul.f32 %v2971_v23, %v790_v5  ;;  %vm818_vm13 = vcmp.eq.f32.partialorder %v817_v34, 8.507059e+37 }
 0x181   :  { %v821_v0 = vsel %vm818_vm13, %v820_v18, %v816_v38 }
 0x182   :  { %v792_v25 = vadd.f32 %v2971_v23, %v791_v28  ;;  %v827_v52 = vsub.f32 1.0, %v821_v0  ;;  %v829_v47 = vmul.f32 %v821_v0, %v3718_v57 }
 0x183   :  { %v2973_v31 = vpop.eup %2972 }
 0x184   :  { %v796_v21 = vsel %vm795_vm7, %v2971_v23, %v792_v25  ;;  %v720_v51 = vmul.f32 %v2973_v31, %v719_v16 }
 0x185   :  { %v801_v5 = vsel %vm798_vm8, %v800_v40, %v796_v21 }
 0x186   :  { %v824_v29 = vmul.f32 %v823_v13, %v801_v5  ;;  %v3801_v41 = vadd.f32 %v721_v11, %v720_v51 }
 0x188   :  { %v825_v23 = vadd.f32 %v824_v29, %v3526_v55  ;;  %4520 = vst [vmem:[#allocation45_spill] sm:$0xff] %v3801_v41  ;;  %2846 = vmatmul.msk.f32.vlgmr.msrb.gmra.mxu1 %vm440_vm10, %v3801_v41 }
 0x189   :  { %1168 = vmatpush.msrb.mxu1 %v3602_v63 }
 0x18a   :  { %2974 = vtanh.f32 %v825_v23 }
 0x18b   :  { %1169 = vmatpush.msrb.mxu1 %v3635_v27 }
 0x18d   :  { %1170 = vmatpush.msrb.mxu1 %v3653_v42 }
 0x18f   :  { %1171 = vmatpush.msrb.mxu1 %v3661_v49 }
 0x190   :  { %v2975_v7 = vpop.eup %2974 }
 0x191   :  { %v828_v55 = vmul.f32 %v2975_v7, %v827_v52 }
 0x193   :  { %v3811_v24 = vadd.f32 %v829_v47, %v828_v55 }
 0x195   :  { %2843 = vmatmul.msk.f32.vlgmr.msra.gmra.mxu2 %vm440_vm10, %v3811_v24  ;;  %2844 = vmatmul.msk.f32.vlgmr.msra.gmra.mxu3 %vm440_vm10, %v3811_v24 }
 0x196   :  { %2845 = vmatmul.msk.f32.vlgmr.msrb.gmra.mxu0 %vm440_vm10, %v3811_v24  ;;  %2852 = vmatmul.msk.f32.vlgmr.msra.gmra.mxu1 %vm440_vm10, %v3811_v24 }
 0x197   :  { %1057 = vmatpush.msra.mxu2 %v3468_v15  ;;  %1128 = vmatpush.msra.mxu3 %v3605_v1 }
 0x198   :  { %1148 = vmatpush.msrb.mxu0 %v3607_v4  ;;  %1299 = vmatpush.msra.mxu1 %v3446_v8  ;;  %v4521_v8 = vld [vmem:[#allocation40_spill] sm:$0xff] }
 0x199   :  { %1058 = vmatpush.msra.mxu2 %v3478_v17  ;;  %1129 = vmatpush.msra.mxu3 %v3637_v48 }
 0x19a   :  { %1149 = vmatpush.msrb.mxu0 %v3639_v54  ;;  %1300 = vmatpush.msra.mxu1 %v3452_v10  ;;  %v4522_v10 = vld [vmem:[#allocation19_spill] sm:$0xff] }
 0x19b   :  { %1059 = vmatpush.msra.mxu2 %v3483_v19  ;;  %1130 = vmatpush.msra.mxu3 %v3655_v43 }
 0x19c   :  { %1150 = vmatpush.msrb.mxu0 %v3657_v26  ;;  %1301 = vmatpush.msra.mxu1 %v3460_v12  ;;  %v4523_v12 = vld [vmem:[#allocation20_spill] sm:$0xff] }
 0x19d   :  { %2847 = vmatmul.msk.f32.vlgmr.msrb.gmra.mxu2 %vm440_vm10, %v3801_v41  ;;  %2848 = vmatmul.msk.f32.vlgmr.msrb.gmra.mxu3 %vm440_vm10, %v3801_v41 }
 0x19e   :  { %2851 = vmatmul.msk.f32.vlgmr.msra.gmra.mxu0 %vm440_vm10, %v3811_v24  ;;  %1060 = vmatpush.msra.mxu2 %v3486_v20  ;;  %v4525_v20 = vld [vmem:[#allocation26_spill] sm:$0xff] }
 0x19f   :  { %1131 = vmatpush.msra.mxu3 %v3663_v33  ;;  %1151 = vmatpush.msrb.mxu0 %v3665_v53 }
 0x1a0   :  { %1191 = vmatpush.msrb.mxu2 %v3546_v2  ;;  %1302 = vmatpush.msra.mxu1 %v3466_v14  ;;  %v4524_v14 = vld [vmem:[#allocation21_spill] sm:$0xff] }
 0x1a1   :  { %1211 = vmatpush.msrb.mxu3 %v3676_v60  ;;  %1231 = vmatpush.msra.mxu0 %v3702_v36 }
 0x1a2   :  { %1192 = vmatpush.msrb.mxu2 %v3564_v30 }
 0x1a3   :  { %1212 = vmatpush.msrb.mxu3 %v3678_v61  ;;  %1232 = vmatpush.msra.mxu0 %v3704_v39 }
 0x1a4   :  { %1193 = vmatpush.msrb.mxu2 %v3579_v50 }
 0x1a5   :  { %1213 = vmatpush.msrb.mxu3 %v3682_v37  ;;  %2853 = vmatmul.msk.f32.vlgmr.msra.gmra.mxu2 %vm440_vm10, %v3811_v24 }
 0x1a6   :  { %1233 = vmatpush.msra.mxu0 %v3711_v22  ;;  %1194 = vmatpush.msrb.mxu2 %v3593_v56 }
 0x1a7   :  { %1214 = vmatpush.msrb.mxu3 %v3687_v62 }
 0x1a8   :  { %1319 = vmatpush.msra.mxu2 %v3448_v9  ;;  %1234 = vmatpush.msra.mxu0 %v4521_v8 }
 0x1aa   :  { %1320 = vmatpush.msra.mxu2 %v4522_v10 }
 0x1ac   :  { %1321 = vmatpush.msra.mxu2 %v4523_v12 }
 0x1ae   :  { %1322 = vmatpush.msra.mxu2 %v4524_v14 }
 0x205   :  { %v914_v15 = vpop.f32.mrf.mxu1 }
 0x213   :  { %v891_v17 = vpop.f32.mrf.mxu0  ;;  %v1042_v19 = vpop.f32.mrf.mxu1 }
 0x214   :  { %v1085_v57 = vadd.f32 %v1042_v19, %v4525_v20 }
 0x216   :  { %v2855_v6 = vmul.f32 -1.442695, %v1085_v57 }
 0x218   :  { %2976 = vpow2.f32 %v2855_v6  ;;  %v851_v28 = vpop.f32.mrf.mxu2  ;;  %v871_v21 = vpop.f32.mrf.mxu3 }
 0x219   :  { %v852_v3 = vadd.f32 %v851_v28, %v4526_v58  ;;  %v872_v5 = vadd.f32 %v871_v21, %v4528_v45 }
 0x21b   :  { %v957_v44 = vadd.f32 %v914_v15, %v852_v3  ;;  %v1022_v9 = vpop.f32.mrf.mxu0  ;;  %v892_v15 = vadd.f32 %v891_v17, %v3787_v59 }
 0x21c   :  { %v1065_v25 = vadd.f32 %v1022_v9, %v4527_v35 }
 0x21d   :  { %v2849_v40 = vmul.f32 -1.442695, %v957_v44 }
 0x21e   :  { %v2977_v13 = vpop.eup %2976  ;;  %v2854_v16 = vmul.f32 -1.442695, %v1065_v25 }
 0x21f   :  { %2978 = vpow2.f32 %v2849_v40  ;;  %v3864_v31 = vadd.f32 1.0, %v2977_v13  ;;  %v4529_v13 = vld [vmem:[#allocation43_spill] sm:$0xff] }
 0x220   :  { %2980 = vpow2.f32 %v2854_v16  ;;  %v934_v46 = vpop.f32.mrf.mxu2  ;;  %v954_v19 = vpop.f32.mrf.mxu3 }
 0x221   :  { %v977_v29 = vadd.f32 %v934_v46, %v872_v5  ;;  %2982 = vrcp.f32 %v3864_v31  ;;  %v997_v17 = vadd.f32 %v4529_v13, %v954_v19  ;;  %vm1095_vm11 = vweird.f32 %v3864_v31 }
 0x223   :  { %v2850_v51 = vmul.f32 -1.442695, %v977_v29 }
 0x225   :  { %v2979_v11 = vpop.eup %2978  ;;  %2984 = vpow2.f32 %v2850_v51 }
 0x226   :  { %v2981_v34 = vpop.eup %2980  ;;  %v961_v23 = vadd.f32 1.0, %v2979_v11 }
 0x227   :  { %v1069_v38 = vadd.f32 1.0, %v2981_v34  ;;  %v3868_v18 = vpop.eup %2982 }
 0x228   :  { %2986 = vrcp.f32 %v961_v23  ;;  %v1091_v52 = vmul.f32 %v3868_v18, %v3864_v31  ;;  %v971_v6 = vand.u32 2147483647, %v961_v23  ;;  %v973_v28 = vand.u32 2147483648, %v961_v23  ;;  %v1062_v9 = vpop.f32.mrf.mxu2 }
 0x229   :  { %2988 = vrcp.f32 %v1069_v38  ;;  %v1081_v3 = vand.u32 2147483648, %v1069_v38  ;;  %v1079_v25 = vand.u32 2147483647, %v1069_v38  ;;  %vm1096_vm2 = vweird.f32 %v3868_v18 }
 0x22a   :  { %v1092_v14 = vsub.f32 1.0, %v1091_v52  ;;  %vm967_vm3 = vweird.f32 %v961_v23  ;;  %vm1075_vm5 = vweird.f32 %v1069_v38  ;;  %vm972_vm6 = vcmp.eq.f32.partialorder %v971_v6, 8.507059e+37  ;;  %vm3884_vm12 = vmor %vm1095_vm11, %vm1096_vm2 }
 0x22b   :  { %v2985_v0 = vpop.eup %2984  ;;  %v974_v29 = vor.u32 1.1754944e-38, %v973_v28  ;;  %v1082_v51 = vor.u32 1.1754944e-38, %v1081_v3  ;;  %v1105_v11 = vadd.f32 %v3696_v32, %v1062_v9  ;;  %vm1080_vm8 = vcmp.eq.f32.partialorder %v1079_v25, 8.507059e+37 }
 0x22c   :  { %v981_v7 = vadd.f32 1.0, %v2985_v0  ;;  %v1093_v21 = vmul.f32 %v3868_v18, %v1092_v14  ;;  %v1101_v6 = vand.u32 2147483648, %v3864_v31 }
 0x22e   :  { %v2987_v55 = vpop.eup %2986  ;;  %2990 = vrcp.f32 %v981_v7  ;;  %v991_v28 = vand.u32 2147483647, %v981_v7  ;;  %vm987_vm13 = vweird.f32 %v981_v7 }
 0x22f   :  { %v2989_v47 = vpop.eup %2988  ;;  %v963_v10 = vmul.f32 %v2987_v55, %v961_v23  ;;  %vm968_vm14 = vweird.f32 %v2987_v55  ;;  %v1094_v23 = vadd.f32 %v3868_v18, %v1093_v21  ;;  %v1102_v21 = vor.u32 1.1754944e-38, %v1101_v6 }
 0x230   :  { %v1071_v12 = vmul.f32 %v2989_v47, %v1069_v38  ;;  %vm1076_vm15 = vweird.f32 %v2989_v47  ;;  %vm969_vm4 = vmor %vm967_vm3, %vm968_vm14  ;;  %v1099_v38 = vand.u32 2147483647, %v3864_v31 }
 0x231   :  { %v964_v20 = vsub.f32 1.0, %v963_v10  ;;  %vm1077_vm7 = vmor %vm1075_vm5, %vm1076_vm15  ;;  %v993_v10 = vand.u32 2147483648, %v981_v7  ;;  %v1098_v31 = vsel %vm3884_vm12, %v3868_v18, %v1094_v23  ;;  %vm992_vm15 = vcmp.eq.f32.partialorder %v991_v28, 8.507059e+37  ;;  %v3906_v18 = vld [vmem:[#allocation5 + $0x58] sm:$0xff] }
 0x232   :  { %v1072_v57 = vsub.f32 1.0, %v1071_v12  ;;  %vm1100_vm2 = vcmp.eq.f32.partialorder %v1099_v38, 8.507059e+37 }
 0x233   :  { %v965_v44 = vmul.f32 %v2987_v55, %v964_v20 }
 0x234   :  { %v1073_v35 = vmul.f32 %v2989_v47, %v1072_v57  ;;  %v2991_v40 = vpop.eup %2990 }
 0x235   :  { %v983_v16 = vmul.f32 %v2991_v40, %v981_v7  ;;  %v966_v5 = vadd.f32 %v2987_v55, %v965_v44  ;;  %vm988_vm9 = vweird.f32 %v2991_v40  ;;  %v4532_v44 = vld [vmem:[#allocation24_spill] sm:$0xff] }
 0x236   :  { %v1074_v46 = vadd.f32 %v2989_v47, %v1073_v35  ;;  %vm989_vm14 = vmor %vm987_vm13, %vm988_vm9  ;;  %v994_v35 = vor.u32 1.1754944e-38, %v993_v10 }
 0x237   :  { %v984_v34 = vsub.f32 1.0, %v983_v16  ;;  %v970_v0 = vsel %vm969_vm4, %v2987_v55, %v966_v5  ;;  %v1103_v16 = vsel %vm1100_vm2, %v1102_v21, %v1098_v31 }
 0x238   :  { %v1078_v52 = vsel %vm1077_vm7, %v2989_v47, %v1074_v46  ;;  %v975_v12 = vsel %vm972_vm6, %v974_v29, %v970_v0  ;;  %v1109_v7 = vsub.f32 1.0, %v1103_v16 }
 0x239   :  { %v1083_v14 = vsel %vm1080_vm8, %v1082_v51, %v1078_v52  ;;  %v985_v19 = vmul.f32 %v2991_v40, %v984_v34  ;;  %v998_v20 = vmul.f32 %v997_v17, %v975_v12  ;;  %v3917_v52 = vld [vmem:[#allocation5 + $0x28] sm:$0xff] }
 0x23a   :  { %v1106_v57 = vmul.f32 %v1105_v11, %v1083_v14 }
 0x23b   :  { %v986_v47 = vadd.f32 %v2991_v40, %v985_v19  ;;  %v999_v3 = vadd.f32 %v998_v20, %v892_v15 }
 0x23c   :  { %v1107_v9 = vadd.f32 %v1106_v57, %v4532_v44 }
 0x23d   :  { %v990_v25 = vsel %vm989_vm14, %v2991_v40, %v986_v47  ;;  %2992 = vtanh.f32 %v999_v3  ;;  %v1111_v40 = vmul.f32 %v1103_v16, %v3811_v24  ;;  %v3911_v24 = vld [vmem:[#allocation5 + $0x40] sm:$0xff] }
 0x23e   :  { %2994 = vtanh.f32 %v1107_v9  ;;  %v995_v17 = vsel %vm992_vm15, %v994_v35, %v990_v25 }
 0x23f   :  { %v1001_v5 = vsub.f32 1.0, %v995_v17  ;;  %v1003_v51 = vmul.f32 %v995_v17, %v3801_v41 }
 0x243   :  { %v2993_v46 = vpop.eup %2992 }
 0x244   :  { %v2995_v15 = vpop.eup %2994  ;;  %v1002_v29 = vmul.f32 %v2993_v46, %v1001_v5 }
 0x245   :  { %v1110_v11 = vmul.f32 %v2995_v15, %v1109_v7 }
 0x246   :  { %v3894_v34 = vadd.f32 %v1003_v51, %v1002_v29 }
 0x247   :  { %v3896_v0 = vadd.f32 %v1111_v40, %v1110_v11 }
 0x248   :  { %4533 = vst [vmem:[#allocation40_spill] sm:$0xff] %v3894_v34  ;;  %2859 = vmatmul.msk.f32.vlgmr.msrb.gmra.mxu2 %vm440_vm10, %v3894_v34 }
 0x249   :  { %2856 = vmatmul.msk.f32.vlgmr.msra.gmra.mxu3 %vm440_vm10, %v3896_v0  ;;  %2857 = vmatmul.msk.f32.vlgmr.msrb.gmra.mxu0 %vm440_vm10, %v3896_v0 }
 0x24a   :  { %2858 = vmatmul.msk.f32.vlgmr.msrb.gmra.mxu1 %vm440_vm10, %v3896_v0  ;;  %1339 = vmatpush.msra.mxu3 %v3906_v18 }
 0x24b   :  { %1450 = vmatpush.msrb.mxu2 %v3602_v63  ;;  %1410 = vmatpush.msrb.mxu0 %v3605_v1  ;;  %v3925_v63 = vld [vmem:[#allocation5 + $0x10] sm:$0xff]  ;;  %v3940_v1 = vld [vmem:[#allocation5 + $0x48] sm:$0xff] }
 0x24c   :  { %1340 = vmatpush.msra.mxu3 %v3911_v24  ;;  %1430 = vmatpush.msrb.mxu1 %v3607_v4  ;;  %v3970_v4 = vld [vmem:[#allocation5 + $0x20] sm:$0xff] }
 0x24d   :  { %1451 = vmatpush.msrb.mxu2 %v3635_v27  ;;  %1411 = vmatpush.msrb.mxu0 %v3637_v48  ;;  %4534 = vst [vmem:[#allocation19_spill] sm:$0xff] %v3970_v4  ;;  %v3973_v27 = vld [vmem:[#allocation5 + $0x8] sm:$0xff] }
 0x24e   :  { %1341 = vmatpush.msra.mxu3 %v3917_v52  ;;  %1431 = vmatpush.msrb.mxu1 %v3639_v54  ;;  %4535 = vst [vmem:[#allocation20_spill] sm:$0xff] %v3973_v27 }
 0x24f   :  { %1452 = vmatpush.msrb.mxu2 %v3653_v42  ;;  %1412 = vmatpush.msrb.mxu0 %v3655_v43 }
 0x250   :  { %2865 = vmatmul.msk.f32.vlgmr.msra.gmra.mxu2 %vm440_vm10, %v3896_v0  ;;  %1342 = vmatpush.msra.mxu3 %v3925_v63 }
 0x251   :  { %2860 = vmatmul.msk.f32.vlgmr.msrb.gmra.mxu3 %vm440_vm10, %v3894_v34  ;;  %2861 = vmatmul.msk.f32.vlgmr.msra.gmra.mxu0 %vm440_vm10, %v3894_v34 }
 0x252   :  { %2864 = vmatmul.msk.f32.vlgmr.msra.gmra.mxu1 %vm440_vm10, %v3896_v0  ;;  %1473 = vmatpush.msrb.mxu3 %v3546_v2  ;;  %v3946_v2 = vld [vmem:[#allocation5 + $0x30] sm:$0xff] }
 0x253   :  { %1432 = vmatpush.msrb.mxu1 %v3657_v26  ;;  %1453 = vmatpush.msrb.mxu2 %v3661_v49 }
 0x254   :  { %1474 = vmatpush.msrb.mxu3 %v3564_v30  ;;  %1413 = vmatpush.msrb.mxu0 %v3663_v33  ;;  %v3954_v30 = vld [vmem:[#allocation5 + $0x50] sm:$0xff] }
 0x255   :  { %1433 = vmatpush.msrb.mxu1 %v3665_v53  ;;  %1581 = vmatpush.msra.mxu2 %v3940_v1  ;;  %v4536_v53 = vld [vmem:[#allocation23_spill] sm:$0xff] }
 0x256   :  { %1475 = vmatpush.msrb.mxu3 %v3579_v50  ;;  %1493 = vmatpush.msra.mxu0 %v3676_v60  ;;  %v3957_v50 = vld [vmem:[#allocation5 + $0x18] sm:$0xff] }
 0x257   :  { %1513 = vmatpush.msra.mxu1 %v3702_v36  ;;  %1582 = vmatpush.msra.mxu2 %v3946_v2  ;;  %v3962_v36 = vld [vmem:[#allocation5 + $0x38] sm:$0xff] }
 0x258   :  { %1476 = vmatpush.msrb.mxu3 %v3593_v56  ;;  %1494 = vmatpush.msra.mxu0 %v3678_v61  ;;  %v3965_v56 = vld [vmem:[#allocation5] sm:$0xff] }
 0x259   :  { %2866 = vmatmul.msk.f32.vlgmr.msra.gmra.mxu3 %vm440_vm10, %v3896_v0  ;;  %1514 = vmatpush.msra.mxu1 %v3704_v39 }
 0x25a   :  { %1601 = vmatpush.msra.mxu3 %v3954_v30  ;;  %1583 = vmatpush.msra.mxu2 %v3957_v50 }
 0x25b   :  { %1495 = vmatpush.msra.mxu0 %v3682_v37  ;;  %1515 = vmatpush.msra.mxu1 %v3711_v22 }
 0x25c   :  { %1602 = vmatpush.msra.mxu3 %v3962_v36  ;;  %1584 = vmatpush.msra.mxu2 %v3965_v56 }
 0x25d   :  { %1496 = vmatpush.msra.mxu0 %v3687_v62  ;;  %1516 = vmatpush.msra.mxu1 %v4521_v8  ;;  %v4537_v8 = vld [vmem:[#allocation27_spill] sm:$0xff] }
 0x25e   :  { %1603 = vmatpush.msra.mxu3 %v3970_v4 }
 0x260   :  { %1604 = vmatpush.msra.mxu3 %v3973_v27 }
 0x2c6   :  { %v1153_v33 = vpop.f32.mrf.mxu0 }
 0x2c7   :  { %v1173_v48 = vpop.f32.mrf.mxu1  ;;  %v1154_v62 = vadd.f32 %v1153_v33, %v4528_v45 }
 0x2c8   :  { %v1174_v21 = vadd.f32 %v1173_v48, %v3787_v59 }
 0x2cb   :  { %v1196_v54 = vpop.f32.mrf.mxu2 }
 0x2cc   :  { %v1133_v42 = vpop.f32.mrf.mxu3 }
 0x2cd   :  { %v1134_v43 = vadd.f32 %v1133_v42, %v4526_v58 }
 0x2ce   :  { %v1236_v9 = vpop.f32.mrf.mxu0 }
 0x2cf   :  { %v1239_v26 = vadd.f32 %v1196_v54, %v1134_v43  ;;  %v1304_v49 = vpop.f32.mrf.mxu1  ;;  %v1279_v5 = vadd.f32 %v4529_v13, %v1236_v9  ;;  %v4029_v54 = vld [vmem:[#allocation10 + $0x50] sm:$0xff] }
 0x2d0   :  { %v1347_v60 = vadd.f32 %v1304_v49, %v4536_v53 }
 0x2d1   :  { %v2862_v61 = vmul.f32 -1.442695, %v1239_v26 }
 0x2d2   :  { %v2867_v37 = vmul.f32 -1.442695, %v1347_v60 }
 0x2d3   :  { %2996 = vpow2.f32 %v2862_v61  ;;  %v1324_v39 = vpop.f32.mrf.mxu2 }
 0x2d4   :  { %2998 = vpow2.f32 %v2867_v37  ;;  %v1216_v22 = vpop.f32.mrf.mxu3  ;;  %v1367_v23 = vadd.f32 %v1324_v39, %v4537_v8 }
 0x2d5   :  { %v1259_v10 = vadd.f32 %v1216_v22, %v1154_v62 }
 0x2d6   :  { %v2868_v12 = vmul.f32 -1.442695, %v1367_v23 }
 0x2d7   :  { %v2863_v14 = vmul.f32 -1.442695, %v1259_v10 }
 0x2d8   :  { %3000 = vpow2.f32 %v2868_v12 }
 0x2d9   :  { %v2997_v19 = vpop.eup %2996  ;;  %3002 = vpow2.f32 %v2863_v14 }
 0x2da   :  { %v2999_v20 = vpop.eup %2998  ;;  %v1243_v57 = vadd.f32 1.0, %v2997_v19 }
 0x2db   :  { %v1351_v38 = vadd.f32 1.0, %v2999_v20 }
 0x2dc   :  { %3004 = vrcp.f32 %v1243_v57  ;;  %v1253_v25 = vand.u32 2147483647, %v1243_v57  ;;  %v1255_v16 = vand.u32 2147483648, %v1243_v57  ;;  %v1344_v46 = vpop.f32.mrf.mxu3  ;;  %vm1249_vm3 = vweird.f32 %v1243_v57 }
 0x2dd   :  { %3006 = vrcp.f32 %v1351_v38  ;;  %v1361_v15 = vand.u32 2147483647, %v1351_v38  ;;  %v1363_v29 = vand.u32 2147483648, %v1351_v38  ;;  %vm1357_vm5 = vweird.f32 %v1351_v38 }
 0x2de   :  { %v3001_v6 = vpop.eup %3000  ;;  %vm3988_vm6 = vcmp.eq.f32.partialorder %v1253_v25, 8.507059e+37  ;;  %v1256_v26 = vor.u32 1.1754944e-38, %v1255_v16  ;;  %v1387_v33 = vadd.f32 %v3696_v32, %v1344_v46 }
 0x2df   :  { %v3003_v28 = vpop.eup %3002  ;;  %v3980_v55 = vadd.f32 1.0, %v3001_v6  ;;  %vm1362_vm9 = vcmp.eq.f32.partialorder %v1361_v15, 8.507059e+37  ;;  %v1364_v61 = vor.u32 1.1754944e-38, %v1363_v29 }
 0x2e0   :  { %v3982_v47 = vadd.f32 1.0, %v3003_v28 }
 0x2e1   :  { %3008 = vrcp.f32 %v3980_v55  ;;  %vm1377_vm11 = vweird.f32 %v3980_v55  ;;  %v1383_v20 = vand.u32 2147483648, %v3980_v55 }
 0x2e2   :  { %v3005_v3 = vpop.eup %3004  ;;  %3010 = vrcp.f32 %v3982_v47  ;;  %v1275_v39 = vand.u32 2147483648, %v3982_v47  ;;  %v1273_v14 = vand.u32 2147483647, %v3982_v47  ;;  %vm1269_vm15 = vweird.f32 %v3982_v47 }
 0x2e3   :  { %v3007_v44 = vpop.eup %3006  ;;  %v1245_v35 = vmul.f32 %v3005_v3, %v1243_v57  ;;  %vm1250_vm4 = vweird.f32 %v3005_v3 }
 0x2e4   :  { %v1353_v31 = vmul.f32 %v3007_v44, %v1351_v38  ;;  %vm1358_vm7 = vweird.f32 %v3007_v44  ;;  %vm1251_vm8 = vmor %vm1249_vm3, %vm1250_vm4  ;;  %v1381_v38 = vand.u32 2147483647, %v3980_v55  ;;  %vm1274_vm4 = vcmp.eq.f32.partialorder %v1273_v14, 8.507059e+37  ;;  %v4102_v14 = vld [vmem:[#allocation11 + $0x28] sm:$0xff] }
 0x2e5   :  { %v1246_v17 = vsub.f32 1.0, %v1245_v35  ;;  %vm1359_vm12 = vmor %vm1357_vm5, %vm1358_vm7  ;;  %v1276_v35 = vor.u32 1.1754944e-38, %v1275_v39  ;;  %v4076_v39 = vld [vmem:[#allocation11 + $0x18] sm:$0xff] }
 0x2e6   :  { %v1354_v7 = vsub.f32 1.0, %v1353_v31  ;;  %v1384_v31 = vor.u32 1.1754944e-38, %v1383_v20  ;;  %vm1382_vm5 = vcmp.eq.f32.partialorder %v1381_v38, 8.507059e+37  ;;  %v4110_v20 = vld [vmem:[#allocation11 + $0x10] sm:$0xff] }
 0x2e7   :  { %v3009_v51 = vpop.eup %3008  ;;  %v1247_v11 = vmul.f32 %v3005_v3, %v1246_v17 }
 0x2e8   :  { %v3011_v40 = vpop.eup %3010  ;;  %v1373_v48 = vmul.f32 %v3009_v51, %v3980_v55  ;;  %v1355_v42 = vmul.f32 %v3007_v44, %v1354_v7  ;;  %vm1378_vm13 = vweird.f32 %v3009_v51 }
 0x2e9   :  { %v1248_v43 = vadd.f32 %v3005_v3, %v1247_v11  ;;  %v1265_v49 = vmul.f32 %v3011_v40, %v3982_v47  ;;  %vm1270_vm14 = vweird.f32 %v3011_v40  ;;  %vm1379_vm2 = vmor %vm1377_vm11, %vm1378_vm13 }
 0x2ea   :  { %v1374_v53 = vsub.f32 1.0, %v1373_v48  ;;  %v1356_v60 = vadd.f32 %v3007_v44, %v1355_v42  ;;  %vm1271_vm3 = vmor %vm1269_vm15, %vm1270_vm14  ;;  %v4032_v48 = vld [vmem:[#allocation10 + $0x40] sm:$0xff]  ;;  %v4035_v42 = vld [vmem:[#allocation10 + $0x30] sm:$0xff] }
 0x2eb   :  { %v1252_v37 = vsel %vm1251_vm8, %v3005_v3, %v1248_v43  ;;  %v1266_v62 = vsub.f32 1.0, %v1265_v49  ;;  %v4540_v3 = vld [vmem:[#allocation25_spill] sm:$0xff]  ;;  %v4039_v43 = vld [vmem:[#allocation10 + $0x38] sm:$0xff] }
 0x2ec   :  { %v1257_v22 = vsel %vm3988_vm6, %v1256_v26, %v1252_v37  ;;  %v1375_v8 = vmul.f32 %v3009_v51, %v1374_v53  ;;  %v1360_v23 = vsel %vm1359_vm12, %v3007_v44, %v1356_v60  ;;  %v4042_v26 = vld [vmem:[#allocation10 + $0x28] sm:$0xff]  ;;  %v4045_v49 = vld [vmem:[#allocation10 + $0x18] sm:$0xff]  ;;  %v4060_v53 = vld [vmem:[#allocation10 + $0x20] sm:$0xff] }
 0x2ed   :  { %v1280_v32 = vmul.f32 %v1279_v5, %v1257_v22  ;;  %v1267_v10 = vmul.f32 %v3011_v40, %v1266_v62  ;;  %v1365_v12 = vsel %vm1362_vm9, %v1364_v61, %v1360_v23  ;;  %v4063_v60 = vld [vmem:[#allocation10 + $0x10] sm:$0xff]  ;;  %v4069_v37 = vld [vmem:[#allocation10] sm:$0xff]  ;;  %v4072_v62 = vld [vmem:[#allocation10 + $0x8] sm:$0xff] }
 0x2ee   :  { %v1376_v19 = vadd.f32 %v3009_v51, %v1375_v8  ;;  %v1388_v57 = vmul.f32 %v1387_v33, %v1365_v12  ;;  %v4057_v33 = vld [vmem:[#allocation11 + $0x48] sm:$0xff]  ;;  %v4066_v61 = vld [vmem:[#allocation11 + $0x30] sm:$0xff]  ;;  %v4082_v8 = vld [vmem:[#allocation11 + $0x58] sm:$0xff] }
 0x2ef   :  { %v1281_v6 = vadd.f32 %v1280_v32, %v1174_v21  ;;  %v1268_v28 = vadd.f32 %v3011_v40, %v1267_v10  ;;  %v4079_v22 = vld [vmem:[#allocation11 + $0x50] sm:$0xff]  ;;  %v4086_v23 = vld [vmem:[#allocation11] sm:$0xff]  ;;  %v4089_v32 = vld [vmem:[#allocation11 + $0x38] sm:$0xff] }
 0x2f0   :  { %v1389_v44 = vadd.f32 %v1388_v57, %v4540_v3  ;;  %v1380_v25 = vsel %vm1379_vm2, %v3009_v51, %v1376_v19  ;;  %v4022_v51 = vld [vmem:[#allocation10 + $0x58] sm:$0xff]  ;;  %v4094_v10 = vld [vmem:[#allocation11 + $0x40] sm:$0xff]  ;;  %v4107_v19 = vld [vmem:[#allocation11 + $0x8] sm:$0xff] }
 0x2f1   :  { %3012 = vtanh.f32 %v1281_v6  ;;  %v1272_v9 = vsel %vm1271_vm3, %v3011_v40, %v1268_v28  ;;  %v1385_v21 = vsel %vm1382_vm5, %v1384_v31, %v1380_v25  ;;  %v4099_v12 = vld [vmem:[#allocation11 + $0x20] sm:$0xff] }
 0x2f2   :  { %3014 = vtanh.f32 %v1389_v44  ;;  %v1277_v17 = vsel %vm1274_vm4, %v1276_v35, %v1272_v9  ;;  %v1391_v5 = vsub.f32 1.0, %v1385_v21  ;;  %v1393_v29 = vmul.f32 %v1385_v21, %v3896_v0  ;;  %v4025_v0 = vld [vmem:[#allocation10 + $0x48] sm:$0xff] }
 0x2f3   :  { %v1283_v16 = vsub.f32 1.0, %v1277_v17  ;;  %v1285_v55 = vmul.f32 %v1277_v17, %v3894_v34 }
 0x2f7   :  { %v3013_v47 = vpop.eup %3012 }
 0x2f8   :  { %v3015_v46 = vpop.eup %3014  ;;  %v1284_v7 = vmul.f32 %v3013_v47, %v1283_v16  ;;  %v4542_v16 = vld [vmem:[#allocation29_spill] sm:$0xff] }
 0x2f9   :  { %v1392_v15 = vmul.f32 %v3015_v46, %v1391_v5 }
 0x2fa   :  { %v4009_v11 = vadd.f32 %v1285_v55, %v1284_v7  ;;  %v4543_v7 = vld [vmem:[#allocation28_spill] sm:$0xff] }
 0x2fb   :  { %v4011_v40 = vadd.f32 %v1393_v29, %v1392_v15 }
 0x2fc   :  { %4541 = vst [vmem:[#allocation21_spill] sm:$0xff] %v4009_v11  ;;  %2872 = vmatmul.msk.f32.vlgmr.msrb.gmra.mxu3 %vm440_vm10, %v4009_v11 }
 0x2fd   :  { %2869 = vmatmul.msk.f32.vlgmr.msrb.gmra.mxu0 %vm440_vm10, %v4011_v40  ;;  %2870 = vmatmul.msk.f32.vlgmr.msrb.gmra.mxu1 %vm440_vm10, %v4011_v40 }
 0x2fe   :  { %2871 = vmatmul.msk.f32.vlgmr.msrb.gmra.mxu2 %vm440_vm10, %v4011_v40  ;;  %1621 = vmatpush.msrb.mxu0 %v3906_v18 }
 0x2ff   :  { %1732 = vmatpush.msrb.mxu3 %v4022_v51  ;;  %1692 = vmatpush.msrb.mxu1 %v4025_v0 }
 0x300   :  { %1622 = vmatpush.msrb.mxu0 %v3911_v24  ;;  %1712 = vmatpush.msrb.mxu2 %v4029_v54 }
 0x301   :  { %1733 = vmatpush.msrb.mxu3 %v4032_v48  ;;  %1693 = vmatpush.msrb.mxu1 %v4035_v42 }
 0x302   :  { %1623 = vmatpush.msrb.mxu0 %v3917_v52  ;;  %1713 = vmatpush.msrb.mxu2 %v4039_v43 }
 0x303   :  { %1734 = vmatpush.msrb.mxu3 %v4042_v26  ;;  %1694 = vmatpush.msrb.mxu1 %v4045_v49 }
 0x304   :  { %2878 = vmatmul.msk.f32.vlgmr.msra.gmra.mxu3 %vm440_vm10, %v4011_v40  ;;  %1624 = vmatpush.msrb.mxu0 %v3925_v63 }
 0x305   :  { %2873 = vmatmul.msk.f32.vlgmr.msra.gmra.mxu0 %vm440_vm10, %v4009_v11  ;;  %2874 = vmatmul.msk.f32.vlgmr.msra.gmra.mxu1 %vm440_vm10, %v4009_v11 }
 0x306   :  { %2877 = vmatmul.msk.f32.vlgmr.msra.gmra.mxu2 %vm440_vm10, %v4011_v40  ;;  %1755 = vmatpush.msra.mxu0 %v4057_v33 }
 0x307   :  { %1714 = vmatpush.msrb.mxu2 %v4060_v53  ;;  %1735 = vmatpush.msrb.mxu3 %v4063_v60 }
 0x308   :  { %1756 = vmatpush.msra.mxu0 %v4066_v61  ;;  %1695 = vmatpush.msrb.mxu1 %v4069_v37 }
 0x309   :  { %1715 = vmatpush.msrb.mxu2 %v4072_v62  ;;  %1863 = vmatpush.msra.mxu3 %v3940_v1 }
 0x30a   :  { %1757 = vmatpush.msra.mxu0 %v4076_v39  ;;  %1775 = vmatpush.msra.mxu1 %v4079_v22 }
 0x30b   :  { %1795 = vmatpush.msra.mxu2 %v4082_v8  ;;  %1864 = vmatpush.msra.mxu3 %v3946_v2 }
 0x30c   :  { %1758 = vmatpush.msra.mxu0 %v4086_v23  ;;  %1776 = vmatpush.msra.mxu1 %v4089_v32 }
 0x30d   :  { %2879 = vmatmul.msk.f32.vlgmr.msrb.gmra.mxu0 %vm440_vm10, %v4011_v40  ;;  %1796 = vmatpush.msra.mxu2 %v4094_v10 }
 0x30e   :  { %1883 = vmatpush.msrb.mxu0 %v3954_v30  ;;  %1865 = vmatpush.msra.mxu3 %v3957_v50 }
 0x30f   :  { %1777 = vmatpush.msra.mxu1 %v4099_v12  ;;  %1797 = vmatpush.msra.mxu2 %v4102_v14 }
 0x310   :  { %1884 = vmatpush.msrb.mxu0 %v3962_v36  ;;  %1866 = vmatpush.msra.mxu3 %v3965_v56 }
 0x311   :  { %1778 = vmatpush.msra.mxu1 %v4107_v19  ;;  %1798 = vmatpush.msra.mxu2 %v4110_v20 }
 0x312   :  { %1885 = vmatpush.msrb.mxu0 %v3970_v4 }
 0x314   :  { %1886 = vmatpush.msrb.mxu0 %v3973_v27 }
 0x37a   :  { %v1415_v57 = vpop.f32.mrf.mxu0  ;;  %v1435_v28 = vpop.f32.mrf.mxu1 }
 0x37b   :  { %v1416_v6 = vadd.f32 %v1415_v57, %v4526_v58  ;;  %v1436_v44 = vadd.f32 %v1435_v28, %v4528_v45 }
 0x37f   :  { %v1478_v38 = vpop.f32.mrf.mxu3 }
 0x380   :  { %v1521_v3 = vadd.f32 %v1478_v38, %v1416_v6 }
 0x381   :  { %v1455_v9 = vpop.f32.mrf.mxu2 }
 0x382   :  { %v2875_v35 = vmul.f32 -1.442695, %v1521_v3  ;;  %v1498_v25 = vpop.f32.mrf.mxu0 }
 0x383   :  { %v1541_v31 = vadd.f32 %v1498_v25, %v1436_v44 }
 0x384   :  { %3016 = vpow2.f32 %v2875_v35 }
 0x385   :  { %v2876_v17 = vmul.f32 -1.442695, %v1541_v31 }
 0x387   :  { %3018 = vpow2.f32 %v2876_v17  ;;  %v1606_v21 = vpop.f32.mrf.mxu3 }
 0x388   :  { %v1649_v47 = vadd.f32 %v1606_v21, %v4542_v16 }
 0x389   :  { %v1586_v5 = vpop.f32.mrf.mxu2 }
 0x38a   :  { %v3017_v46 = vpop.eup %3016  ;;  %v1629_v55 = vadd.f32 %v1586_v5, %v4543_v7  ;;  %v2881_v15 = vmul.f32 -1.442695, %v1649_v47 }
 0x38b   :  { %v1525_v29 = vadd.f32 1.0, %v3017_v46 }
 0x38c   :  { %v2880_v57 = vmul.f32 -1.442695, %v1629_v55  ;;  %3020 = vpow2.f32 %v2881_v15  ;;  %v1518_v55 = vpop.f32.mrf.mxu1 }
 0x38d   :  { %v3019_v6 = vpop.eup %3018  ;;  %3022 = vrcp.f32 %v1525_v29  ;;  %v1537_v47 = vand.u32 2147483648, %v1525_v29  ;;  %v1535_v46 = vand.u32 2147483647, %v1525_v29  ;;  %vm1531_vm7 = vweird.f32 %v1525_v29 }
 0x38e   :  { %v1545_v28 = vadd.f32 1.0, %v3019_v6  ;;  %3024 = vpow2.f32 %v2880_v57 }
 0x38f   :  { %vm1536_vm9 = vcmp.eq.f32.partialorder %v1535_v46, 8.507059e+37 }
 0x390   :  { %3026 = vrcp.f32 %v1545_v28  ;;  %vm1551_vm12 = vweird.f32 %v1545_v28 }
 0x392   :  { %v3021_v38 = vpop.eup %3020 }
 0x393   :  { %v3023_v3 = vpop.eup %3022  ;;  %v4119_v44 = vadd.f32 1.0, %v3021_v38  ;;  %v1538_v38 = vor.u32 1.1754944e-38, %v1537_v47 }
 0x394   :  { %v3025_v35 = vpop.eup %3024  ;;  %v1527_v25 = vmul.f32 %v3023_v3, %v1525_v29  ;;  %vm1532_vm6 = vweird.f32 %v3023_v3  ;;  %v1555_v29 = vand.u32 2147483647, %v1545_v28 }
 0x395   :  { %v1633_v31 = vadd.f32 1.0, %v3025_v35  ;;  %3028 = vrcp.f32 %v4119_v44  ;;  %vm1533_vm8 = vmor %vm1531_vm7, %vm1532_vm6  ;;  %v1561_v35 = vadd.f32 %v4529_v13, %v1518_v55  ;;  %vm1659_vm6 = vweird.f32 %v4119_v44 }
 0x396   :  { %v3027_v17 = vpop.eup %3026  ;;  %v1528_v21 = vsub.f32 1.0, %v1527_v25  ;;  %vm1556_vm15 = vcmp.eq.f32.partialorder %v1555_v29, 8.507059e+37 }
 0x397   :  { %v1547_v16 = vmul.f32 %v3027_v17, %v1545_v28  ;;  %3030 = vrcp.f32 %v1633_v31  ;;  %vm1552_vm11 = vweird.f32 %v3027_v17  ;;  %v1645_v13 = vand.u32 2147483648, %v1633_v31 }
 0x398   :  { %v1529_v5 = vmul.f32 %v3023_v3, %v1528_v21  ;;  %v1557_v21 = vand.u32 2147483648, %v1545_v28  ;;  %vm1553_vm13 = vmor %vm1551_vm12, %vm1552_vm11  ;;  %vm1639_vm2 = vweird.f32 %v1633_v31 }
 0x399   :  { %v1548_v7 = vsub.f32 1.0, %v1547_v16  ;;  %v1456_v16 = vadd.f32 %v1455_v9, %v3787_v59 }
 0x39a   :  { %v1530_v15 = vadd.f32 %v3023_v3, %v1529_v5  ;;  %v1558_v46 = vor.u32 1.1754944e-38, %v1557_v21 }
 0x39b   :  { %v3029_v57 = vpop.eup %3028  ;;  %v1549_v6 = vmul.f32 %v3027_v17, %v1548_v7 }
 0x39c   :  { %v1534_v41 = vsel %vm1533_vm8, %v3023_v3, %v1530_v15  ;;  %v1655_v25 = vmul.f32 %v3029_v57, %v4119_v44  ;;  %vm1660_vm5 = vweird.f32 %v3029_v57 }
 0x39d   :  { %v3031_v34 = vpop.eup %3030  ;;  %v1550_v45 = vadd.f32 %v3027_v17, %v1549_v6  ;;  %v1539_v58 = vsel %vm1536_vm9, %v1538_v38, %v1534_v41  ;;  %v1643_v6 = vand.u32 2147483647, %v1633_v31  ;;  %v1626_v41 = vpop.f32.mrf.mxu0  ;;  %vm1661_vm7 = vmor %vm1659_vm6, %vm1660_vm5 }
 0x39e   :  { %v1562_v27 = vmul.f32 %v1561_v35, %v1539_v58  ;;  %v1635_v5 = vmul.f32 %v3031_v34, %v1633_v31  ;;  %v1656_v7 = vsub.f32 1.0, %v1655_v25  ;;  %vm1640_vm14 = vweird.f32 %v3031_v34  ;;  %v4125_v35 = vld [vmem:[#allocation8] ss:$0 sm:$0xff]  ;;  %v4544_v31 = vld [vmem:[#allocation30_spill] sm:$0xff] }
 0x39f   :  { %v1554_v15 = vsel %vm1553_vm13, %v3027_v17, %v1550_v45  ;;  %vm1641_vm3 = vmor %vm1639_vm2, %vm1640_vm14  ;;  %v1646_v58 = vor.u32 1.1754944e-38, %v1645_v13  ;;  %vm1644_vm4 = vcmp.eq.f32.partialorder %v1643_v6, 8.507059e+37 }
 0x3a0   :  { %v1563_v47 = vadd.f32 %v1562_v27, %v1456_v16  ;;  %v1636_v3 = vsub.f32 1.0, %v1635_v5  ;;  %v1657_v4 = vmul.f32 %v3029_v57, %v1656_v7  ;;  %v1559_v38 = vsel %vm1556_vm15, %v1558_v46, %v1554_v15 }
 0x3a1   :  { %v1669_v27 = vadd.f32 %v4125_v35, %v1626_v41  ;;  %v1565_v45 = vsub.f32 1.0, %v1559_v38  ;;  %v1665_v16 = vand.u32 2147483648, %v4119_v44  ;;  %v1567_v7 = vmul.f32 %v1559_v38, %v4009_v11  ;;  %v4546_v41 = vld [vmem:[#allocation20_spill] sm:$0xff] }
 0x3a2   :  { %3032 = vtanh.f32 %v1563_v47  ;;  %v1637_v55 = vmul.f32 %v3031_v34, %v1636_v3  ;;  %v1658_v17 = vadd.f32 %v3029_v57, %v1657_v4 }
 0x3a3   :  { %v1666_v4 = vor.u32 1.1754944e-38, %v1665_v16 }
 0x3a4   :  { %v1638_v9 = vadd.f32 %v3031_v34, %v1637_v55  ;;  %v1662_v46 = vsel %vm1661_vm7, %v3029_v57, %v1658_v17  ;;  %v4548_v17 = vld [vmem:[#allocation31_spill] sm:$0xff] }
 0x3a6   :  { %v1642_v28 = vsel %vm1641_vm3, %v3031_v34, %v1638_v9  ;;  %v1663_v34 = vand.u32 2147483647, %v4119_v44 }
 0x3a7   :  { %v1647_v25 = vsel %vm1644_vm4, %v1646_v58, %v1642_v28  ;;  %v4547_v58 = vld [vmem:[#allocation41_spill] sm:$0xff] }
 0x3a8   :  { %v3033_v21 = vpop.eup %3032  ;;  %v1670_v5 = vmul.f32 %v1669_v27, %v1647_v25  ;;  %vm1664_vm8 = vcmp.eq.f32.partialorder %v1663_v34, 8.507059e+37 }
 0x3a9   :  { %v1566_v29 = vmul.f32 %v3033_v21, %v1565_v45  ;;  %v1667_v15 = vsel %vm1664_vm8, %v1666_v4, %v1662_v46 }
 0x3aa   :  { %v1671_v47 = vadd.f32 %v1670_v5, %v4544_v31  ;;  %v1673_v13 = vsub.f32 1.0, %v1667_v15  ;;  %v1675_v6 = vmul.f32 %v1667_v15, %v4011_v40  ;;  %v4545_v40 = vld [vmem:[#allocation19_spill] sm:$0xff]  ;;  %v4549_v5 = vld [vmem:[#allocation42_spill] sm:$0xff] }
 0x3ab   :  { %v4133_v3 = vadd.f32 %v1567_v7, %v1566_v29 }
 0x3ac   :  { %3034 = vtanh.f32 %v1671_v47 }
 0x3ad   :  { %2885 = vmatmul.msk.f32.vlgmr.msra.gmra.mxu0 %vm440_vm10, %v4133_v3 }
 0x3ae   :  { %2014 = vmatpush.msra.mxu0 %v4022_v51 }
 0x3b0   :  { %2015 = vmatpush.msra.mxu0 %v4032_v48 }
 0x3b2   :  { %v3035_v55 = vpop.eup %3034  ;;  %2016 = vmatpush.msra.mxu0 %v4042_v26 }
 0x3b3   :  { %v1674_v44 = vmul.f32 %v3035_v55, %v1673_v13  ;;  %v4550_v55 = vld [vmem:[#allocation32_spill] sm:$0xff] }
 0x3b4   :  { %2017 = vmatpush.msra.mxu0 %v4063_v60 }
 0x3b5   :  { %v4142_v57 = vadd.f32 %v1675_v6, %v1674_v44 }
 0x3b7   :  { %2882 = vmatmul.msk.f32.vlgmr.msrb.gmra.mxu1 %vm440_vm10, %v4142_v57  ;;  %2883 = vmatmul.msk.f32.vlgmr.msrb.gmra.mxu2 %vm440_vm10, %v4142_v57 }
 0x3b8   :  { %2884 = vmatmul.msk.f32.vlgmr.msrb.gmra.mxu3 %vm440_vm10, %v4142_v57  ;;  %2891 = vmatmul.msk.f32.vlgmr.msrb.gmra.mxu0 %vm440_vm10, %v4142_v57 }
 0x3b9   :  { %1903 = vmatpush.msrb.mxu1 %v3906_v18  ;;  %1974 = vmatpush.msrb.mxu2 %v4025_v0 }
 0x3ba   :  { %1994 = vmatpush.msrb.mxu3 %v4029_v54  ;;  %2145 = vmatpush.msrb.mxu0 %v3940_v1 }
 0x3bb   :  { %1904 = vmatpush.msrb.mxu1 %v3911_v24  ;;  %1975 = vmatpush.msrb.mxu2 %v4035_v42 }
 0x3bc   :  { %1995 = vmatpush.msrb.mxu3 %v4039_v43  ;;  %2146 = vmatpush.msrb.mxu0 %v3946_v2 }
 0x3bd   :  { %1905 = vmatpush.msrb.mxu1 %v3917_v52  ;;  %1976 = vmatpush.msrb.mxu2 %v4045_v49 }
 0x3be   :  { %1996 = vmatpush.msrb.mxu3 %v4060_v53  ;;  %2147 = vmatpush.msrb.mxu0 %v3957_v50 }
 0x3bf   :  { %2886 = vmatmul.msk.f32.vlgmr.msra.gmra.mxu1 %vm440_vm10, %v4133_v3  ;;  %2887 = vmatmul.msk.f32.vlgmr.msra.gmra.mxu2 %vm440_vm10, %v4133_v3 }
 0x3c0   :  { %2890 = vmatmul.msk.f32.vlgmr.msra.gmra.mxu3 %vm440_vm10, %v4142_v57  ;;  %1906 = vmatpush.msrb.mxu1 %v3925_v63 }
 0x3c1   :  { %1977 = vmatpush.msrb.mxu2 %v4069_v37  ;;  %1997 = vmatpush.msrb.mxu3 %v4072_v62 }
 0x3c2   :  { %2037 = vmatpush.msra.mxu1 %v4057_v33  ;;  %2148 = vmatpush.msrb.mxu0 %v3965_v56 }
 0x3c3   :  { %2057 = vmatpush.msra.mxu2 %v4079_v22  ;;  %2077 = vmatpush.msra.mxu3 %v4082_v8 }
 0x3c4   :  { %2038 = vmatpush.msra.mxu1 %v4066_v61 }
 0x3c5   :  { %2058 = vmatpush.msra.mxu2 %v4089_v32  ;;  %2078 = vmatpush.msra.mxu3 %v4094_v10 }
 0x3c6   :  { %2039 = vmatpush.msra.mxu1 %v4076_v39 }
 0x3c7   :  { %2059 = vmatpush.msra.mxu2 %v4099_v12  ;;  %2892 = vmatmul.msk.f32.vlgmr.msrb.gmra.mxu1 %vm440_vm10, %v4142_v57 }
 0x3c8   :  { %2079 = vmatpush.msra.mxu3 %v4102_v14  ;;  %2040 = vmatpush.msra.mxu1 %v4086_v23 }
 0x3c9   :  { %2060 = vmatpush.msra.mxu2 %v4107_v19 }
 0x3ca   :  { %2165 = vmatpush.msrb.mxu1 %v3954_v30  ;;  %2080 = vmatpush.msra.mxu3 %v4110_v20 }
 0x3cc   :  { %2166 = vmatpush.msrb.mxu1 %v3962_v36 }
 0x3ce   :  { %2167 = vmatpush.msrb.mxu1 %v4545_v40 }
 0x3d0   :  { %2168 = vmatpush.msrb.mxu1 %v4546_v41 }
 0x42a   :  { %v1760_v38 = vpop.f32.mrf.mxu0 }
 0x434   :  { %v1697_v9 = vpop.f32.mrf.mxu1 }
 0x435   :  { %v1698_v28 = vadd.f32 %v1697_v9, %v4547_v58  ;;  %v1888_v27 = vpop.f32.mrf.mxu0 }
 0x436   :  { %v1931_v25 = vadd.f32 %v1888_v27, %v4548_v17 }
 0x437   :  { %v1803_v45 = vadd.f32 %v1760_v38, %v1698_v28 }
 0x438   :  { %v2894_v34 = vmul.f32 -1.442695, %v1931_v25 }
 0x439   :  { %v2888_v21 = vmul.f32 -1.442695, %v1803_v45 }
 0x43a   :  { %v1717_v16 = vpop.f32.mrf.mxu2 }
 0x43b   :  { %3036 = vpow2.f32 %v2888_v21  ;;  %v1718_v29 = vadd.f32 %v1717_v16, %v4549_v5  ;;  %v1737_v7 = vpop.f32.mrf.mxu3 }
 0x43c   :  { %v1780_v31 = vpop.f32.mrf.mxu1  ;;  %3038 = vpow2.f32 %v2894_v34 }
 0x43d   :  { %v1823_v47 = vadd.f32 %v1780_v31, %v1718_v29 }
 0x43f   :  { %v2889_v46 = vmul.f32 -1.442695, %v1823_v47 }
 0x441   :  { %v3037_v4 = vpop.eup %3036  ;;  %3040 = vpow2.f32 %v2889_v46 }
 0x442   :  { %v1807_v15 = vadd.f32 1.0, %v3037_v4  ;;  %v3039_v6 = vpop.eup %3038  ;;  %v1800_v47 = vpop.f32.mrf.mxu2 }
 0x443   :  { %v1868_v13 = vpop.f32.mrf.mxu3  ;;  %v4196_v27 = vadd.f32 1.0, %v3039_v6 }
 0x444   :  { %3042 = vrcp.f32 %v1807_v15  ;;  %v1911_v44 = vadd.f32 %v1868_v13, %v4550_v55  ;;  %v1819_v21 = vand.u32 2147483648, %v1807_v15  ;;  %v1817_v34 = vand.u32 2147483647, %v1807_v15 }
 0x445   :  { %vm1813_vm11 = vweird.f32 %v1807_v15 }
 0x446   :  { %v2893_v9 = vmul.f32 -1.442695, %v1911_v44  ;;  %v1820_v55 = vor.u32 1.1754944e-38, %v1819_v21  ;;  %vm1818_vm13 = vcmp.eq.f32.partialorder %v1817_v34, 8.507059e+37 }
 0x447   :  { %v3041_v38 = vpop.eup %3040 }
 0x448   :  { %v1827_v28 = vadd.f32 1.0, %v3041_v38  ;;  %3044 = vpow2.f32 %v2893_v9  ;;  %v4204_v9 = vld [vmem:[%s4460_s8] ss:$0 sm:$0xff] }
 0x449   :  { %4551 = vst [vmem:[#allocation26_spill] sm:$0xff] %v4204_v9 }
 0x44a   :  { %v3043_v45 = vpop.eup %3042  ;;  %3046 = vrcp.f32 %v1827_v28  ;;  %vm1833_vm15 = vweird.f32 %v1827_v28 }
 0x44b   :  { %v1809_v17 = vmul.f32 %v3043_v45, %v1807_v15  ;;  %3048 = vrcp.f32 %v4196_v27  ;;  %vm1814_vm9 = vweird.f32 %v3043_v45  ;;  %v1839_v15 = vand.u32 2147483648, %v1827_v28 }
 0x44c   :  { %vm1815_vm12 = vmor %vm1813_vm11, %vm1814_vm9  ;;  %vm1941_vm9 = vweird.f32 %v4196_v27 }
 0x44d   :  { %v1810_v25 = vsub.f32 1.0, %v1809_v17  ;;  %v1843_v17 = vadd.f32 %v4204_v9, %v1800_v47  ;;  %v1840_v5 = vor.u32 1.1754944e-38, %v1839_v15 }
 0x44e   :  { %v3045_v16 = vpop.eup %3044 }
 0x44f   :  { %v1811_v29 = vmul.f32 %v3043_v45, %v1810_v25  ;;  %v1915_v46 = vadd.f32 1.0, %v3045_v16  ;;  %v1738_v25 = vadd.f32 %v1737_v7, %v3787_v59 }
 0x450   :  { %v3047_v31 = vpop.eup %3046 }
 0x451   :  { %v1829_v4 = vmul.f32 %v3047_v31, %v1827_v28  ;;  %v1812_v13 = vadd.f32 %v3043_v45, %v1811_v29  ;;  %3050 = vrcp.f32 %v1915_v46  ;;  %v4199_v44 = vpop.eup %3048  ;;  %vm1834_vm14 = vweird.f32 %v3047_v31 }
 0x452   :  { %v1937_v11 = vmul.f32 %v4199_v44, %v4196_v27  ;;  %vm1835_vm2 = vmor %vm1833_vm15, %vm1834_vm14  ;;  %vm1921_vm5 = vweird.f32 %v1915_v46  ;;  %vm1942_vm8 = vweird.f32 %v4199_v44 }
 0x453   :  { %v1830_v6 = vsub.f32 1.0, %v1829_v4  ;;  %v1816_v38 = vsel %vm1815_vm12, %v3043_v45, %v1812_v13  ;;  %v1837_v4 = vand.u32 2147483647, %v1827_v28  ;;  %vm1943_vm11 = vmor %vm1941_vm9, %vm1942_vm8 }
 0x454   :  { %v1821_v16 = vsel %vm1818_vm13, %v1820_v55, %v1816_v38  ;;  %v1938_v9 = vsub.f32 1.0, %v1937_v11 }
 0x455   :  { %v1831_v29 = vmul.f32 %v3047_v31, %v1830_v6  ;;  %v1844_v21 = vmul.f32 %v1843_v17, %v1821_v16  ;;  %vm1838_vm3 = vcmp.eq.f32.partialorder %v1837_v4, 8.507059e+37  ;;  %v1927_v6 = vand.u32 2147483648, %v1915_v46 }
 0x456   :  { %v1925_v17 = vand.u32 2147483647, %v1915_v46  ;;  %v1939_v16 = vmul.f32 %v4199_v44, %v1938_v9 }
 0x457   :  { %v1832_v45 = vadd.f32 %v3047_v31, %v1831_v29  ;;  %v1845_v34 = vadd.f32 %v1844_v21, %v1738_v25  ;;  %v3051_v13 = vpop.eup %3050  ;;  %v1908_v29 = vpop.f32.mrf.mxu1  ;;  %v1928_v15 = vor.u32 1.1754944e-38, %v1927_v6 }
 0x458   :  { %v1917_v47 = vmul.f32 %v3051_v13, %v1915_v46  ;;  %vm1922_vm4 = vweird.f32 %v3051_v13  ;;  %vm1926_vm7 = vcmp.eq.f32.partialorder %v1925_v17, 8.507059e+37  ;;  %v4552_v46 = vld [vmem:[#allocation33_spill] sm:$0xff] }
 0x459   :  { %v1836_v58 = vsel %vm1835_vm2, %v3047_v31, %v1832_v45  ;;  %3052 = vtanh.f32 %v1845_v34  ;;  %vm1923_vm6 = vmor %vm1921_vm5, %vm1922_vm4  ;;  %v1947_v45 = vand.u32 2147483648, %v4196_v27 }
 0x45a   :  { %v1841_v7 = vsel %vm1838_vm3, %v1840_v5, %v1836_v58  ;;  %v1918_v55 = vsub.f32 1.0, %v1917_v47  ;;  %v1951_v58 = vadd.f32 %v4125_v35, %v1908_v29  ;;  %v1940_v5 = vadd.f32 %v4199_v44, %v1939_v16  ;;  %v4555_v29 = vld [vmem:[#allocation35_spill] sm:$0xff] }
 0x45b   :  { %v1847_v59 = vsub.f32 1.0, %v1841_v7  ;;  %v1849_v31 = vmul.f32 %v1841_v7, %v4133_v3  ;;  %v1948_v7 = vor.u32 1.1754944e-38, %v1947_v45 }
 0x45c   :  { %v1919_v38 = vmul.f32 %v3051_v13, %v1918_v55  ;;  %v1944_v47 = vsel %vm1943_vm11, %v4199_v44, %v1940_v5 }
 0x45e   :  { %v1920_v25 = vadd.f32 %v3051_v13, %v1919_v38 }
 0x45f   :  { %v3053_v28 = vpop.eup %3052 }
 0x460   :  { %v1848_v21 = vmul.f32 %v3053_v28, %v1847_v59  ;;  %v1924_v11 = vsel %vm1923_vm6, %v3051_v13, %v1920_v25  ;;  %v1945_v59 = vand.u32 2147483647, %v4196_v27 }
 0x461   :  { %v1929_v9 = vsel %vm1926_vm7, %v1928_v15, %v1924_v11 }
 0x462   :  { %v4215_v4 = vadd.f32 %v1849_v31, %v1848_v21  ;;  %v1952_v34 = vmul.f32 %v1951_v58, %v1929_v9  ;;  %vm1946_vm12 = vcmp.eq.f32.partialorder %v1945_v59, 8.507059e+37  ;;  %v4556_v31 = vld [vmem:[#allocation42_spill] sm:$0xff] }
 0x463   :  { %v1949_v55 = vsel %vm1946_vm12, %v1948_v7, %v1944_v47 }
 0x464   :  { %2898 = vmatmul.msk.f32.vlgmr.msra.gmra.mxu1 %vm440_vm10, %v4215_v4  ;;  %v1953_v13 = vadd.f32 %v1952_v34, %v4552_v46  ;;  %v1955_v27 = vsub.f32 1.0, %v1949_v55  ;;  %v1957_v17 = vmul.f32 %v1949_v55, %v4142_v57 }
 0x465   :  { %2296 = vmatpush.msra.mxu1 %v4022_v51 }
 0x466   :  { %3054 = vtanh.f32 %v1953_v13 }
 0x467   :  { %2297 = vmatpush.msra.mxu1 %v4032_v48 }
 0x469   :  { %2298 = vmatpush.msra.mxu1 %v4042_v26 }
 0x46b   :  { %2299 = vmatpush.msra.mxu1 %v4063_v60 }
 0x46c   :  { %v3055_v6 = vpop.eup %3054 }
 0x46d   :  { %v1956_v38 = vmul.f32 %v3055_v6, %v1955_v27 }
 0x46f   :  { %v4229_v16 = vadd.f32 %v1957_v17, %v1956_v38 }
 0x471   :  { %2895 = vmatmul.msk.f32.vlgmr.msrb.gmra.mxu2 %vm440_vm10, %v4229_v16  ;;  %2896 = vmatmul.msk.f32.vlgmr.msrb.gmra.mxu3 %vm440_vm10, %v4229_v16 }
 0x472   :  { %2897 = vmatmul.msk.f32.vlgmr.msra.gmra.mxu0 %vm440_vm10, %v4229_v16  ;;  %2904 = vmatmul.msk.f32.vlgmr.msrb.gmra.mxu1 %vm440_vm10, %v4229_v16 }
 0x473   :  { %2185 = vmatpush.msrb.mxu2 %v3906_v18  ;;  %2256 = vmatpush.msrb.mxu3 %v4025_v0 }
 0x474   :  { %2276 = vmatpush.msra.mxu0 %v4029_v54  ;;  %2427 = vmatpush.msrb.mxu1 %v3940_v1 }
 0x475   :  { %2186 = vmatpush.msrb.mxu2 %v3911_v24  ;;  %2257 = vmatpush.msrb.mxu3 %v4035_v42 }
 0x476   :  { %2277 = vmatpush.msra.mxu0 %v4039_v43  ;;  %2428 = vmatpush.msrb.mxu1 %v3946_v2 }
 0x477   :  { %2187 = vmatpush.msrb.mxu2 %v3917_v52  ;;  %2258 = vmatpush.msrb.mxu3 %v4045_v49 }
 0x478   :  { %2278 = vmatpush.msra.mxu0 %v4060_v53  ;;  %2429 = vmatpush.msrb.mxu1 %v3957_v50 }
 0x479   :  { %2899 = vmatmul.msk.f32.vlgmr.msra.gmra.mxu2 %vm440_vm10, %v4215_v4  ;;  %2900 = vmatmul.msk.f32.vlgmr.msra.gmra.mxu3 %vm440_vm10, %v4215_v4 }
 0x47a   :  { %2903 = vmatmul.msk.f32.vlgmr.msrb.gmra.mxu0 %vm440_vm10, %v4229_v16  ;;  %2188 = vmatpush.msrb.mxu2 %v3925_v63  ;;  %v4553_v63 = vld [vmem:[#allocation34_spill] sm:$0xff] }
 0x47b   :  { %2259 = vmatpush.msrb.mxu3 %v4069_v37  ;;  %2279 = vmatpush.msra.mxu0 %v4072_v62 }
 0x47c   :  { %2319 = vmatpush.msra.mxu2 %v4057_v33  ;;  %2430 = vmatpush.msrb.mxu1 %v3965_v56  ;;  %v4554_v56 = vld [vmem:[#allocation41_spill] sm:$0xff] }
 0x47d   :  { %2339 = vmatpush.msra.mxu3 %v4079_v22  ;;  %2359 = vmatpush.msrb.mxu0 %v4082_v8 }
 0x47e   :  { %2320 = vmatpush.msra.mxu2 %v4066_v61 }
 0x47f   :  { %2340 = vmatpush.msra.mxu3 %v4089_v32  ;;  %2360 = vmatpush.msrb.mxu0 %v4094_v10 }
 0x480   :  { %2321 = vmatpush.msra.mxu2 %v4076_v39 }
 0x481   :  { %2341 = vmatpush.msra.mxu3 %v4099_v12  ;;  %2905 = vmatmul.msk.f32.vlgmr.msrb.gmra.mxu2 %vm440_vm10, %v4229_v16 }
 0x482   :  { %2361 = vmatpush.msrb.mxu0 %v4102_v14  ;;  %2322 = vmatpush.msra.mxu2 %v4086_v23 }
 0x483   :  { %2342 = vmatpush.msra.mxu3 %v4107_v19 }
 0x484   :  { %2447 = vmatpush.msrb.mxu2 %v3954_v30  ;;  %2362 = vmatpush.msrb.mxu0 %v4110_v20 }
 0x486   :  { %2448 = vmatpush.msrb.mxu2 %v3962_v36 }
 0x488   :  { %2449 = vmatpush.msrb.mxu2 %v4545_v40 }
 0x48a   :  { %2450 = vmatpush.msrb.mxu2 %v4546_v41 }
 0x4e1   :  { %v2042_v18 = vpop.f32.mrf.mxu1 }
 0x4ef   :  { %v2019_v24 = vpop.f32.mrf.mxu0  ;;  %v2170_v52 = vpop.f32.mrf.mxu1 }
 0x4f0   :  { %v2213_v1 = vadd.f32 %v2170_v52, %v4553_v63 }
 0x4f2   :  { %v2907_v2 = vmul.f32 -1.442695, %v2213_v1 }
 0x4f4   :  { %3056 = vpow2.f32 %v2907_v2  ;;  %v1979_v50 = vpop.f32.mrf.mxu2  ;;  %v1999_v36 = vpop.f32.mrf.mxu3 }
 0x4f5   :  { %v1980_v57 = vadd.f32 %v1979_v50, %v4554_v56  ;;  %v2000_v15 = vadd.f32 %v1999_v36, %v4556_v31 }
 0x4f7   :  { %v2085_v44 = vadd.f32 %v2042_v18, %v1980_v57  ;;  %v2150_v30 = vpop.f32.mrf.mxu0  ;;  %v4557_v18 = vld [vmem:[#allocation44_spill] sm:$0xff] }
 0x4f8   :  { %v2193_v28 = vadd.f32 %v2150_v30, %v4555_v29  ;;  %v2020_v52 = vadd.f32 %v2019_v24, %v4557_v18 }
 0x4f9   :  { %v2901_v25 = vmul.f32 -1.442695, %v2085_v44 }
 0x4fa   :  { %v3057_v21 = vpop.eup %3056  ;;  %v2906_v40 = vmul.f32 -1.442695, %v2193_v28 }
 0x4fb   :  { %3058 = vpow2.f32 %v2901_v25  ;;  %v4282_v41 = vadd.f32 1.0, %v3057_v21 }
 0x4fc   :  { %3060 = vpow2.f32 %v2906_v40  ;;  %v2062_v11 = vpop.f32.mrf.mxu2  ;;  %v2082_v63 = vpop.f32.mrf.mxu3  ;;  %v4558_v40 = vld [vmem:[#allocation26_spill] sm:$0xff] }
 0x4fd   :  { %v2105_v58 = vadd.f32 %v2062_v11, %v2000_v15  ;;  %3062 = vrcp.f32 %v4282_v41  ;;  %v2125_v24 = vadd.f32 %v4558_v40, %v2082_v63  ;;  %vm2223_vm9 = vweird.f32 %v4282_v41 }
 0x4ff   :  { %v2902_v5 = vmul.f32 -1.442695, %v2105_v58 }
 0x501   :  { %v3059_v9 = vpop.eup %3058  ;;  %3064 = vpow2.f32 %v2902_v5 }
 0x502   :  { %v3061_v45 = vpop.eup %3060  ;;  %v2089_v34 = vadd.f32 1.0, %v3059_v9 }
 0x503   :  { %v2197_v59 = vadd.f32 1.0, %v3061_v45  ;;  %v4286_v46 = vpop.eup %3062 }
 0x504   :  { %3066 = vrcp.f32 %v2089_v34  ;;  %v2219_v47 = vmul.f32 %v4286_v46, %v4282_v41  ;;  %v2099_v50 = vand.u32 2147483647, %v2089_v34  ;;  %v2101_v57 = vand.u32 2147483648, %v2089_v34  ;;  %v2190_v29 = vpop.f32.mrf.mxu2 }
 0x505   :  { %3068 = vrcp.f32 %v2197_v59  ;;  %v2209_v44 = vand.u32 2147483648, %v2197_v59  ;;  %v2207_v25 = vand.u32 2147483647, %v2197_v59  ;;  %vm2224_vm15 = vweird.f32 %v4286_v46 }
 0x506   :  { %v2220_v17 = vsub.f32 1.0, %v2219_v47  ;;  %vm2095_vm2 = vweird.f32 %v2089_v34  ;;  %vm2203_vm4 = vweird.f32 %v2197_v59  ;;  %vm2100_vm5 = vcmp.eq.f32.partialorder %v2099_v50, 8.507059e+37  ;;  %vm4302_vm11 = vmor %vm2223_vm9, %vm2224_vm15 }
 0x507   :  { %v3065_v13 = vpop.eup %3064  ;;  %v2102_v5 = vor.u32 1.1754944e-38, %v2101_v57  ;;  %v2210_v9 = vor.u32 1.1754944e-38, %v2209_v44  ;;  %v2233_v45 = vadd.f32 %v4125_v35, %v2190_v29  ;;  %vm2208_vm7 = vcmp.eq.f32.partialorder %v2207_v25, 8.507059e+37  ;;  %v4561_v29 = vld [vmem:[#allocation36_spill] sm:$0xff] }
 0x508   :  { %v2109_v7 = vadd.f32 1.0, %v3065_v13  ;;  %v2221_v21 = vmul.f32 %v4286_v46, %v2220_v17  ;;  %v2229_v50 = vand.u32 2147483648, %v4282_v41 }
 0x50a   :  { %v3067_v55 = vpop.eup %3066  ;;  %3070 = vrcp.f32 %v2109_v7  ;;  %v2119_v57 = vand.u32 2147483647, %v2109_v7  ;;  %vm2115_vm12 = vweird.f32 %v2109_v7 }
 0x50b   :  { %v3069_v27 = vpop.eup %3068  ;;  %v2091_v6 = vmul.f32 %v3067_v55, %v2089_v34  ;;  %vm2096_vm13 = vweird.f32 %v3067_v55  ;;  %v2222_v34 = vadd.f32 %v4286_v46, %v2221_v21 }
 0x50c   :  { %v2199_v38 = vmul.f32 %v3069_v27, %v2197_v59  ;;  %vm2204_vm14 = vweird.f32 %v3069_v27  ;;  %vm2097_vm3 = vmor %vm2095_vm2, %vm2096_vm13  ;;  %v2227_v59 = vand.u32 2147483647, %v4282_v41 }
 0x50d   :  { %v2092_v1 = vsub.f32 1.0, %v2091_v6  ;;  %vm2205_vm6 = vmor %vm2203_vm4, %vm2204_vm14  ;;  %v2226_v41 = vsel %vm4302_vm11, %v4286_v46, %v2222_v34  ;;  %vm2120_vm14 = vcmp.eq.f32.partialorder %v2119_v57, 8.507059e+37  ;;  %v3144_v46 = vld [vmem:[#allocation5 + $0x58] sm:$0xff]  ;;  %v3146_v34 = vld [vmem:[#allocation5 + $0x28] sm:$0xff] }
 0x50e   :  { %v2200_v2 = vsub.f32 1.0, %v2199_v38  ;;  %v2121_v38 = vand.u32 2147483648, %v2109_v7  ;;  %vm2228_vm15 = vcmp.eq.f32.partialorder %v2227_v59, 8.507059e+37 }
 0x50f   :  { %v2093_v30 = vmul.f32 %v3067_v55, %v2092_v1 }
 0x510   :  { %v2201_v28 = vmul.f32 %v3069_v27, %v2200_v2  ;;  %v3071_v36 = vpop.eup %3070  ;;  %v2122_v25 = vor.u32 1.1754944e-38, %v2121_v38 }
 0x511   :  { %v2111_v15 = vmul.f32 %v3071_v36, %v2109_v7  ;;  %v2094_v11 = vadd.f32 %v3067_v55, %v2093_v30  ;;  %vm2116_vm8 = vweird.f32 %v3071_v36 }
 0x512   :  { %v2202_v58 = vadd.f32 %v3069_v27, %v2201_v28  ;;  %vm2117_vm13 = vmor %vm2115_vm12, %vm2116_vm8 }
 0x513   :  { %v2112_v13 = vsub.f32 1.0, %v2111_v15  ;;  %v2098_v47 = vsel %vm2097_vm3, %v3067_v55, %v2094_v11 }
 0x514   :  { %v2206_v6 = vsel %vm2205_vm6, %v3069_v27, %v2202_v58  ;;  %v2103_v17 = vsel %vm2100_vm5, %v2102_v5, %v2098_v47 }
 0x515   :  { %v2211_v63 = vsel %vm2208_vm7, %v2210_v9, %v2206_v6  ;;  %v2113_v1 = vmul.f32 %v3071_v36, %v2112_v13  ;;  %v2126_v2 = vmul.f32 %v2125_v24, %v2103_v17  ;;  %v2230_v24 = vor.u32 1.1754944e-38, %v2229_v50 }
 0x516   :  { %v2234_v30 = vmul.f32 %v2233_v45, %v2211_v63 }
 0x517   :  { %v2114_v27 = vadd.f32 %v3071_v36, %v2113_v1  ;;  %v2127_v44 = vadd.f32 %v2126_v2, %v2020_v52  ;;  %v2231_v11 = vsel %vm2228_vm15, %v2230_v24, %v2226_v41 }
 0x518   :  { %v2235_v28 = vadd.f32 %v2234_v30, %v4561_v29  ;;  %v2237_v7 = vsub.f32 1.0, %v2231_v11 }
 0x519   :  { %v2118_v21 = vsel %vm2117_vm13, %v3071_v36, %v2114_v27  ;;  %3072 = vtanh.f32 %v2127_v44  ;;  %v2239_v36 = vmul.f32 %v2231_v11, %v4229_v16  ;;  %v3145_v16 = vld [vmem:[#allocation5 + $0x40] sm:$0xff] }
 0x51a   :  { %3074 = vtanh.f32 %v2235_v28  ;;  %v2123_v15 = vsel %vm2120_vm14, %v2122_v25, %v2118_v21 }
 0x51b   :  { %v2129_v58 = vsub.f32 1.0, %v2123_v15  ;;  %v2131_v45 = vmul.f32 %v2123_v15, %v4215_v4 }
 0x51f   :  { %v3073_v5 = vpop.eup %3072 }
 0x520   :  { %v3075_v52 = vpop.eup %3074  ;;  %v2130_v9 = vmul.f32 %v3073_v5, %v2129_v58 }
 0x521   :  { %v2238_v13 = vmul.f32 %v3075_v52, %v2237_v7 }
 0x522   :  { %v4312_v47 = vadd.f32 %v2131_v45, %v2130_v9 }
 0x523   :  { %v4314_v6 = vadd.f32 %v2239_v36, %v2238_v13 }
 0x524   :  { %2911 = vmatmul.msk.f32.vlgmr.msra.gmra.mxu2 %vm440_vm10, %v4312_v47 }
 0x525   :  { %2908 = vmatmul.msk.f32.vlgmr.msrb.gmra.mxu3 %vm440_vm10, %v4314_v6  ;;  %2909 = vmatmul.msk.f32.vlgmr.msra.gmra.mxu0 %vm440_vm10, %v4314_v6 }
 0x526   :  { %2910 = vmatmul.msk.f32.vlgmr.msra.gmra.mxu1 %vm440_vm10, %v4314_v6  ;;  %2467 = vmatpush.msrb.mxu3 %v3144_v46 }
 0x527   :  { %2538 = vmatpush.msra.mxu0 %v4025_v0  ;;  %2558 = vmatpush.msra.mxu1 %v4029_v54  ;;  %v3147_v0 = vld [vmem:[#allocation5 + $0x10] sm:$0xff] }
 0x528   :  { %2468 = vmatpush.msrb.mxu3 %v3145_v16  ;;  %2578 = vmatpush.msra.mxu2 %v4022_v51 }
 0x529   :  { %2539 = vmatpush.msra.mxu0 %v4035_v42  ;;  %2559 = vmatpush.msra.mxu1 %v4039_v43 }
 0x52a   :  { %2469 = vmatpush.msrb.mxu3 %v3146_v34  ;;  %2579 = vmatpush.msra.mxu2 %v4032_v48 }
 0x52b   :  { %2540 = vmatpush.msra.mxu0 %v4045_v49  ;;  %2560 = vmatpush.msra.mxu1 %v4060_v53 }
 0x52c   :  { %2917 = vmatmul.msk.f32.vlgmr.msrb.gmra.mxu2 %vm440_vm10, %v4314_v6  ;;  %2470 = vmatpush.msrb.mxu3 %v3147_v0 }
 0x52d   :  { %2912 = vmatmul.msk.f32.vlgmr.msra.gmra.mxu3 %vm440_vm10, %v4312_v47  ;;  %2913 = vmatmul.msk.f32.vlgmr.msrb.gmra.mxu0 %vm440_vm10, %v4312_v47 }
 0x52e   :  { %2916 = vmatmul.msk.f32.vlgmr.msrb.gmra.mxu1 %vm440_vm10, %v4314_v6  ;;  %2601 = vmatpush.msra.mxu3 %v4057_v33  ;;  %v4562_v33 = vld [vmem:[#allocation37_spill] sm:$0xff] }
 0x52f   :  { %2580 = vmatpush.msra.mxu2 %v4042_v26  ;;  %2541 = vmatpush.msra.mxu0 %v4069_v37 }
 0x530   :  { %2602 = vmatpush.msra.mxu3 %v4066_v61  ;;  %2561 = vmatpush.msra.mxu1 %v4072_v62 }
 0x531   :  { %2581 = vmatpush.msra.mxu2 %v4063_v60  ;;  %2621 = vmatpush.msrb.mxu0 %v4079_v22  ;;  %v4563_v22 = vld [vmem:[#allocation38_spill] sm:$0xff] }
 0x532   :  { %2603 = vmatpush.msra.mxu3 %v4076_v39  ;;  %2641 = vmatpush.msrb.mxu1 %v4082_v8 }
 0x533   :  { %2622 = vmatpush.msrb.mxu0 %v4089_v32 }
 0x534   :  { %2604 = vmatpush.msra.mxu3 %v4086_v23  ;;  %2642 = vmatpush.msrb.mxu1 %v4094_v10 }
 0x535   :  { %2918 = vmatmul.msk.f32.vlgmr.msrb.gmra.mxu3 %vm440_vm10, %v4314_v6  ;;  %2623 = vmatpush.msrb.mxu0 %v4099_v12 }
 0x536   :  { %2643 = vmatpush.msrb.mxu1 %v4102_v14 }
 0x537   :  { %2624 = vmatpush.msrb.mxu0 %v4107_v19 }
 0x538   :  { %2644 = vmatpush.msrb.mxu1 %v4110_v20 }
 0x5a2   :  { %v2281_v49 = vpop.f32.mrf.mxu0 }
 0x5a3   :  { %v2301_v51 = vpop.f32.mrf.mxu1  ;;  %v2282_v37 = vadd.f32 %v2281_v49, %v4556_v31 }
 0x5a4   :  { %v2302_v27 = vadd.f32 %v2301_v51, %v4557_v18 }
 0x5a7   :  { %v2324_v54 = vpop.f32.mrf.mxu2 }
 0x5a8   :  { %v2261_v48 = vpop.f32.mrf.mxu3 }
 0x5a9   :  { %v2262_v42 = vadd.f32 %v2261_v48, %v4554_v56 }
 0x5aa   :  { %v2364_v59 = vpop.f32.mrf.mxu0 }
 0x5ab   :  { %v2367_v43 = vadd.f32 %v2324_v54, %v2262_v42  ;;  %v2432_v26 = vpop.f32.mrf.mxu1  ;;  %v2407_v28 = vadd.f32 %v4558_v40, %v2364_v59 }
 0x5ac   :  { %v2475_v53 = vadd.f32 %v2432_v26, %v4562_v33 }
 0x5ad   :  { %v2914_v60 = vmul.f32 -1.442695, %v2367_v43 }
 0x5ae   :  { %v2919_v61 = vmul.f32 -1.442695, %v2475_v53 }
 0x5af   :  { %3076 = vpow2.f32 %v2914_v60  ;;  %v2452_v62 = vpop.f32.mrf.mxu2 }
 0x5b0   :  { %3078 = vpow2.f32 %v2919_v61  ;;  %v2344_v39 = vpop.f32.mrf.mxu3  ;;  %v2495_v8 = vadd.f32 %v2452_v62, %v4563_v22  ;;  %v4566_v22 = vld [vmem:[#allocation39_spill] sm:$0xff] }
 0x5b1   :  { %v2387_v23 = vadd.f32 %v2344_v39, %v2282_v37 }
 0x5b2   :  { %v2920_v32 = vmul.f32 -1.442695, %v2495_v8 }
 0x5b3   :  { %v2915_v10 = vmul.f32 -1.442695, %v2387_v23 }
 0x5b4   :  { %3080 = vpow2.f32 %v2920_v32 }
 0x5b5   :  { %v3077_v12 = vpop.eup %3076  ;;  %3082 = vpow2.f32 %v2915_v10 }
 0x5b6   :  { %v3079_v14 = vpop.eup %3078  ;;  %v2371_v19 = vadd.f32 1.0, %v3077_v12 }
 0x5b7   :  { %v2479_v20 = vadd.f32 1.0, %v3079_v14 }
 0x5b8   :  { %3084 = vrcp.f32 %v2371_v19  ;;  %v2381_v57 = vand.u32 2147483647, %v2371_v19  ;;  %v2383_v29 = vand.u32 2147483648, %v2371_v19  ;;  %v2472_v25 = vpop.f32.mrf.mxu3  ;;  %vm2377_vm2 = vweird.f32 %v2371_v19 }
 0x5b9   :  { %3086 = vrcp.f32 %v2479_v20  ;;  %v2489_v41 = vand.u32 2147483647, %v2479_v20  ;;  %v2491_v24 = vand.u32 2147483648, %v2479_v20  ;;  %vm2485_vm4 = vweird.f32 %v2479_v20 }
 0x5ba   :  { %v3081_v38 = vpop.eup %3080  ;;  %vm4370_vm5 = vcmp.eq.f32.partialorder %v2381_v57, 8.507059e+37  ;;  %v2384_v45 = vor.u32 1.1754944e-38, %v2383_v29  ;;  %v2515_v36 = vadd.f32 %v4125_v35, %v2472_v25 }
 0x5bb   :  { %v3083_v17 = vpop.eup %3082  ;;  %v4362_v63 = vadd.f32 1.0, %v3081_v38  ;;  %vm2490_vm8 = vcmp.eq.f32.partialorder %v2489_v41, 8.507059e+37  ;;  %v2492_v34 = vor.u32 1.1754944e-38, %v2491_v24 }
 0x5bc   :  { %v4364_v1 = vadd.f32 1.0, %v3083_v17 }
 0x5bd   :  { %3088 = vrcp.f32 %v4362_v63  ;;  %vm2505_vm9 = vweird.f32 %v4362_v63  ;;  %v2511_v60 = vand.u32 2147483648, %v4362_v63  ;;  %v2509_v39 = vand.u32 2147483647, %v4362_v63 }
 0x5be   :  { %v3085_v2 = vpop.eup %3084  ;;  %3090 = vrcp.f32 %v4364_v1  ;;  %v2403_v54 = vand.u32 2147483648, %v4364_v1  ;;  %v2401_v33 = vand.u32 2147483647, %v4364_v1  ;;  %vm2397_vm14 = vweird.f32 %v4364_v1 }
 0x5bf   :  { %v3087_v30 = vpop.eup %3086  ;;  %v2373_v50 = vmul.f32 %v3085_v2, %v2371_v19  ;;  %vm2378_vm3 = vweird.f32 %v3085_v2  ;;  %v2512_v12 = vor.u32 1.1754944e-38, %v2511_v60 }
 0x5c0   :  { %v2481_v55 = vmul.f32 %v3087_v30, %v2479_v20  ;;  %vm2486_vm6 = vweird.f32 %v3087_v30  ;;  %vm2379_vm7 = vmor %vm2377_vm2, %vm2378_vm3  ;;  %v2404_v32 = vor.u32 1.1754944e-38, %v2403_v54  ;;  %vm2402_vm3 = vcmp.eq.f32.partialorder %v2401_v33, 8.507059e+37 }
 0x5c1   :  { %v2374_v44 = vsub.f32 1.0, %v2373_v50  ;;  %vm2487_vm11 = vmor %vm2485_vm4, %vm2486_vm6  ;;  %vm2510_vm4 = vcmp.eq.f32.partialorder %v2509_v39, 8.507059e+37 }
 0x5c2   :  { %v2482_v21 = vsub.f32 1.0, %v2481_v55 }
 0x5c3   :  { %v3089_v15 = vpop.eup %3088  ;;  %v2375_v11 = vmul.f32 %v3085_v2, %v2374_v44 }
 0x5c4   :  { %v3091_v58 = vpop.eup %3090  ;;  %v2501_v7 = vmul.f32 %v3089_v15, %v4362_v63  ;;  %v2483_v52 = vmul.f32 %v3087_v30, %v2482_v21  ;;  %vm2506_vm12 = vweird.f32 %v3089_v15 }
 0x5c5   :  { %v2376_v9 = vadd.f32 %v3085_v2, %v2375_v11  ;;  %v2393_v13 = vmul.f32 %v3091_v58, %v4364_v1  ;;  %vm2398_vm13 = vweird.f32 %v3091_v58  ;;  %vm2507_vm15 = vmor %vm2505_vm9, %vm2506_vm12  ;;  %v2699_v11 = vld [vmem:[%s4461_s9 + $0x10] sm:$0xff] }
 0x5c6   :  { %v2502_v46 = vsub.f32 1.0, %v2501_v7  ;;  %v2484_v16 = vadd.f32 %v3087_v30, %v2483_v52  ;;  %vm2399_vm2 = vmor %vm2397_vm14, %vm2398_vm13  ;;  %v2697_v7 = vld [vmem:[%s4461_s9] sm:$0xff]  ;;  %vm2718_vm14 = vcmask 1041408  }
 0x5c7   :  { %v2380_v0 = vsel %vm2379_vm7, %v3085_v2, %v2376_v9  ;;  %v2394_v51 = vsub.f32 1.0, %v2393_v13 }
 0x5c8   :  { %v2385_v48 = vsel %vm4370_vm5, %v2384_v45, %v2380_v0  ;;  %v2503_v42 = vmul.f32 %v3089_v15, %v2502_v46  ;;  %v2488_v43 = vsel %vm2487_vm11, %v3087_v30, %v2484_v16 }
 0x5c9   :  { %v2408_v35 = vmul.f32 %v2407_v28, %v2385_v48  ;;  %v2395_v26 = vmul.f32 %v3091_v58, %v2394_v51  ;;  %v2493_v49 = vsel %vm2490_vm8, %v2492_v34, %v2488_v43 }
 0x5ca   :  { %v2504_v53 = vadd.f32 %v3089_v15, %v2503_v42  ;;  %v2516_v61 = vmul.f32 %v2515_v36, %v2493_v49 }
 0x5cb   :  { %v2409_v37 = vadd.f32 %v2408_v35, %v2302_v27  ;;  %v2396_v62 = vadd.f32 %v3091_v58, %v2395_v26 }
 0x5cc   :  { %v2517_v8 = vadd.f32 %v2516_v61, %v4566_v22  ;;  %v2508_v10 = vsel %vm2507_vm15, %v3089_v15, %v2504_v53  ;;  %v2700_v15 = vld [vmem:[%s4461_s9 + $0x18] sm:$0xff]  ;;  %vm2720_vm15 = vcmask 1042432  }
 0x5cd   :  { %3092 = vtanh.f32 %v2409_v37  ;;  %v2400_v23 = vsel %vm2399_vm2, %v3091_v58, %v2396_v62  ;;  %v2513_v19 = vsel %vm2510_vm4, %v2512_v12, %v2508_v10  ;;  %2748 = vmatpush.msrb.mxu2 %v2700_v15  ;;  %2793 = vmatpush.msrb.mxu3 %v2700_v15  ;;  %v4568_v10 = vld [vmem:[#allocation21_spill] sm:$0xff]  ;;  %vm2722_vm2 = vcmask 1043456  }
 0x5ce   :  { %3094 = vtanh.f32 %v2517_v8  ;;  %v2405_v14 = vsel %vm2402_vm3, %v2404_v32, %v2400_v23  ;;  %v2519_v17 = vsub.f32 1.0, %v2513_v19  ;;  %v2521_v59 = vmul.f32 %v2513_v19, %v4314_v6  ;;  %v4567_v23 = vld [vmem:[#allocation40_spill] sm:$0xff] }
 0x5cf   :  { %v2411_v20 = vsub.f32 1.0, %v2405_v14  ;;  %v2413_v63 = vmul.f32 %v2405_v14, %v4312_v47  ;;  %2749 = vmatpush.msrb.mxu2 %v2699_v11  ;;  %2794 = vmatpush.msrb.mxu3 %v2699_v11  ;;  %v2702_v32 = vrot.slane %v4567_v23, 7  ;;  %v2704_v12 = vrot.slane %v4568_v10, 6  ;;  %v4569_v14 = vld [vmem:[#allocation45_spill] sm:$0xff] }
 0x5d0   :  { %v2757_v19 = vrot.slane %v4569_v14, 1  ;;  %vm2726_vm3 = vcmask 1045504   ;;  %vm2728_vm4 = vcmask 1046528  }
 0x5d3   :  { %v3093_v38 = vpop.eup %3092 }
 0x5d4   :  { %v3095_v1 = vpop.eup %3094  ;;  %v2412_v2 = vmul.f32 %v3093_v38, %v2411_v20  ;;  %v2759_v20 = vrot.slane %v4568_v10, 7  ;;  %v2771_v38 = vsel %vm321_vm1, %v2757_v19, %v4567_v23 }
 0x5d5   :  { %v2520_v30 = vmul.f32 %v3095_v1, %v2519_v17  ;;  %v2706_v1 = vrot.slane %v4133_v3, 5 }
 0x5d6   :  { %v4391_v50 = vadd.f32 %v2413_v63, %v2412_v2  ;;  %v2761_v63 = vrot.slane %v4133_v3, 6  ;;  %v2772_v3 = vsel %vm2718_vm14, %v2771_v38, %v2759_v20 }
 0x5d7   :  { %v2522_v57 = vadd.f32 %v2521_v59, %v2520_v30  ;;  %v2708_v59 = vrot.slane %v4215_v4, 4 }
 0x5d8   :  { %2924 = vmatmul.msk.f32.vlgmr.msra.gmra.mxu3 %vm440_vm10, %v4391_v50 }
 0x5d9   :  { %2921 = vmatmul.msk.f32.vlgmr.msra.gmra.mxu0 %vm440_vm10, %v2522_v57  ;;  %2922 = vmatmul.msk.f32.vlgmr.msra.gmra.mxu1 %vm440_vm10, %v2522_v57 }
 0x5da   :  { %2923 = vmatmul.msk.f32.vlgmr.msra.gmra.mxu2 %vm440_vm10, %v2522_v57  ;;  %v2763_v57 = vrot.slane %v4215_v4, 5 }
 0x5e1   :  { %2925 = vmatmul.msk.f32.vlgmr.msrb.gmra.mxu0 %vm440_vm10, %v4391_v50  ;;  %2926 = vmatmul.msk.f32.vlgmr.msrb.gmra.mxu1 %vm440_vm10, %v4391_v50 }
 0x656   :  { %v2543_v55 = vpop.f32.mrf.mxu0  ;;  %v2563_v27 = vpop.f32.mrf.mxu1 }
 0x657   :  { %v2544_v6 = vadd.f32 %v2543_v55, %v4554_v56  ;;  %v2564_v28 = vadd.f32 %v2563_v27, %v4556_v31  ;;  %v2698_v31 = vld [vmem:[%s4461_s9 + $0x8] sm:$0xff]  ;;  %v2710_v27 = vrot.slane %v4312_v47, 3 }
 0x658   :  { %2750 = vmatpush.msrb.mxu2 %v2698_v31  ;;  %2795 = vmatpush.msrb.mxu3 %v2698_v31 }
 0x65a   :  { %2751 = vmatpush.msrb.mxu2 %v2697_v7  ;;  %2796 = vmatpush.msrb.mxu3 %v2697_v7 }
 0x65b   :  { %v2606_v44 = vpop.f32.mrf.mxu3 }
 0x65c   :  { %v2649_v29 = vadd.f32 %v2606_v44, %v2544_v6  ;;  %v2765_v44 = vrot.slane %v4312_v47, 4 }
 0x65d   :  { %v2583_v42 = vpop.f32.mrf.mxu2 }
 0x65e   :  { %v2927_v25 = vmul.f32 -1.442695, %v2649_v29  ;;  %v2626_v21 = vpop.f32.mrf.mxu0  ;;  %v2646_v54 = vpop.f32.mrf.mxu1  ;;  %v2584_v60 = vadd.f32 %v2583_v42, %v4557_v18  ;;  %v2717_v18 = vsel %vm321_vm1, %v4569_v14, %v2702_v32  ;;  %v2712_v29 = vrot.slane %v4391_v50, 2 }
 0x65f   :  { %v2669_v41 = vadd.f32 %v2626_v21, %v2564_v28  ;;  %v2689_v49 = vadd.f32 %v4558_v40, %v2646_v54  ;;  %v2719_v2 = vsel %vm2718_vm14, %v2717_v18, %v2704_v12  ;;  %vm2724_vm1 = vcmask 1044480  }
 0x660   :  { %3096 = vpow2.f32 %v2927_v25  ;;  %v2767_v28 = vrot.slane %v4391_v50, 3  ;;  %v2721_v21 = vsel %vm2720_vm15, %v2719_v2, %v2706_v1 }
 0x661   :  { %v2928_v24 = vmul.f32 -1.442695, %v2669_v41  ;;  %v2773_v41 = vsel %vm2720_vm15, %v2772_v3, %v2761_v63  ;;  %v2723_v4 = vsel %vm2722_vm2, %v2721_v21, %v2708_v59 }
 0x662   :  { %v2725_v11 = vsel %vm2724_vm1, %v2723_v4, %v2710_v27 }
 0x663   :  { %3098 = vpow2.f32 %v2928_v24  ;;  %v2774_v24 = vsel %vm2722_vm2, %v2773_v41, %v2763_v57 }
 0x664   :  { %v2775_v47 = vsel %vm2724_vm1, %v2774_v24, %v2765_v44 }
 0x665   :  { %v2776_v31 = vsel %vm2726_vm3, %v2775_v47, %v2767_v28 }
 0x666   :  { %v3097_v56 = vpop.eup %3096 }
 0x667   :  { %v2653_v58 = vadd.f32 1.0, %v3097_v56 }
 0x669   :  { %v3099_v5 = vpop.eup %3098  ;;  %3100 = vrcp.f32 %v2653_v58  ;;  %v2665_v16 = vand.u32 2147483648, %v2653_v58  ;;  %v2663_v0 = vand.u32 2147483647, %v2653_v58  ;;  %vm2659_vm6 = vweird.f32 %v2653_v58 }
 0x66a   :  { %v2673_v52 = vadd.f32 1.0, %v3099_v5 }
 0x66b   :  { %v2666_v35 = vor.u32 1.1754944e-38, %v2665_v16  ;;  %vm2664_vm8 = vcmp.eq.f32.partialorder %v2663_v0, 8.507059e+37 }
 0x66c   :  { %3102 = vrcp.f32 %v2673_v52  ;;  %v2685_v61 = vand.u32 2147483648, %v2673_v52  ;;  %vm2679_vm11 = vweird.f32 %v2673_v52  ;;  %v2683_v62 = vand.u32 2147483647, %v2673_v52 }
 0x66e   :  { %v2686_v8 = vor.u32 1.1754944e-38, %v2685_v61  ;;  %vm2684_vm13 = vcmp.eq.f32.partialorder %v2683_v62, 8.507059e+37 }
 0x66f   :  { %v3101_v9 = vpop.eup %3100 }
 0x670   :  { %v2655_v45 = vmul.f32 %v3101_v9, %v2653_v58  ;;  %vm2660_vm5 = vweird.f32 %v3101_v9  ;;  %v2727_v58 = vsel %vm2726_vm3, %v2725_v11, %v2712_v29 }
 0x671   :  { %vm2661_vm7 = vmor %vm2659_vm6, %vm2660_vm5 }
 0x672   :  { %v3103_v13 = vpop.eup %3102  ;;  %v2656_v36 = vsub.f32 1.0, %v2655_v45 }
 0x673   :  { %v2675_v46 = vmul.f32 %v3103_v13, %v2673_v52  ;;  %vm2680_vm9 = vweird.f32 %v3103_v13 }
 0x674   :  { %v2657_v34 = vmul.f32 %v3101_v9, %v2656_v36  ;;  %vm2681_vm12 = vmor %vm2679_vm11, %vm2680_vm9 }
 0x675   :  { %v2676_v51 = vsub.f32 1.0, %v2675_v46 }
 0x676   :  { %v2658_v48 = vadd.f32 %v3101_v9, %v2657_v34 }
 0x677   :  { %v2677_v43 = vmul.f32 %v3103_v13, %v2676_v51 }
 0x678   :  { %v2662_v26 = vsel %vm2661_vm7, %v3101_v9, %v2658_v48 }
 0x679   :  { %v2678_v33 = vadd.f32 %v3103_v13, %v2677_v43  ;;  %v2667_v53 = vsel %vm2664_vm8, %v2666_v35, %v2662_v26 }
 0x67a   :  { %v2690_v37 = vmul.f32 %v2689_v49, %v2667_v53 }
 0x67b   :  { %v2682_v22 = vsel %vm2681_vm12, %v3103_v13, %v2678_v33 }
 0x67c   :  { %v2691_v39 = vadd.f32 %v2690_v37, %v2584_v60  ;;  %v2687_v40 = vsel %vm2684_vm13, %v2686_v8, %v2682_v22 }
 0x67d   :  { %v2693_v17 = vsub.f32 1.0, %v2687_v40  ;;  %v2695_v6 = vmul.f32 %v2687_v40, %v4391_v50  ;;  %v2945_v50 = vld [vmem:[%s4462_s10] ss:$0 sm:$0xff] }
 0x67e   :  { %3104 = vtanh.f32 %v2691_v39 }
 0x684   :  { %v3105_v30 = vpop.eup %3104 }
 0x685   :  { %v2694_v55 = vmul.f32 %v3105_v30, %v2693_v17 }
 0x687   :  { %v2696_v25 = vadd.f32 %v2695_v6, %v2694_v55 }
 0x689   :  { %v2715_v15 = vrot.slane %v2696_v25, 1  ;;  %v2769_v56 = vrot.slane %v2696_v25, 2 }
 0x68b   :  { %v2729_v5 = vsel %vm2728_vm4, %v2727_v58, %v2715_v15  ;;  %v2777_v7 = vsel %vm2728_vm4, %v2776_v31, %v2769_v56 }
 0x68c   :  { %2929 = vmatmul.msk.f32.vlgmr.msrb.gmra.mxu2 %vm440_vm10, %v2729_v5  ;;  %2930 = vmatmul.msk.f32.vlgmr.msrb.gmra.mxu3 %vm440_vm10, %v2777_v7 }
 0x70f   :  { %v2753_v52 = vpop.f32.mrf.mxu2  ;;  %v2798_v9 = vpop.f32.mrf.mxu3 }
 0x710   :  { %v2754_v45 = vadd.f32 %v2945_v50, %v2753_v52  ;;  %v2799_v13 = vadd.f32 %v2945_v50, %v2798_v9 }
 0x712   :  { %2756 = vst.msk [vmem:[#allocation13] sm:$0xff] %vm183_vm0, %v2754_v45 }
 0x713   :  { %2802 = vst.msk [vmem:[#allocation13 + $0x8] sm:$0xff] %vm183_vm0, %v2799_v13 }
 0x714   :  { %2815 = dma.vmem_to_hbm [thread:$0]  %s2808_s2, 256, %s2810_s13, [#allocation4], %s3331_s16, %s3331_s16, %s3332_s17  }
 0x715   :  { %3324 = dma.done.wait [#allocation4], 256  }
 0x716   :  { %3325 = vsyncadd [#allocation4], 4294967040 }
 0x717   :  { %2820 = vsyncpa [#allocation3], 1 }
 0x718   :  { %2821 = vsyncpa [#allocation6], 1 }
 0x719   :  { %2822 = vsyncpa [#allocation9], 1 }
 0x71a   :  { %2823 = vsyncpa [#allocation12], 1 }
 0x71b   :  { %2824 = vsyncpa [#allocation4], 1 }

</bundles_post_ra>
